<compile_context>
chip_gen: v7x
topology: tpu7x:2x2x1
jax: 0.10.0
libtpu: 0.0.40
codegen_flags: <defaults>
</compile_context>

<pallas_src>
import jax
import jax.numpy as jnp
import numpy as np
from jax import lax
from jax.experimental import pallas as pl
from jax.experimental.pallas import tpu as pltpu

# Model hyper-parameters.
# TODO(synk): vocab_size is dataset-derived (pandas CSV scan) in the original; fixed to 100 here.
vocab_size = 100
embedding_dim = 32
hidden_size = 256
output_size = 2
OUT_PAD = 128          # lane-dense padded logits width


def bilstm_fc_kernel(ids_ref, ptab_f_ref, ptab_b_ref, whh_hbm_ref,
                     wfc_f_ref, wfc_b_ref, bfc_ref, out_ref,
                     pre_ref, whh_vmem, dma_sem):
    """ids: (T*B, 1) int32 time-major-flat token ids;
    ptab_f/ptab_b: (V, 4H) bf16 = embedding @ W_ih^T + b_ih + b_hh (fwd / bwd dirs);
    whh_hbm: (H, 4H) bf16 in HBM (manually DMA'd); wfc_f/wfc_b: (H, OUT_PAD) f32;
    bfc: (1, OUT_PAD) f32; out: (B, OUT_PAD) f32;
    scratch: pre (T*B, 4H) f32 fwd pre-acts, whh_vmem (H, 4H) bf16, dma_sem."""
    TB = ids_ref.shape[0]
    V = ptab_f_ref.shape[0]
    H = whh_vmem.shape[0]
    B = out_ref.shape[0]
    T = TB // B

    # ---- Kick off the W_hh HBM->VMEM copy; overlap with projection + backward cell ----
    whh_cp = pltpu.make_async_copy(whh_hbm_ref, whh_vmem, dma_sem)
    whh_cp.start()

    def sigmoid(x):
        # Single EUP op (tanh) instead of exp + divide on the serial critical path.
        return 0.5 * jnp.tanh(0.5 * x) + 0.5

    def cell(gates, c):
        # PyTorch gate order: i, f, g, o (slices are lane-aligned: H = 256).
        i = sigmoid(gates[:, 0 * H:1 * H])
        f = sigmoid(gates[:, 1 * H:2 * H])
        g = jnp.tanh(gates[:, 2 * H:3 * H])
        o = sigmoid(gates[:, 3 * H:4 * H])
        c_new = f * c + i * g
        return o * jnp.tanh(c_new), c_new

    # ---- Fused embedding + input projection (forward dir, all T steps) ----
    # One-hot built from int ids; bias is folded into ptab (each one-hot row sums to 1).
    ids_all = ids_ref[...]                                               # (TB, 1) int32
    lane_v = lax.broadcasted_iota(jnp.int32, (TB, V), 1)
    onehot_f = (ids_all == lane_v).astype(jnp.bfloat16)                  # (TB, V)
    pre_ref[...] = jnp.dot(onehot_f, ptab_f_ref[...],
                           preferred_element_type=jnp.float32)           # (TB, 4H) f32

    # ---- Backward direction: one cell step on the last timestep from zero state ----
    ids_last = ids_ref[TB - B:, :]                                       # (B, 1) int32
    onehot_b = (ids_last == lax.broadcasted_iota(jnp.int32, (B, V), 1)).astype(jnp.bfloat16)
    gates_b = jnp.dot(onehot_b, ptab_b_ref[...],
                      preferred_element_type=jnp.float32)                # (B, 4H)
    zeros_bh = jnp.zeros((B, H), jnp.float32)
    h_bwd, _ = cell(gates_b, zeros_bh)

    # ---- Serial forward recurrence: only h @ W_hh + nonlinearities on the critical path ----
    whh_cp.wait()                                # W_hh now resident in VMEM

    def fwd_step(t, carry):
        h, c = carry
        row = pl.multiple_of(t * B, 8)           # B is a multiple of 8 (padded in wrapper)
        gates = (jnp.dot(h.astype(jnp.bfloat16), whh_vmem[...],
                         preferred_element_type=jnp.float32)
                 + pre_ref[pl.ds(row, B), :])
        return cell(gates, c)

    # unroll=True gives the scheduler full visibility across the T=8 steps.
    h_fwd, _ = lax.fori_loop(0, T, fwd_step, (zeros_bh, zeros_bh), unroll=True)

    # ---- Final FC, split-weight form (no (B, 2H) concat), lane-dense 128-wide store ----
    out_ref[...] = (jnp.dot(h_fwd, wfc_f_ref[...], preferred_element_type=jnp.float32)
                    + jnp.dot(h_bwd, wfc_b_ref[...], preferred_element_type=jnp.float32)
                    + bfc_ref[...])


def init_params(key):
    """Raw PyTorch-layout f32 parameters (used by the pure-JAX reference)."""
    ks = jax.random.split(key, 12)
    H, E, O, V = hidden_size, embedding_dim, output_size, vocab_size
    k_lstm = 1.0 / np.sqrt(H)                      # PyTorch LSTM default init
    xavier = np.sqrt(6.0 / (2 * H + O))            # xavier_uniform_ on fc.weight

    def u(k, shape, bound):
        return jax.random.uniform(k, shape, jnp.float32, -bound, bound)

    return {
        "embedding": jax.random.normal(ks[0], (V, E), jnp.float32),   # nn.Embedding default
        "wih_f": u(ks[1], (4 * H, E), k_lstm),
        "whh_f": u(ks[2], (4 * H, H), k_lstm),
        "bih_f": u(ks[3], (4 * H,), k_lstm),
        "bhh_f": u(ks[4], (4 * H,), k_lstm),
        "wih_b": u(ks[5], (4 * H, E), k_lstm),
        "whh_b": u(ks[6], (4 * H, H), k_lstm),     # unused in forward (see note above)
        "bih_b": u(ks[7], (4 * H,), k_lstm),
        "bhh_b": u(ks[8], (4 * H,), k_lstm),
        "wfc": u(ks[9], (O, 2 * H), xavier),
        "bfc": jnp.zeros((O,), jnp.float32),
    }


def prepare_kernel_params(p):
    """One-time repacking into kernel layout:
    embedding fused with the input projections (bias folded in) -> (V, 4H) bf16 tables;
    W_hh pre-transposed to bf16; FC weights pre-split and zero-padded to 128 lanes."""
    H, O = hidden_size, output_size
    # Combined table in f32, single bf16 rounding at the end (>= accuracy of bf16 x @ bf16 W).
    ptab_f = p["embedding"] @ p["wih_f"].T + p["bih_f"] + p["bhh_f"]      # (V, 4H)
    ptab_b = p["embedding"] @ p["wih_b"].T + p["bih_b"] + p["bhh_b"]      # (V, 4H)
    wfc_t = p["wfc"].T                                                    # (2H, O)
    wfc_f = jnp.zeros((H, OUT_PAD), jnp.float32).at[:, :O].set(wfc_t[:H])
    wfc_b = jnp.zeros((H, OUT_PAD), jnp.float32).at[:, :O].set(wfc_t[H:])
    bfc = jnp.zeros((1, OUT_PAD), jnp.float32).at[0, :O].set(p["bfc"])
    return {
        "ptab_f": ptab_f.astype(jnp.bfloat16),
        "ptab_b": ptab_b.astype(jnp.bfloat16),
        "whh_f_t": p["whh_f"].T.astype(jnp.bfloat16),                     # (H, 4H)
        "wfc_f": wfc_f,
        "wfc_b": wfc_b,
        "bfc": bfc,
    }


def lstm_classifier_forward(x_ids, kp):
    B, T = x_ids.shape
    H = hidden_size
    B_pad = max(8, ((B + 7) // 8) * 8)             # f32 sublane granule

    # Only trivial int32 plumbing outside the kernel: pad + time-major flatten of the ids.
    ids = jnp.pad(x_ids, ((0, B_pad - B), (0, 0)))                       # pad rows -> token 0
    ids_tm = jnp.transpose(ids).reshape(T * B_pad, 1).astype(jnp.int32)  # (T*B_pad, 1)

    vmem = pl.BlockSpec(memory_space=pltpu.MemorySpace.VMEM)
    hbm = pl.BlockSpec(memory_space=pl.ANY)        # W_hh stays in HBM; kernel DMAs it manually

    logits_pad = pl.pallas_call(
        bilstm_fc_kernel,
        out_shape=jax.ShapeDtypeStruct((B_pad, OUT_PAD), jnp.float32),
        in_specs=[vmem, vmem, vmem, hbm, vmem, vmem, vmem],
        out_specs=vmem,
        scratch_shapes=[
            pltpu.VMEM((T * B_pad, 4 * H), jnp.float32),   # fwd gate pre-activations
            pltpu.VMEM((H, 4 * H), jnp.bfloat16),          # W_hh landing buffer
            pltpu.SemaphoreType.DMA,                       # W_hh copy completion
        ],
    )(ids_tm, kp["ptab_f"], kp["ptab_b"], kp["whh_f_t"],
      kp["wfc_f"], kp["wfc_b"], kp["bfc"])
    return logits_pad[:B, :output_size]


def ref_forward(x_ids, p):
    """Pure-JAX f32 reference matching PyTorch semantics."""
    emb = p["embedding"][x_ids]
    B, T, _ = emb.shape
    H = hidden_size

    def cell(x_t, h, c, wih, whh, bih, bhh):
        gates = x_t @ wih.T + bih + h @ whh.T + bhh
        i, f, g, o = jnp.split(gates, 4, axis=-1)
        c = jax.nn.sigmoid(f) * c + jax.nn.sigmoid(i) * jnp.tanh(g)
        h = jax.nn.sigmoid(o) * jnp.tanh(c)
        return h, c

    h = jnp.zeros((B, H)); c = jnp.zeros((B, H))
    for t in range(T):
        h, c = cell(emb[:, t], h, c, p["wih_f"], p["whh_f"], p["bih_f"], p["bhh_f"])
    hb = jnp.zeros((B, H)); cb = jnp.zeros((B, H))
    hb, _ = cell(emb[:, T - 1], hb, cb, p["wih_b"], p["whh_b"], p["bih_b"], p["bhh_b"])
    last = jnp.concatenate([h, hb], axis=-1)
    return last @ p["wfc"].T + p["bfc"]


if __name__ == "__main__":
    key = jax.random.PRNGKey(0)
    k_param, k_data = jax.random.split(key)
    params = init_params(k_param)
    kparams = prepare_kernel_params(params)        # one-time weight repacking (not per call)

    B, T = 2, 8
    x_ids = jax.random.randint(k_data, (B, T), 0, vocab_size, dtype=jnp.int32)

    logits = jax.block_until_ready(lstm_classifier_forward(x_ids, kparams))
    ref = jax.block_until_ready(ref_forward(x_ids, params))

    assert logits.shape == (B, output_size)
    # Tolerance relaxed vs the pure-f32 reference because MXU weights/activations are bf16.
    np.testing.assert_allclose(np.asarray(logits), np.asarray(ref), rtol=5e-2, atol=5e-2)
    print("KERNEL_OK")
</pallas_src>

<mosaic_0001>
module attributes {stable_mosaic.version = 11 : i64} {
  func.func @bilstm_fc_kernel(%arg0: memref<64x1xi32, #tpu.memory_space<vmem>>, %arg1: memref<100x1024xbf16, #tpu.memory_space<vmem>>, %arg2: memref<100x1024xbf16, #tpu.memory_space<vmem>>, %arg3: memref<256x1024xbf16, #tpu.memory_space<any>>, %arg4: memref<256x128xf32, #tpu.memory_space<vmem>>, %arg5: memref<256x128xf32, #tpu.memory_space<vmem>>, %arg6: memref<1x128xf32, #tpu.memory_space<vmem>>, %arg7: memref<8x128xf32, #tpu.memory_space<vmem>>, %arg8: memref<64x1024xf32, #tpu.memory_space<vmem>>, %arg9: memref<256x1024xbf16, #tpu.memory_space<vmem>>, %arg10: memref<!tpu.dma_semaphore, #tpu.memory_space<semaphore_mem>>) attributes {dimension_semantics = [], scalar_prefetch = 0 : i64, scratch_operands = 3 : i64, tpu.core_type = #tpu.core_type<tc>} {
    tpu.enqueue_dma source(%arg3 : memref<256x1024xbf16, #tpu.memory_space<any>>) target(%arg9 : memref<256x1024xbf16, #tpu.memory_space<vmem>>) target_semaphore(%arg10 : memref<!tpu.dma_semaphore, #tpu.memory_space<semaphore_mem>>)
    %c0 = arith.constant 0 : index
    %c0_0 = arith.constant 0 : index
    %0 = vector.load %arg0[%c0, %c0_0] : memref<64x1xi32, #tpu.memory_space<vmem>>, vector<64x1xi32>
    %1 = tpu.iota {dimensions = array<i32: 1>} : vector<64x100xi32>
    %2 = vector.broadcast %0 : vector<64x1xi32> to vector<64x100xi32>
    %3 = arith.cmpi eq, %2, %1 : vector<64x100xi32>
    %4 = arith.extui %3 : vector<64x100xi1> to vector<64x100xi32>
    %5 = arith.sitofp %4 : vector<64x100xi32> to vector<64x100xf32>
    %6 = arith.truncf %5 : vector<64x100xf32> to vector<64x100xbf16>
    %c0_1 = arith.constant 0 : index
    %c0_2 = arith.constant 0 : index
    %7 = vector.load %arg1[%c0_1, %c0_2] : memref<100x1024xbf16, #tpu.memory_space<vmem>>, vector<100x1024xbf16>
    %cst = arith.constant dense<0.000000e+00> : vector<64x1024xf32>
    %8 = tpu.matmul %6, %7, %cst {dimension_numbers = #tpu.dot_dimension_numbers<[1], [0], [0], [1], [0, 0, 1, 1], [], []>} : vector<64x100xbf16>, vector<100x1024xbf16>, vector<64x1024xf32> -> vector<64x1024xf32>
    %c0_3 = arith.constant 0 : index
    %c0_4 = arith.constant 0 : index
    %9 = vector.load %arg8[%c0_3, %c0_4] : memref<64x1024xf32, #tpu.memory_space<vmem>>, vector<64x1024xf32>
    tpu.vector_store %arg8[%c0_3, %c0_4], %8 {strides = array<i32>} : memref<64x1024xf32, #tpu.memory_space<vmem>>, vector<64x1024xf32>,
    %c56 = arith.constant 56 : index
    %c0_5 = arith.constant 0 : index
    %10 = vector.load %arg0[%c56, %c0_5] : memref<64x1xi32, #tpu.memory_space<vmem>>, vector<8x1xi32>
    %11 = tpu.iota {dimensions = array<i32: 1>} : vector<8x100xi32>
    %12 = vector.broadcast %10 : vector<8x1xi32> to vector<8x100xi32>
    %13 = arith.cmpi eq, %12, %11 : vector<8x100xi32>
    %14 = arith.extui %13 : vector<8x100xi1> to vector<8x100xi32>
    %15 = arith.sitofp %14 : vector<8x100xi32> to vector<8x100xf32>
    %16 = arith.truncf %15 : vector<8x100xf32> to vector<8x100xbf16>
    %c0_6 = arith.constant 0 : index
    %c0_7 = arith.constant 0 : index
    %17 = vector.load %arg2[%c0_6, %c0_7] : memref<100x1024xbf16, #tpu.memory_space<vmem>>, vector<100x1024xbf16>
    %cst_8 = arith.constant dense<0.000000e+00> : vector<8x1024xf32>
    %18 = tpu.matmul %16, %17, %cst_8 {dimension_numbers = #tpu.dot_dimension_numbers<[1], [0], [0], [1], [0, 0, 1, 1], [], []>} : vector<8x100xbf16>, vector<100x1024xbf16>, vector<8x1024xf32> -> vector<8x1024xf32>
    %cst_9 = arith.constant 0.000000e+00 : f32
    %19 = vector.broadcast %cst_9 : f32 to vector<8x256xf32>
    %20 = vector.extract_strided_slice %18 {offsets = [0, 0], sizes = [8, 256], strides = [1, 1]} : vector<8x1024xf32> to vector<8x256xf32>
    %cst_10 = arith.constant 5.000000e-01 : f32
    %21 = vector.broadcast %cst_10 : f32 to vector<8x256xf32>
    %22 = arith.mulf %21, %20 : vector<8x256xf32>
    %23 = math.tanh %22 : vector<8x256xf32>
    %cst_11 = arith.constant 5.000000e-01 : f32
    %24 = vector.broadcast %cst_11 : f32 to vector<8x256xf32>
    %25 = arith.mulf %24, %23 : vector<8x256xf32>
    %cst_12 = arith.constant 5.000000e-01 : f32
    %26 = vector.broadcast %cst_12 : f32 to vector<8x256xf32>
    %27 = arith.addf %25, %26 : vector<8x256xf32>
    %28 = vector.extract_strided_slice %18 {offsets = [0, 256], sizes = [8, 256], strides = [1, 1]} : vector<8x1024xf32> to vector<8x256xf32>
    %cst_13 = arith.constant 5.000000e-01 : f32
    %29 = vector.broadcast %cst_13 : f32 to vector<8x256xf32>
    %30 = arith.mulf %29, %28 : vector<8x256xf32>
    %31 = math.tanh %30 : vector<8x256xf32>
    %cst_14 = arith.constant 5.000000e-01 : f32
    %32 = vector.broadcast %cst_14 : f32 to vector<8x256xf32>
    %33 = arith.mulf %32, %31 : vector<8x256xf32>
    %cst_15 = arith.constant 5.000000e-01 : f32
    %34 = vector.broadcast %cst_15 : f32 to vector<8x256xf32>
    %35 = arith.addf %33, %34 : vector<8x256xf32>
    %36 = vector.extract_strided_slice %18 {offsets = [0, 512], sizes = [8, 256], strides = [1, 1]} : vector<8x1024xf32> to vector<8x256xf32>
    %37 = math.tanh %36 : vector<8x256xf32>
    %38 = vector.extract_strided_slice %18 {offsets = [0, 768], sizes = [8, 256], strides = [1, 1]} : vector<8x1024xf32> to vector<8x256xf32>
    %cst_16 = arith.constant 5.000000e-01 : f32
    %39 = vector.broadcast %cst_16 : f32 to vector<8x256xf32>
    %40 = arith.mulf %39, %38 : vector<8x256xf32>
    %41 = math.tanh %40 : vector<8x256xf32>
    %cst_17 = arith.constant 5.000000e-01 : f32
    %42 = vector.broadcast %cst_17 : f32 to vector<8x256xf32>
    %43 = arith.mulf %42, %41 : vector<8x256xf32>
    %cst_18 = arith.constant 5.000000e-01 : f32
    %44 = vector.broadcast %cst_18 : f32 to vector<8x256xf32>
    %45 = arith.addf %43, %44 : vector<8x256xf32>
    %46 = arith.mulf %35, %19 : vector<8x256xf32>
    %47 = arith.mulf %27, %37 : vector<8x256xf32>
    %48 = arith.addf %46, %47 : vector<8x256xf32>
    %49 = math.tanh %48 : vector<8x256xf32>
    %50 = arith.mulf %45, %49 : vector<8x256xf32>
    tpu.wait_dma2 semaphore(%arg10 : memref<!tpu.dma_semaphore, #tpu.memory_space<semaphore_mem>>) src(%arg3 : memref<256x1024xbf16, #tpu.memory_space<any>>) dst(%arg9 : memref<256x1024xbf16, #tpu.memory_space<vmem>>)
    %c0_i32 = arith.constant 0 : i32
    %c8_i32 = arith.constant 8 : i32
    %51 = arith.muli %c0_i32, %c8_i32 : i32
    %52 = tpu.assume_multiple %51, 8 : i32
    %53 = arith.truncf %19 : vector<8x256xf32> to vector<8x256xbf16>
    %c0_19 = arith.constant 0 : index
    %c0_20 = arith.constant 0 : index
    %54 = vector.load %arg9[%c0_19, %c0_20] : memref<256x1024xbf16, #tpu.memory_space<vmem>>, vector<256x1024xbf16>
    %cst_21 = arith.constant dense<0.000000e+00> : vector<8x1024xf32>
    %55 = tpu.matmul %53, %54, %cst_21 {dimension_numbers = #tpu.dot_dimension_numbers<[1], [0], [0], [1], [0, 0, 1, 1], [], []>} : vector<8x256xbf16>, vector<256x1024xbf16>, vector<8x1024xf32> -> vector<8x1024xf32>
    %56 = arith.index_cast %52 : i32 to index
    %c0_22 = arith.constant 0 : index
    %57 = vector.load %arg8[%56, %c0_22] : memref<64x1024xf32, #tpu.memory_space<vmem>>, vector<8x1024xf32>
    %58 = arith.addf %55, %57 : vector<8x1024xf32>
    %59 = vector.extract_strided_slice %58 {offsets = [0, 0], sizes = [8, 256], strides = [1, 1]} : vector<8x1024xf32> to vector<8x256xf32>
    %cst_23 = arith.constant 5.000000e-01 : f32
    %60 = vector.broadcast %cst_23 : f32 to vector<8x256xf32>
    %61 = arith.mulf %60, %59 : vector<8x256xf32>
    %62 = math.tanh %61 : vector<8x256xf32>
    %cst_24 = arith.constant 5.000000e-01 : f32
    %63 = vector.broadcast %cst_24 : f32 to vector<8x256xf32>
    %64 = arith.mulf %63, %62 : vector<8x256xf32>
    %cst_25 = arith.constant 5.000000e-01 : f32
    %65 = vector.broadcast %cst_25 : f32 to vector<8x256xf32>
    %66 = arith.addf %64, %65 : vector<8x256xf32>
    %67 = vector.extract_strided_slice %58 {offsets = [0, 256], sizes = [8, 256], strides = [1, 1]} : vector<8x1024xf32> to vector<8x256xf32>
    %cst_26 = arith.constant 5.000000e-01 : f32
    %68 = vector.broadcast %cst_26 : f32 to vector<8x256xf32>
    %69 = arith.mulf %68, %67 : vector<8x256xf32>
    %70 = math.tanh %69 : vector<8x256xf32>
    %cst_27 = arith.constant 5.000000e-01 : f32
    %71 = vector.broadcast %cst_27 : f32 to vector<8x256xf32>
    %72 = arith.mulf %71, %70 : vector<8x256xf32>
    %cst_28 = arith.constant 5.000000e-01 : f32
    %73 = vector.broadcast %cst_28 : f32 to vector<8x256xf32>
    %74 = arith.addf %72, %73 : vector<8x256xf32>
    %75 = vector.extract_strided_slice %58 {offsets = [0, 512], sizes = [8, 256], strides = [1, 1]} : vector<8x1024xf32> to vector<8x256xf32>
    %76 = math.tanh %75 : vector<8x256xf32>
    %77 = vector.extract_strided_slice %58 {offsets = [0, 768], sizes = [8, 256], strides = [1, 1]} : vector<8x1024xf32> to vector<8x256xf32>
    %cst_29 = arith.constant 5.000000e-01 : f32
    %78 = vector.broadcast %cst_29 : f32 to vector<8x256xf32>
    %79 = arith.mulf %78, %77 : vector<8x256xf32>
    %80 = math.tanh %79 : vector<8x256xf32>
    %cst_30 = arith.constant 5.000000e-01 : f32
    %81 = vector.broadcast %cst_30 : f32 to vector<8x256xf32>
    %82 = arith.mulf %81, %80 : vector<8x256xf32>
    %cst_31 = arith.constant 5.000000e-01 : f32
    %83 = vector.broadcast %cst_31 : f32 to vector<8x256xf32>
    %84 = arith.addf %82, %83 : vector<8x256xf32>
    %85 = arith.mulf %74, %19 : vector<8x256xf32>
    %86 = arith.mulf %66, %76 : vector<8x256xf32>
    %87 = arith.addf %85, %86 : vector<8x256xf32>
    %88 = math.tanh %87 : vector<8x256xf32>
    %89 = arith.mulf %84, %88 : vector<8x256xf32>
    %c1_i32 = arith.constant 1 : i32
    %c8_i32_32 = arith.constant 8 : i32
    %90 = arith.muli %c1_i32, %c8_i32_32 : i32
    %91 = tpu.assume_multiple %90, 8 : i32
    %92 = arith.truncf %89 : vector<8x256xf32> to vector<8x256xbf16>
    %c0_33 = arith.constant 0 : index
    %c0_34 = arith.constant 0 : index
    %93 = vector.load %arg9[%c0_33, %c0_34] : memref<256x1024xbf16, #tpu.memory_space<vmem>>, vector<256x1024xbf16>
    %cst_35 = arith.constant dense<0.000000e+00> : vector<8x1024xf32>
    %94 = tpu.matmul %92, %93, %cst_35 {dimension_numbers = #tpu.dot_dimension_numbers<[1], [0], [0], [1], [0, 0, 1, 1], [], []>} : vector<8x256xbf16>, vector<256x1024xbf16>, vector<8x1024xf32> -> vector<8x1024xf32>
    %95 = arith.index_cast %91 : i32 to index
    %c0_36 = arith.constant 0 : index
    %96 = vector.load %arg8[%95, %c0_36] : memref<64x1024xf32, #tpu.memory_space<vmem>>, vector<8x1024xf32>
    %97 = arith.addf %94, %96 : vector<8x1024xf32>
    %98 = vector.extract_strided_slice %97 {offsets = [0, 0], sizes = [8, 256], strides = [1, 1]} : vector<8x1024xf32> to vector<8x256xf32>
    %cst_37 = arith.constant 5.000000e-01 : f32
    %99 = vector.broadcast %cst_37 : f32 to vector<8x256xf32>
    %100 = arith.mulf %99, %98 : vector<8x256xf32>
    %101 = math.tanh %100 : vector<8x256xf32>
    %cst_38 = arith.constant 5.000000e-01 : f32
    %102 = vector.broadcast %cst_38 : f32 to vector<8x256xf32>
    %103 = arith.mulf %102, %101 : vector<8x256xf32>
    %cst_39 = arith.constant 5.000000e-01 : f32
    %104 = vector.broadcast %cst_39 : f32 to vector<8x256xf32>
    %105 = arith.addf %103, %104 : vector<8x256xf32>
    %106 = vector.extract_strided_slice %97 {offsets = [0, 256], sizes = [8, 256], strides = [1, 1]} : vector<8x1024xf32> to vector<8x256xf32>
    %cst_40 = arith.constant 5.000000e-01 : f32
    %107 = vector.broadcast %cst_40 : f32 to vector<8x256xf32>
    %108 = arith.mulf %107, %106 : vector<8x256xf32>
    %109 = math.tanh %108 : vector<8x256xf32>
    %cst_41 = arith.constant 5.000000e-01 : f32
    %110 = vector.broadcast %cst_41 : f32 to vector<8x256xf32>
    %111 = arith.mulf %110, %109 : vector<8x256xf32>
    %cst_42 = arith.constant 5.000000e-01 : f32
    %112 = vector.broadcast %cst_42 : f32 to vector<8x256xf32>
    %113 = arith.addf %111, %112 : vector<8x256xf32>
    %114 = vector.extract_strided_slice %97 {offsets = [0, 512], sizes = [8, 256], strides = [1, 1]} : vector<8x1024xf32> to vector<8x256xf32>
    %115 = math.tanh %114 : vector<8x256xf32>
    %116 = vector.extract_strided_slice %97 {offsets = [0, 768], sizes = [8, 256], strides = [1, 1]} : vector<8x1024xf32> to vector<8x256xf32>
    %cst_43 = arith.constant 5.000000e-01 : f32
    %117 = vector.broadcast %cst_43 : f32 to vector<8x256xf32>
    %118 = arith.mulf %117, %116 : vector<8x256xf32>
    %119 = math.tanh %118 : vector<8x256xf32>
    %cst_44 = arith.constant 5.000000e-01 : f32
    %120 = vector.broadcast %cst_44 : f32 to vector<8x256xf32>
    %121 = arith.mulf %120, %119 : vector<8x256xf32>
    %cst_45 = arith.constant 5.000000e-01 : f32
    %122 = vector.broadcast %cst_45 : f32 to vector<8x256xf32>
    %123 = arith.addf %121, %122 : vector<8x256xf32>
    %124 = arith.mulf %113, %87 : vector<8x256xf32>
    %125 = arith.mulf %105, %115 : vector<8x256xf32>
    %126 = arith.addf %124, %125 : vector<8x256xf32>
    %127 = math.tanh %126 : vector<8x256xf32>
    %128 = arith.mulf %123, %127 : vector<8x256xf32>
    %c2_i32 = arith.constant 2 : i32
    %c8_i32_46 = arith.constant 8 : i32
    %129 = arith.muli %c2_i32, %c8_i32_46 : i32
    %130 = tpu.assume_multiple %129, 8 : i32
    %131 = arith.truncf %128 : vector<8x256xf32> to vector<8x256xbf16>
    %c0_47 = arith.constant 0 : index
    %c0_48 = arith.constant 0 : index
    %132 = vector.load %arg9[%c0_47, %c0_48] : memref<256x1024xbf16, #tpu.memory_space<vmem>>, vector<256x1024xbf16>
    %cst_49 = arith.constant dense<0.000000e+00> : vector<8x1024xf32>
    %133 = tpu.matmul %131, %132, %cst_49 {dimension_numbers = #tpu.dot_dimension_numbers<[1], [0], [0], [1], [0, 0, 1, 1], [], []>} : vector<8x256xbf16>, vector<256x1024xbf16>, vector<8x1024xf32> -> vector<8x1024xf32>
    %134 = arith.index_cast %130 : i32 to index
    %c0_50 = arith.constant 0 : index
    %135 = vector.load %arg8[%134, %c0_50] : memref<64x1024xf32, #tpu.memory_space<vmem>>, vector<8x1024xf32>
    %136 = arith.addf %133, %135 : vector<8x1024xf32>
    %137 = vector.extract_strided_slice %136 {offsets = [0, 0], sizes = [8, 256], strides = [1, 1]} : vector<8x1024xf32> to vector<8x256xf32>
    %cst_51 = arith.constant 5.000000e-01 : f32
    %138 = vector.broadcast %cst_51 : f32 to vector<8x256xf32>
    %139 = arith.mulf %138, %137 : vector<8x256xf32>
    %140 = math.tanh %139 : vector<8x256xf32>
    %cst_52 = arith.constant 5.000000e-01 : f32
    %141 = vector.broadcast %cst_52 : f32 to vector<8x256xf32>
    %142 = arith.mulf %141, %140 : vector<8x256xf32>
    %cst_53 = arith.constant 5.000000e-01 : f32
    %143 = vector.broadcast %cst_53 : f32 to vector<8x256xf32>
    %144 = arith.addf %142, %143 : vector<8x256xf32>
    %145 = vector.extract_strided_slice %136 {offsets = [0, 256], sizes = [8, 256], strides = [1, 1]} : vector<8x1024xf32> to vector<8x256xf32>
    %cst_54 = arith.constant 5.000000e-01 : f32
    %146 = vector.broadcast %cst_54 : f32 to vector<8x256xf32>
    %147 = arith.mulf %146, %145 : vector<8x256xf32>
    %148 = math.tanh %147 : vector<8x256xf32>
    %cst_55 = arith.constant 5.000000e-01 : f32
    %149 = vector.broadcast %cst_55 : f32 to vector<8x256xf32>
    %150 = arith.mulf %149, %148 : vector<8x256xf32>
    %cst_56 = arith.constant 5.000000e-01 : f32
    %151 = vector.broadcast %cst_56 : f32 to vector<8x256xf32>
    %152 = arith.addf %150, %151 : vector<8x256xf32>
    %153 = vector.extract_strided_slice %136 {offsets = [0, 512], sizes = [8, 256], strides = [1, 1]} : vector<8x1024xf32> to vector<8x256xf32>
    %154 = math.tanh %153 : vector<8x256xf32>
    %155 = vector.extract_strided_slice %136 {offsets = [0, 768], sizes = [8, 256], strides = [1, 1]} : vector<8x1024xf32> to vector<8x256xf32>
    %cst_57 = arith.constant 5.000000e-01 : f32
    %156 = vector.broadcast %cst_57 : f32 to vector<8x256xf32>
    %157 = arith.mulf %156, %155 : vector<8x256xf32>
    %158 = math.tanh %157 : vector<8x256xf32>
    %cst_58 = arith.constant 5.000000e-01 : f32
    %159 = vector.broadcast %cst_58 : f32 to vector<8x256xf32>
    %160 = arith.mulf %159, %158 : vector<8x256xf32>
    %cst_59 = arith.constant 5.000000e-01 : f32
    %161 = vector.broadcast %cst_59 : f32 to vector<8x256xf32>
    %162 = arith.addf %160, %161 : vector<8x256xf32>
    %163 = arith.mulf %152, %126 : vector<8x256xf32>
    %164 = arith.mulf %144, %154 : vector<8x256xf32>
    %165 = arith.addf %163, %164 : vector<8x256xf32>
    %166 = math.tanh %165 : vector<8x256xf32>
    %167 = arith.mulf %162, %166 : vector<8x256xf32>
    %c3_i32 = arith.constant 3 : i32
    %c8_i32_60 = arith.constant 8 : i32
    %168 = arith.muli %c3_i32, %c8_i32_60 : i32
    %169 = tpu.assume_multiple %168, 8 : i32
    %170 = arith.truncf %167 : vector<8x256xf32> to vector<8x256xbf16>
    %c0_61 = arith.constant 0 : index
    %c0_62 = arith.constant 0 : index
    %171 = vector.load %arg9[%c0_61, %c0_62] : memref<256x1024xbf16, #tpu.memory_space<vmem>>, vector<256x1024xbf16>
    %cst_63 = arith.constant dense<0.000000e+00> : vector<8x1024xf32>
    %172 = tpu.matmul %170, %171, %cst_63 {dimension_numbers = #tpu.dot_dimension_numbers<[1], [0], [0], [1], [0, 0, 1, 1], [], []>} : vector<8x256xbf16>, vector<256x1024xbf16>, vector<8x1024xf32> -> vector<8x1024xf32>
    %173 = arith.index_cast %169 : i32 to index
    %c0_64 = arith.constant 0 : index
    %174 = vector.load %arg8[%173, %c0_64] : memref<64x1024xf32, #tpu.memory_space<vmem>>, vector<8x1024xf32>
    %175 = arith.addf %172, %174 : vector<8x1024xf32>
    %176 = vector.extract_strided_slice %175 {offsets = [0, 0], sizes = [8, 256], strides = [1, 1]} : vector<8x1024xf32> to vector<8x256xf32>
    %cst_65 = arith.constant 5.000000e-01 : f32
    %177 = vector.broadcast %cst_65 : f32 to vector<8x256xf32>
    %178 = arith.mulf %177, %176 : vector<8x256xf32>
    %179 = math.tanh %178 : vector<8x256xf32>
    %cst_66 = arith.constant 5.000000e-01 : f32
    %180 = vector.broadcast %cst_66 : f32 to vector<8x256xf32>
    %181 = arith.mulf %180, %179 : vector<8x256xf32>
    %cst_67 = arith.constant 5.000000e-01 : f32
    %182 = vector.broadcast %cst_67 : f32 to vector<8x256xf32>
    %183 = arith.addf %181, %182 : vector<8x256xf32>
    %184 = vector.extract_strided_slice %175 {offsets = [0, 256], sizes = [8, 256], strides = [1, 1]} : vector<8x1024xf32> to vector<8x256xf32>
    %cst_68 = arith.constant 5.000000e-01 : f32
    %185 = vector.broadcast %cst_68 : f32 to vector<8x256xf32>
    %186 = arith.mulf %185, %184 : vector<8x256xf32>
    %187 = math.tanh %186 : vector<8x256xf32>
    %cst_69 = arith.constant 5.000000e-01 : f32
    %188 = vector.broadcast %cst_69 : f32 to vector<8x256xf32>
    %189 = arith.mulf %188, %187 : vector<8x256xf32>
    %cst_70 = arith.constant 5.000000e-01 : f32
    %190 = vector.broadcast %cst_70 : f32 to vector<8x256xf32>
    %191 = arith.addf %189, %190 : vector<8x256xf32>
    %192 = vector.extract_strided_slice %175 {offsets = [0, 512], sizes = [8, 256], strides = [1, 1]} : vector<8x1024xf32> to vector<8x256xf32>
    %193 = math.tanh %192 : vector<8x256xf32>
    %194 = vector.extract_strided_slice %175 {offsets = [0, 768], sizes = [8, 256], strides = [1, 1]} : vector<8x1024xf32> to vector<8x256xf32>
    %cst_71 = arith.constant 5.000000e-01 : f32
    %195 = vector.broadcast %cst_71 : f32 to vector<8x256xf32>
    %196 = arith.mulf %195, %194 : vector<8x256xf32>
    %197 = math.tanh %196 : vector<8x256xf32>
    %cst_72 = arith.constant 5.000000e-01 : f32
    %198 = vector.broadcast %cst_72 : f32 to vector<8x256xf32>
    %199 = arith.mulf %198, %197 : vector<8x256xf32>
    %cst_73 = arith.constant 5.000000e-01 : f32
    %200 = vector.broadcast %cst_73 : f32 to vector<8x256xf32>
    %201 = arith.addf %199, %200 : vector<8x256xf32>
    %202 = arith.mulf %191, %165 : vector<8x256xf32>
    %203 = arith.mulf %183, %193 : vector<8x256xf32>
    %204 = arith.addf %202, %203 : vector<8x256xf32>
    %205 = math.tanh %204 : vector<8x256xf32>
    %206 = arith.mulf %201, %205 : vector<8x256xf32>
    %c4_i32 = arith.constant 4 : i32
    %c8_i32_74 = arith.constant 8 : i32
    %207 = arith.muli %c4_i32, %c8_i32_74 : i32
    %208 = tpu.assume_multiple %207, 8 : i32
    %209 = arith.truncf %206 : vector<8x256xf32> to vector<8x256xbf16>
    %c0_75 = arith.constant 0 : index
    %c0_76 = arith.constant 0 : index
    %210 = vector.load %arg9[%c0_75, %c0_76] : memref<256x1024xbf16, #tpu.memory_space<vmem>>, vector<256x1024xbf16>
    %cst_77 = arith.constant dense<0.000000e+00> : vector<8x1024xf32>
    %211 = tpu.matmul %209, %210, %cst_77 {dimension_numbers = #tpu.dot_dimension_numbers<[1], [0], [0], [1], [0, 0, 1, 1], [], []>} : vector<8x256xbf16>, vector<256x1024xbf16>, vector<8x1024xf32> -> vector<8x1024xf32>
    %212 = arith.index_cast %208 : i32 to index
    %c0_78 = arith.constant 0 : index
    %213 = vector.load %arg8[%212, %c0_78] : memref<64x1024xf32, #tpu.memory_space<vmem>>, vector<8x1024xf32>
    %214 = arith.addf %211, %213 : vector<8x1024xf32>
    %215 = vector.extract_strided_slice %214 {offsets = [0, 0], sizes = [8, 256], strides = [1, 1]} : vector<8x1024xf32> to vector<8x256xf32>
    %cst_79 = arith.constant 5.000000e-01 : f32
    %216 = vector.broadcast %cst_79 : f32 to vector<8x256xf32>
    %217 = arith.mulf %216, %215 : vector<8x256xf32>
    %218 = math.tanh %217 : vector<8x256xf32>
    %cst_80 = arith.constant 5.000000e-01 : f32
    %219 = vector.broadcast %cst_80 : f32 to vector<8x256xf32>
    %220 = arith.mulf %219, %218 : vector<8x256xf32>
    %cst_81 = arith.constant 5.000000e-01 : f32
    %221 = vector.broadcast %cst_81 : f32 to vector<8x256xf32>
    %222 = arith.addf %220, %221 : vector<8x256xf32>
    %223 = vector.extract_strided_slice %214 {offsets = [0, 256], sizes = [8, 256], strides = [1, 1]} : vector<8x1024xf32> to vector<8x256xf32>
    %cst_82 = arith.constant 5.000000e-01 : f32
    %224 = vector.broadcast %cst_82 : f32 to vector<8x256xf32>
    %225 = arith.mulf %224, %223 : vector<8x256xf32>
    %226 = math.tanh %225 : vector<8x256xf32>
    %cst_83 = arith.constant 5.000000e-01 : f32
    %227 = vector.broadcast %cst_83 : f32 to vector<8x256xf32>
    %228 = arith.mulf %227, %226 : vector<8x256xf32>
    %cst_84 = arith.constant 5.000000e-01 : f32
    %229 = vector.broadcast %cst_84 : f32 to vector<8x256xf32>
    %230 = arith.addf %228, %229 : vector<8x256xf32>
    %231 = vector.extract_strided_slice %214 {offsets = [0, 512], sizes = [8, 256], strides = [1, 1]} : vector<8x1024xf32> to vector<8x256xf32>
    %232 = math.tanh %231 : vector<8x256xf32>
    %233 = vector.extract_strided_slice %214 {offsets = [0, 768], sizes = [8, 256], strides = [1, 1]} : vector<8x1024xf32> to vector<8x256xf32>
    %cst_85 = arith.constant 5.000000e-01 : f32
    %234 = vector.broadcast %cst_85 : f32 to vector<8x256xf32>
    %235 = arith.mulf %234, %233 : vector<8x256xf32>
    %236 = math.tanh %235 : vector<8x256xf32>
    %cst_86 = arith.constant 5.000000e-01 : f32
    %237 = vector.broadcast %cst_86 : f32 to vector<8x256xf32>
    %238 = arith.mulf %237, %236 : vector<8x256xf32>
    %cst_87 = arith.constant 5.000000e-01 : f32
    %239 = vector.broadcast %cst_87 : f32 to vector<8x256xf32>
    %240 = arith.addf %238, %239 : vector<8x256xf32>
    %241 = arith.mulf %230, %204 : vector<8x256xf32>
    %242 = arith.mulf %222, %232 : vector<8x256xf32>
    %243 = arith.addf %241, %242 : vector<8x256xf32>
    %244 = math.tanh %243 : vector<8x256xf32>
    %245 = arith.mulf %240, %244 : vector<8x256xf32>
    %c5_i32 = arith.constant 5 : i32
    %c8_i32_88 = arith.constant 8 : i32
    %246 = arith.muli %c5_i32, %c8_i32_88 : i32
    %247 = tpu.assume_multiple %246, 8 : i32
    %248 = arith.truncf %245 : vector<8x256xf32> to vector<8x256xbf16>
    %c0_89 = arith.constant 0 : index
    %c0_90 = arith.constant 0 : index
    %249 = vector.load %arg9[%c0_89, %c0_90] : memref<256x1024xbf16, #tpu.memory_space<vmem>>, vector<256x1024xbf16>
    %cst_91 = arith.constant dense<0.000000e+00> : vector<8x1024xf32>
    %250 = tpu.matmul %248, %249, %cst_91 {dimension_numbers = #tpu.dot_dimension_numbers<[1], [0], [0], [1], [0, 0, 1, 1], [], []>} : vector<8x256xbf16>, vector<256x1024xbf16>, vector<8x1024xf32> -> vector<8x1024xf32>
    %251 = arith.index_cast %247 : i32 to index
    %c0_92 = arith.constant 0 : index
    %252 = vector.load %arg8[%251, %c0_92] : memref<64x1024xf32, #tpu.memory_space<vmem>>, vector<8x1024xf32>
    %253 = arith.addf %250, %252 : vector<8x1024xf32>
    %254 = vector.extract_strided_slice %253 {offsets = [0, 0], sizes = [8, 256], strides = [1, 1]} : vector<8x1024xf32> to vector<8x256xf32>
    %cst_93 = arith.constant 5.000000e-01 : f32
    %255 = vector.broadcast %cst_93 : f32 to vector<8x256xf32>
    %256 = arith.mulf %255, %254 : vector<8x256xf32>
    %257 = math.tanh %256 : vector<8x256xf32>
    %cst_94 = arith.constant 5.000000e-01 : f32
    %258 = vector.broadcast %cst_94 : f32 to vector<8x256xf32>
    %259 = arith.mulf %258, %257 : vector<8x256xf32>
    %cst_95 = arith.constant 5.000000e-01 : f32
    %260 = vector.broadcast %cst_95 : f32 to vector<8x256xf32>
    %261 = arith.addf %259, %260 : vector<8x256xf32>
    %262 = vector.extract_strided_slice %253 {offsets = [0, 256], sizes = [8, 256], strides = [1, 1]} : vector<8x1024xf32> to vector<8x256xf32>
    %cst_96 = arith.constant 5.000000e-01 : f32
    %263 = vector.broadcast %cst_96 : f32 to vector<8x256xf32>
    %264 = arith.mulf %263, %262 : vector<8x256xf32>
    %265 = math.tanh %264 : vector<8x256xf32>
    %cst_97 = arith.constant 5.000000e-01 : f32
    %266 = vector.broadcast %cst_97 : f32 to vector<8x256xf32>
    %267 = arith.mulf %266, %265 : vector<8x256xf32>
    %cst_98 = arith.constant 5.000000e-01 : f32
    %268 = vector.broadcast %cst_98 : f32 to vector<8x256xf32>
    %269 = arith.addf %267, %268 : vector<8x256xf32>
    %270 = vector.extract_strided_slice %253 {offsets = [0, 512], sizes = [8, 256], strides = [1, 1]} : vector<8x1024xf32> to vector<8x256xf32>
    %271 = math.tanh %270 : vector<8x256xf32>
    %272 = vector.extract_strided_slice %253 {offsets = [0, 768], sizes = [8, 256], strides = [1, 1]} : vector<8x1024xf32> to vector<8x256xf32>
    %cst_99 = arith.constant 5.000000e-01 : f32
    %273 = vector.broadcast %cst_99 : f32 to vector<8x256xf32>
    %274 = arith.mulf %273, %272 : vector<8x256xf32>
    %275 = math.tanh %274 : vector<8x256xf32>
    %cst_100 = arith.constant 5.000000e-01 : f32
    %276 = vector.broadcast %cst_100 : f32 to vector<8x256xf32>
    %277 = arith.mulf %276, %275 : vector<8x256xf32>
    %cst_101 = arith.constant 5.000000e-01 : f32
    %278 = vector.broadcast %cst_101 : f32 to vector<8x256xf32>
    %279 = arith.addf %277, %278 : vector<8x256xf32>
    %280 = arith.mulf %269, %243 : vector<8x256xf32>
    %281 = arith.mulf %261, %271 : vector<8x256xf32>
    %282 = arith.addf %280, %281 : vector<8x256xf32>
    %283 = math.tanh %282 : vector<8x256xf32>
    %284 = arith.mulf %279, %283 : vector<8x256xf32>
    %c6_i32 = arith.constant 6 : i32
    %c8_i32_102 = arith.constant 8 : i32
    %285 = arith.muli %c6_i32, %c8_i32_102 : i32
    %286 = tpu.assume_multiple %285, 8 : i32
    %287 = arith.truncf %284 : vector<8x256xf32> to vector<8x256xbf16>
    %c0_103 = arith.constant 0 : index
    %c0_104 = arith.constant 0 : index
    %288 = vector.load %arg9[%c0_103, %c0_104] : memref<256x1024xbf16, #tpu.memory_space<vmem>>, vector<256x1024xbf16>
    %cst_105 = arith.constant dense<0.000000e+00> : vector<8x1024xf32>
    %289 = tpu.matmul %287, %288, %cst_105 {dimension_numbers = #tpu.dot_dimension_numbers<[1], [0], [0], [1], [0, 0, 1, 1], [], []>} : vector<8x256xbf16>, vector<256x1024xbf16>, vector<8x1024xf32> -> vector<8x1024xf32>
    %290 = arith.index_cast %286 : i32 to index
    %c0_106 = arith.constant 0 : index
    %291 = vector.load %arg8[%290, %c0_106] : memref<64x1024xf32, #tpu.memory_space<vmem>>, vector<8x1024xf32>
    %292 = arith.addf %289, %291 : vector<8x1024xf32>
    %293 = vector.extract_strided_slice %292 {offsets = [0, 0], sizes = [8, 256], strides = [1, 1]} : vector<8x1024xf32> to vector<8x256xf32>
    %cst_107 = arith.constant 5.000000e-01 : f32
    %294 = vector.broadcast %cst_107 : f32 to vector<8x256xf32>
    %295 = arith.mulf %294, %293 : vector<8x256xf32>
    %296 = math.tanh %295 : vector<8x256xf32>
    %cst_108 = arith.constant 5.000000e-01 : f32
    %297 = vector.broadcast %cst_108 : f32 to vector<8x256xf32>
    %298 = arith.mulf %297, %296 : vector<8x256xf32>
    %cst_109 = arith.constant 5.000000e-01 : f32
    %299 = vector.broadcast %cst_109 : f32 to vector<8x256xf32>
    %300 = arith.addf %298, %299 : vector<8x256xf32>
    %301 = vector.extract_strided_slice %292 {offsets = [0, 256], sizes = [8, 256], strides = [1, 1]} : vector<8x1024xf32> to vector<8x256xf32>
    %cst_110 = arith.constant 5.000000e-01 : f32
    %302 = vector.broadcast %cst_110 : f32 to vector<8x256xf32>
    %303 = arith.mulf %302, %301 : vector<8x256xf32>
    %304 = math.tanh %303 : vector<8x256xf32>
    %cst_111 = arith.constant 5.000000e-01 : f32
    %305 = vector.broadcast %cst_111 : f32 to vector<8x256xf32>
    %306 = arith.mulf %305, %304 : vector<8x256xf32>
    %cst_112 = arith.constant 5.000000e-01 : f32
    %307 = vector.broadcast %cst_112 : f32 to vector<8x256xf32>
    %308 = arith.addf %306, %307 : vector<8x256xf32>
    %309 = vector.extract_strided_slice %292 {offsets = [0, 512], sizes = [8, 256], strides = [1, 1]} : vector<8x1024xf32> to vector<8x256xf32>
    %310 = math.tanh %309 : vector<8x256xf32>
    %311 = vector.extract_strided_slice %292 {offsets = [0, 768], sizes = [8, 256], strides = [1, 1]} : vector<8x1024xf32> to vector<8x256xf32>
    %cst_113 = arith.constant 5.000000e-01 : f32
    %312 = vector.broadcast %cst_113 : f32 to vector<8x256xf32>
    %313 = arith.mulf %312, %311 : vector<8x256xf32>
    %314 = math.tanh %313 : vector<8x256xf32>
    %cst_114 = arith.constant 5.000000e-01 : f32
    %315 = vector.broadcast %cst_114 : f32 to vector<8x256xf32>
    %316 = arith.mulf %315, %314 : vector<8x256xf32>
    %cst_115 = arith.constant 5.000000e-01 : f32
    %317 = vector.broadcast %cst_115 : f32 to vector<8x256xf32>
    %318 = arith.addf %316, %317 : vector<8x256xf32>
    %319 = arith.mulf %308, %282 : vector<8x256xf32>
    %320 = arith.mulf %300, %310 : vector<8x256xf32>
    %321 = arith.addf %319, %320 : vector<8x256xf32>
    %322 = math.tanh %321 : vector<8x256xf32>
    %323 = arith.mulf %318, %322 : vector<8x256xf32>
    %c7_i32 = arith.constant 7 : i32
    %c8_i32_116 = arith.constant 8 : i32
    %324 = arith.muli %c7_i32, %c8_i32_116 : i32
    %325 = tpu.assume_multiple %324, 8 : i32
    %326 = arith.truncf %323 : vector<8x256xf32> to vector<8x256xbf16>
    %c0_117 = arith.constant 0 : index
    %c0_118 = arith.constant 0 : index
    %327 = vector.load %arg9[%c0_117, %c0_118] : memref<256x1024xbf16, #tpu.memory_space<vmem>>, vector<256x1024xbf16>
    %cst_119 = arith.constant dense<0.000000e+00> : vector<8x1024xf32>
    %328 = tpu.matmul %326, %327, %cst_119 {dimension_numbers = #tpu.dot_dimension_numbers<[1], [0], [0], [1], [0, 0, 1, 1], [], []>} : vector<8x256xbf16>, vector<256x1024xbf16>, vector<8x1024xf32> -> vector<8x1024xf32>
    %329 = arith.index_cast %325 : i32 to index
    %c0_120 = arith.constant 0 : index
    %330 = vector.load %arg8[%329, %c0_120] : memref<64x1024xf32, #tpu.memory_space<vmem>>, vector<8x1024xf32>
    %331 = arith.addf %328, %330 : vector<8x1024xf32>
    %332 = vector.extract_strided_slice %331 {offsets = [0, 0], sizes = [8, 256], strides = [1, 1]} : vector<8x1024xf32> to vector<8x256xf32>
    %cst_121 = arith.constant 5.000000e-01 : f32
    %333 = vector.broadcast %cst_121 : f32 to vector<8x256xf32>
    %334 = arith.mulf %333, %332 : vector<8x256xf32>
    %335 = math.tanh %334 : vector<8x256xf32>
    %cst_122 = arith.constant 5.000000e-01 : f32
    %336 = vector.broadcast %cst_122 : f32 to vector<8x256xf32>
    %337 = arith.mulf %336, %335 : vector<8x256xf32>
    %cst_123 = arith.constant 5.000000e-01 : f32
    %338 = vector.broadcast %cst_123 : f32 to vector<8x256xf32>
    %339 = arith.addf %337, %338 : vector<8x256xf32>
    %340 = vector.extract_strided_slice %331 {offsets = [0, 256], sizes = [8, 256], strides = [1, 1]} : vector<8x1024xf32> to vector<8x256xf32>
    %cst_124 = arith.constant 5.000000e-01 : f32
    %341 = vector.broadcast %cst_124 : f32 to vector<8x256xf32>
    %342 = arith.mulf %341, %340 : vector<8x256xf32>
    %343 = math.tanh %342 : vector<8x256xf32>
    %cst_125 = arith.constant 5.000000e-01 : f32
    %344 = vector.broadcast %cst_125 : f32 to vector<8x256xf32>
    %345 = arith.mulf %344, %343 : vector<8x256xf32>
    %cst_126 = arith.constant 5.000000e-01 : f32
    %346 = vector.broadcast %cst_126 : f32 to vector<8x256xf32>
    %347 = arith.addf %345, %346 : vector<8x256xf32>
    %348 = vector.extract_strided_slice %331 {offsets = [0, 512], sizes = [8, 256], strides = [1, 1]} : vector<8x1024xf32> to vector<8x256xf32>
    %349 = math.tanh %348 : vector<8x256xf32>
    %350 = vector.extract_strided_slice %331 {offsets = [0, 768], sizes = [8, 256], strides = [1, 1]} : vector<8x1024xf32> to vector<8x256xf32>
    %cst_127 = arith.constant 5.000000e-01 : f32
    %351 = vector.broadcast %cst_127 : f32 to vector<8x256xf32>
    %352 = arith.mulf %351, %350 : vector<8x256xf32>
    %353 = math.tanh %352 : vector<8x256xf32>
    %cst_128 = arith.constant 5.000000e-01 : f32
    %354 = vector.broadcast %cst_128 : f32 to vector<8x256xf32>
    %355 = arith.mulf %354, %353 : vector<8x256xf32>
    %cst_129 = arith.constant 5.000000e-01 : f32
    %356 = vector.broadcast %cst_129 : f32 to vector<8x256xf32>
    %357 = arith.addf %355, %356 : vector<8x256xf32>
    %358 = arith.mulf %347, %321 : vector<8x256xf32>
    %359 = arith.mulf %339, %349 : vector<8x256xf32>
    %360 = arith.addf %358, %359 : vector<8x256xf32>
    %361 = math.tanh %360 : vector<8x256xf32>
    %362 = arith.mulf %357, %361 : vector<8x256xf32>
    %c8_i32_130 = arith.constant 8 : i32
    %c0_131 = arith.constant 0 : index
    %c0_132 = arith.constant 0 : index
    %363 = vector.load %arg4[%c0_131, %c0_132] : memref<256x128xf32, #tpu.memory_space<vmem>>, vector<256x128xf32>
    %cst_133 = arith.constant dense<0.000000e+00> : vector<8x128xf32>
    %364 = tpu.matmul %362, %363, %cst_133 {dimension_numbers = #tpu.dot_dimension_numbers<[1], [0], [0], [1], [0, 0, 1, 1], [], []>} : vector<8x256xf32>, vector<256x128xf32>, vector<8x128xf32> -> vector<8x128xf32>
    %c0_134 = arith.constant 0 : index
    %c0_135 = arith.constant 0 : index
    %365 = vector.load %arg5[%c0_134, %c0_135] : memref<256x128xf32, #tpu.memory_space<vmem>>, vector<256x128xf32>
    %cst_136 = arith.constant dense<0.000000e+00> : vector<8x128xf32>
    %366 = tpu.matmul %50, %365, %cst_136 {dimension_numbers = #tpu.dot_dimension_numbers<[1], [0], [0], [1], [0, 0, 1, 1], [], []>} : vector<8x256xf32>, vector<256x128xf32>, vector<8x128xf32> -> vector<8x128xf32>
    %367 = arith.addf %364, %366 : vector<8x128xf32>
    %c0_137 = arith.constant 0 : index
    %c0_138 = arith.constant 0 : index
    %368 = vector.load %arg6[%c0_137, %c0_138] : memref<1x128xf32, #tpu.memory_space<vmem>>, vector<1x128xf32>
    %369 = vector.broadcast %368 : vector<1x128xf32> to vector<8x128xf32>
    %370 = arith.addf %367, %369 : vector<8x128xf32>
    %c0_139 = arith.constant 0 : index
    %c0_140 = arith.constant 0 : index
    %371 = vector.load %arg7[%c0_139, %c0_140] : memref<8x128xf32, #tpu.memory_space<vmem>>, vector<8x128xf32>
    tpu.vector_store %arg7[%c0_139, %c0_140], %370 {strides = array<i32>} : memref<8x128xf32, #tpu.memory_space<vmem>>, vector<8x128xf32>,
    return
  }
}

</mosaic_0001>

<bundles_post_ra>
// kernel: tpu_custom_call.1
= control target key start
LH: loop header
LB: loop body
LE: loop exit
PB: predicated region body
PF: predicated region fallthrough
CT: control target
= control target key end

     0   :  { %12 = vsyncpa [#allocation6], 0  ;;  %s6788_s0 = inlined_call_operand.vmem [shape: s32[64,1], index: 0, kind: input, shape index: {}]   ;;  %s6789_s1 = inlined_call_operand.hbm [shape: bf16[100,1024], index: 1, kind: input, shape index: {}]   ;;  %s6790_s2 = inlined_call_operand.hbm [shape: bf16[100,1024], index: 2, kind: input, shape index: {}]   ;;  %s6791_s3 = inlined_call_operand.hbm [shape: bf16[256,1024], index: 3, kind: input, shape index: {}]   ;;  %s6792_s4 = inlined_call_operand.hbm [shape: f32[256,128], index: 4, kind: input, shape index: {}]   ;;  %s6793_s5 = inlined_call_operand.hbm [shape: f32[256,128], index: 5, kind: input, shape index: {}]   ;;  %s6794_s6 = inlined_call_operand.vmem [shape: f32[1,128], index: 6, kind: input, shape index: {}]   ;;  %s6795_s7 = inlined_call_operand.hbm [shape: f32[8,128], index: 7, kind: output, shape index: {}]  }
   0x1   :  { %13 = vsyncpa [#allocation9], 0 }
   0x2   :  { %14 = vsyncpa [#allocation12], 0 }
   0x3   :  { %15 = vsyncpa [#allocation7], 0  ;;  %s4387_s24 = smov [#allocation8]   ;;  %s4388_s26 = smov [#allocation5]  }
   0x4   :  { %s35_s25 = sshll.u32 %s4387_s24, 4  ;;  %s23_s27 = sshll.u32 %s4388_s26, 4  ;;  %s36_s25 = int_to_ptr.vmem [resolvable:$true] %s35_s25  ;;  %s4445_s27 = int_to_ptr.vmem [resolvable:$true] %s23_s27 }
   0x5   :  { %s4267_s30 = scalar_lea.hbm %s6790_s2, 6656 }
   0x6   :  { %p4268_p0 = scmp.ne.s32.totalorder %s6790_s2, %s4267_s30  ;;  %p4271_p1 = scmp.lt.u32.totalorder %s4267_s30, %s6790_s2 }
   0x8   :  { %p4273_p2 = pnand %p4271_p1, %p4268_p0 }
   0xa   :  { %4276 = shalt.err (!%p4273_p2)
}
   0xb   :  { %s4277_s12 = scalar_lea.vmem %s36_s25, 6656  ;;  %p4282_p4 = scmp.lt.s32.totalorder %s36_s25, %s36_s25 }
   0xc   :  { %p4278_p3 = scmp.ne.s32.totalorder %s36_s25, %s4277_s12  ;;  %p4283_p5 = scmp.lt.s32.totalorder %s4277_s12, %s4277_s12 }
   0xe   :  { %p4284_p6 = por %p4283_p5, %p4282_p4 }
  0x10   :  { %p4285_p7 = pnand %p4284_p6, %p4278_p3 }
  0x12   :  { %4288 = shalt.err (!%p4285_p7)
}
  0x13   :  { %s4389_s13 = smov 512   ;;  %s4390_s14 = smov 32  }
  0x14   :  { %41 = dma.hbm_to_vmem [thread:$0]  %s6790_s2, 6656, %s36_s25, [#allocation9], %s4389_s13, %s4389_s13, %s4390_s14  }
  0x15   :  { %s4289_s19 = scalar_lea.hbm %s6789_s1, 6656 }
  0x16   :  { %p4290_p8 = scmp.ne.s32.totalorder %s6789_s1, %s4289_s19  ;;  %p4293_p9 = scmp.lt.u32.totalorder %s4289_s19, %s6789_s1 }
  0x18   :  { %p4295_p10 = pnand %p4293_p9, %p4290_p8 }
  0x1a   :  { %4298 = shalt.err (!%p4295_p10)
}
  0x1b   :  { %s4299_s24 = scalar_lea.vmem %s4445_s27, 6656  ;;  %p4304_p12 = scmp.lt.s32.totalorder %s4445_s27, %s4445_s27 }
  0x1c   :  { %p4300_p11 = scmp.ne.s32.totalorder %s4445_s27, %s4299_s24  ;;  %p4305_p13 = scmp.lt.s32.totalorder %s4299_s24, %s4299_s24 }
  0x1e   :  { %p4306_p0 = por %p4305_p13, %p4304_p12 }
  0x20   :  { %p4307_p1 = pnand %p4306_p0, %p4300_p11 }
  0x22   :  { %4310 = shalt.err (!%p4307_p1)
}
  0x23   :  { %29 = dma.hbm_to_vmem [thread:$0]  %s6789_s1, 6656, %s4445_s27, [#allocation6], %s4389_s13, %s4389_s13, %s4390_s14  }
  0x24   :  { %s4391_s26 = smov [#allocation10]   ;;  %s4311_s8 = scalar_lea.hbm %s6792_s4, 4096 }
  0x25   :  { %s47_s28 = sshll.u32 %s4391_s26, 4  ;;  %p4312_p2 = scmp.ne.s32.totalorder %s6792_s4, %s4311_s8  ;;  %s48_s28 = int_to_ptr.vmem [resolvable:$true] %s47_s28 }
  0x26   :  { %p4315_p3 = scmp.lt.u32.totalorder %s4311_s8, %s6792_s4 }
  0x28   :  { %p4317_p4 = pnand %p4315_p3, %p4312_p2 }
  0x2a   :  { %4320 = shalt.err (!%p4317_p4)
}
  0x2b   :  { %s4321_s15 = scalar_lea.vmem %s48_s28, 4096  ;;  %p4326_p6 = scmp.lt.s32.totalorder %s48_s28, %s48_s28 }
  0x2c   :  { %p4322_p5 = scmp.ne.s32.totalorder %s48_s28, %s4321_s15  ;;  %p4327_p7 = scmp.lt.s32.totalorder %s4321_s15, %s4321_s15 }
  0x2e   :  { %p4328_p8 = por %p4327_p7, %p4326_p6 }
  0x30   :  { %p4329_p9 = pnand %p4328_p8, %p4322_p5 }
  0x32   :  { %4332 = shalt.err (!%p4329_p9)
}
  0x33   :  { %s4392_s1 = smov 128   ;;  %s4393_s27 = smov 8  }
  0x34   :  { %53 = dma.hbm_to_vmem [thread:$0]  %s6792_s4, 4096, %s48_s28, [#allocation9], %s4392_s1, %s4392_s1, %s4393_s27  }
  0x35   :  { %s4394_s17 = smov [#allocation11]   ;;  %s4333_s21 = scalar_lea.hbm %s6793_s5, 4096 }
  0x36   :  { %s59_s18 = sshll.u32 %s4394_s17, 4  ;;  %p4334_p10 = scmp.ne.s32.totalorder %s6793_s5, %s4333_s21  ;;  %s60_s18 = int_to_ptr.vmem [resolvable:$true] %s59_s18 }
  0x37   :  { %p4337_p11 = scmp.lt.u32.totalorder %s4333_s21, %s6793_s5 }
  0x39   :  { %p4339_p12 = pnand %p4337_p11, %p4334_p10 }
  0x3b   :  { %4342 = shalt.err (!%p4339_p12)
}
  0x3c   :  { %s4343_s25 = scalar_lea.vmem %s60_s18, 4096  ;;  %p4348_p0 = scmp.lt.s32.totalorder %s60_s18, %s60_s18 }
  0x3d   :  { %p4344_p13 = scmp.ne.s32.totalorder %s60_s18, %s4343_s25  ;;  %p4349_p1 = scmp.lt.s32.totalorder %s4343_s25, %s4343_s25 }
  0x3f   :  { %p4350_p2 = por %p4349_p1, %p4348_p0 }
  0x41   :  { %p4351_p3 = pnand %p4350_p2, %p4344_p13 }
  0x43   :  { %4354 = shalt.err (!%p4351_p3)
}
  0x44   :  { %65 = dma.hbm_to_vmem [thread:$0]  %s6793_s5, 4096, %s60_s18, [#allocation12], %s4392_s1, %s4392_s1, %s4393_s27  }
  0x45   :  { %4377 = dma.done.wait [#allocation6], 6656  }
  0x46   :  { %4378 = vsyncadd [#allocation6], 4294960640 }
  0x47   :  { %4379 = dma.done.wait [#allocation9], 10752  }
  0x48   :  { %4380 = vsyncadd [#allocation9], 4294956544 }
  0x49   :  { %4381 = dma.done.wait [#allocation12], 4096  }
  0x4a   :  { %4382 = vsyncadd [#allocation12], 4294963200  ;;  %s85_s28 = sld [smem:[#allocation0]]   ;;  %s4395_s29 = smov 1024   ;;  %v6796_v0 = vmov 0   ;;  %vm503_vm0 = vcmask 1041408  }
  0x4b   :  { %97 = sst [smem:[#allocation15]] %s4395_s29  ;;  %3814 = vset.pattern.permute.xlu1 %v6796_v0  ;;  %3813 = vset.pattern.permute.xlu0 %v6796_v0  ;;  %s4397_s5 = smov 64   ;;  %vm490_vm3 = vcmask 818176  }
  0x4c   :  { %99 = sst [smem:[#allocation15 + $0x1]] %s4395_s29  ;;  %560 = vmatprep.mubr.bf16.mxu0 %v6796_v0  ;;  %633 = vmatprep.mubr.bf16.mxu1 %v6796_v0  ;;  %s4398_s30 = smov [#allocation3]  }
  0x4d   :  { %101 = sst [smem:[#allocation15 + $0x2]] %s4393_s27  ;;  %s93_s8 = sshll.u32 %s4398_s30, 4  ;;  %s94_s8 = int_to_ptr.vmem [resolvable:$true] %s93_s8 }
  0x4e   :  { %103 = sst [smem:[#allocation15 + $0x3]] %s4397_s5  ;;  %s4399_s9 = smov 2  }
  0x4f   :  { %105 = sst [smem:[#allocation15 + $0x4]] %s4392_s1  ;;  %s4400_s12 = smov 4  }
  0x50   :  { %107 = sst [smem:[#allocation15 + $0x5]] %s4399_s9  ;;  %s3508_s10 = sshll.u32 %s85_s28, 26 }
  0x51   :  { %109 = sst [smem:[#allocation15 + $0x6]] %s4389_s13  ;;  %s3509_s11 = sadd.s32 134217728, %s3508_s10 }
  0x52   :  { %111 = sst [smem:[#allocation15 + $0x7]] %s4397_s5  ;;  %s4401_s15 = smov [#allocation4]  }
  0x53   :  { %113 = sst [smem:[#allocation15 + $0x8]] %s4400_s12  ;;  %s4402_s14 = smov [#allocation14]  }
  0x54   :  { %115 = dma.general %s6791_s3, 16384, %s94_s8, %s4401_s15, %s4402_s14, [#allocation15], %s3509_s11, 0  }
  0x55   :  { %v118_v1 = vld [vmem:[%s6788_s0 + $0x10] sm:$0xff]  ;;  %v116_v2 = vld [vmem:[%s6788_s0] sm:$0xff]  ;;  %v119_v3 = vld [vmem:[%s6788_s0 + $0x18] sm:$0xff] }
  0x56   :  { %133 = vperm.xlu1 %3814, %v118_v1   ;;  %127 = vperm.xlu0 %3813, %v116_v2   ;;  %v117_v4 = vld [vmem:[%s6788_s0 + $0x8] sm:$0xff]  ;;  %v178_v5 = vld [vmem:[#allocation5] sm:$0xff]  ;;  %v123_v33 = vld [vmem:[%s6788_s0 + $0x38] sm:$0xff] }
  0x57   :  { %v182_v6 = vld [vmem:[#allocation5 + $0x20] sm:$0xff]  ;;  %v179_v7 = vld [vmem:[#allocation5 + $0x8] sm:$0xff]  ;;  %v122_v34 = vld [vmem:[%s6788_s0 + $0x30] sm:$0xff] }
  0x58   :  { %v183_v8 = vld [vmem:[#allocation5 + $0x28] sm:$0xff]  ;;  %v3519_v10 = vcombine.high %v178_v5, %v182_v6  ;;  %v3518_v11 = vcombine.low %v178_v5, %v182_v6  ;;  %v186_v14 = vld [vmem:[#allocation5 + $0x40] sm:$0xff]  ;;  %v4544_v37 = vld [vmem:[#allocation5 + $0x10] sm:$0xff] }
  0x59   :  { %v121_v9 = vld [vmem:[%s6788_s0 + $0x28] sm:$0xff]  ;;  %v3521_v12 = vcombine.high %v179_v7, %v183_v8  ;;  %v3520_v13 = vcombine.low %v179_v7, %v183_v8  ;;  %v190_v15 = vld [vmem:[#allocation5 + $0x60] sm:$0xff]  ;;  %v4546_v38 = vld [vmem:[#allocation5 + $0x30] sm:$0xff] }
  0x5a   :  { %v187_v16 = vld [vmem:[#allocation5 + $0x48] sm:$0xff]  ;;  %136 = vperm.xlu1 %3814, %v119_v3   ;;  %130 = vperm.xlu0 %3813, %v117_v4   ;;  %v3527_v17 = vcombine.high %v186_v14, %v190_v15  ;;  %v194_v19 = vld [vmem:[#allocation5 + $0x80] sm:$0xff]  ;;  %v3526_v25 = vcombine.low %v186_v14, %v190_v15  ;;  %v4548_v42 = vld [vmem:[#allocation5 + $0x18] sm:$0xff]  ;;  %v3522_v47 = vcombine.low %v4544_v37, %v4546_v38 }
  0x5b   :  { %v191_v18 = vld [vmem:[#allocation5 + $0x68] sm:$0xff]  ;;  %v198_v20 = vld [vmem:[#allocation5 + $0xa0] sm:$0xff]  ;;  %528 = vmatprep.subr.bf16.mxu0 %v3519_v10  ;;  %601 = vmatprep.subr.bf16.mxu1 %v3521_v12  ;;  %v4550_v43 = vld [vmem:[#allocation5 + $0x38] sm:$0xff]  ;;  %v3523_v8 = vcombine.high %v4544_v37, %v4546_v38  ;;  %v124_v10 = vlaneseq }
  0x5c   :  { %v120_v21 = vld [vmem:[%s6788_s0 + $0x20] sm:$0xff]  ;;  %v3529_v22 = vcombine.high %v187_v16, %v191_v18  ;;  %v195_v23 = vld [vmem:[#allocation5 + $0x88] sm:$0xff]  ;;  %529 = vmatpush1.bf16.msra.mxu0 %v3518_v11  ;;  %602 = vmatpush1.bf16.msra.mxu1 %v3520_v13  ;;  %v3528_v26 = vcombine.low %v187_v16, %v191_v18  ;;  %v3535_v27 = vcombine.high %v194_v19, %v198_v20  ;;  %v188_v15 = vld [vmem:[#allocation5 + $0x50] sm:$0xff] }
  0x5d   :  { %v199_v24 = vld [vmem:[#allocation5 + $0xa8] sm:$0xff]  ;;  %530 = vmatprep.subr.bf16.mxu0 %v3527_v17  ;;  %v202_v29 = vld [vmem:[#allocation5 + $0xc0] sm:$0xff]  ;;  %v3534_v35 = vcombine.low %v194_v19, %v198_v20  ;;  %v3524_v48 = vcombine.low %v4548_v42, %v4550_v43  ;;  %v4564_v11 = vand.u32 127, %v124_v10  ;;  %v192_v16 = vld [vmem:[#allocation5 + $0x70] sm:$0xff]  ;;  %v4403_v19 = vmov 0.0  }
  0x5e   :  { %603 = vmatprep.subr.bf16.mxu1 %v3529_v22  ;;  %v3537_v28 = vcombine.high %v195_v23, %v199_v24  ;;  %142 = vperm.xlu1 %3814, %v121_v9   ;;  %v206_v30 = vld [vmem:[#allocation5 + $0xe0] sm:$0xff]  ;;  %v203_v31 = vld [vmem:[#allocation5 + $0xc8] sm:$0xff]  ;;  %v3536_v36 = vcombine.low %v195_v23, %v199_v24  ;;  %v3525_v9 = vcombine.high %v4548_v42, %v4550_v43  ;;  %v189_v17 = vld [vmem:[#allocation5 + $0x58] sm:$0xff] }
  0x5f   :  { %139 = vperm.xlu0 %3813, %v120_v21   ;;  %v207_v32 = vld [vmem:[#allocation5 + $0xe8] sm:$0xff]  ;;  %v3543_v39 = vcombine.high %v202_v29, %v206_v30  ;;  %v210_v41 = vld [vmem:[#allocation5 + $0x100] sm:$0xff]  ;;  %v3542_v49 = vcombine.low %v202_v29, %v206_v30  ;;  %v193_v18 = vld [vmem:[#allocation5 + $0x78] sm:$0xff]  ;;  %v3531_v23 = vcombine.high %v188_v15, %v192_v16 }
  0x60   :  { %531 = vmatpush1.bf16.msra.mxu0 %v3526_v25  ;;  %604 = vmatpush1.bf16.msra.mxu1 %v3528_v26  ;;  %v3545_v40 = vcombine.high %v203_v31, %v207_v32  ;;  %v214_v44 = vld [vmem:[#allocation5 + $0x120] sm:$0xff]  ;;  %v211_v45 = vld [vmem:[#allocation5 + $0x108] sm:$0xff]  ;;  %v3544_v50 = vcombine.low %v203_v31, %v207_v32  ;;  %v196_v24 = vld [vmem:[#allocation5 + $0x90] sm:$0xff]  ;;  %v3530_v31 = vcombine.low %v188_v15, %v192_v16 }
  0x61   :  { %532 = vmatprep.subr.bf16.mxu0 %v3535_v27  ;;  %605 = vmatprep.subr.bf16.mxu1 %v3537_v28  ;;  %v215_v46 = vld [vmem:[#allocation5 + $0x128] sm:$0xff]  ;;  %v3551_v51 = vcombine.high %v210_v41, %v214_v44  ;;  %v218_v53 = vld [vmem:[#allocation5 + $0x140] sm:$0xff]  ;;  %v3550_v57 = vcombine.low %v210_v41, %v214_v44  ;;  %v3533_v27 = vcombine.high %v189_v17, %v193_v18  ;;  %v200_v28 = vld [vmem:[#allocation5 + $0xb0] sm:$0xff] }
  0x62   :  { %148 = vperm.xlu1 %3814, %v123_v33   ;;  %v3553_v52 = vcombine.high %v211_v45, %v215_v46  ;;  %v222_v54 = vld [vmem:[#allocation5 + $0x160] sm:$0xff]  ;;  %v219_v55 = vld [vmem:[#allocation5 + $0x148] sm:$0xff]  ;;  %v3552_v58 = vcombine.low %v211_v45, %v215_v46  ;;  %v197_v29 = vld [vmem:[#allocation5 + $0x98] sm:$0xff]  ;;  %v3532_v32 = vcombine.low %v189_v17, %v193_v18  ;;  %v3538_v43 = vcombine.low %v196_v24, %v200_v28 }
  0x63   :  { %145 = vperm.xlu0 %3813, %v122_v34   ;;  %v223_v56 = vld [vmem:[#allocation5 + $0x168] sm:$0xff]  ;;  %v3559_v59 = vcombine.high %v218_v53, %v222_v54  ;;  %v226_v61 = vld [vmem:[#allocation5 + $0x180] sm:$0x33]  ;;  %v3558_v63 = vcombine.low %v218_v53, %v222_v54  ;;  %v201_v30 = vld [vmem:[#allocation5 + $0xb8] sm:$0xff] }
  0x64   :  { %533 = vmatpush1.bf16.msra.mxu0 %v3534_v35  ;;  %606 = vmatpush1.bf16.msra.mxu1 %v3536_v36  ;;  %v3561_v60 = vcombine.high %v219_v55, %v223_v56  ;;  %v227_v62 = vld [vmem:[#allocation5 + $0x188] sm:$0x33]  ;;  %v3560_v1 = vcombine.low %v219_v55, %v223_v56  ;;  %v3567_v2 = vcombine.high %v226_v61, %v226_v61  ;;  %v204_v37 = vld [vmem:[#allocation5 + $0xd0] sm:$0xff]  ;;  %v209_v41 = vld [vmem:[#allocation5 + $0xf8] sm:$0xff] }
  0x65   :  { %534 = vmatprep.subr.bf16.mxu0 %v3543_v39  ;;  %607 = vmatprep.subr.bf16.mxu1 %v3545_v40  ;;  %v3566_v3 = vcombine.low %v226_v61, %v226_v61  ;;  %v3569_v4 = vcombine.high %v227_v62, %v227_v62  ;;  %v3568_v5 = vcombine.low %v227_v62, %v227_v62  ;;  %v208_v38 = vld [vmem:[#allocation5 + $0xf0] sm:$0xff]  ;;  %v205_v40 = vld [vmem:[#allocation5 + $0xd8] sm:$0xff]  ;;  %v892_v17 = vld [vmem:[#allocation8] sm:$0xff] }
  0x66   :  { %v3541_v34 = vcombine.high %v197_v29, %v201_v30  ;;  %v3540_v44 = vcombine.low %v197_v29, %v201_v30  ;;  %v3547_v46 = vcombine.high %v204_v37, %v208_v38  ;;  %v3546_v54 = vcombine.low %v204_v37, %v208_v38  ;;  %v224_v61 = vld [vmem:[#allocation5 + $0x170] sm:$0xff]  ;;  %v221_v62 = vld [vmem:[#allocation5 + $0x158] sm:$0xff]  ;;  %v896_v18 = vld [vmem:[#allocation8 + $0x20] sm:$0xff] }
  0x67   :  { %886 = vperm.xlu0 %3813, %v123_v33   ;;  %v505_v6 = vsel %vm503_vm0, %v3566_v3, 0  ;;  %v511_v7 = vsel %vm503_vm0, %v3568_v5, 0  ;;  %v3539_v33 = vcombine.high %v196_v24, %v200_v28  ;;  %v3548_v55 = vcombine.low %v205_v40, %v209_v41  ;;  %v904_v28 = vld [vmem:[#allocation8 + $0x60] sm:$0xff]  ;;  %v901_v29 = vld [vmem:[#allocation8 + $0x48] sm:$0xff] }
  0x68   :  { %535 = vmatpush1.bf16.msra.mxu0 %v3542_v49  ;;  %608 = vmatpush1.bf16.msra.mxu1 %v3544_v50  ;;  %v3549_v49 = vcombine.high %v205_v40, %v209_v41  ;;  %v216_v50 = vld [vmem:[#allocation5 + $0x130] sm:$0xff]  ;;  %v905_v30 = vld [vmem:[#allocation8 + $0x68] sm:$0xff] }
  0x69   :  { %536 = vmatprep.subr.bf16.mxu0 %v3551_v51  ;;  %609 = vmatprep.subr.bf16.mxu1 %v3553_v52  ;;  %v213_v51 = vld [vmem:[#allocation5 + $0x118] sm:$0xff]  ;;  %v913_v37 = vld [vmem:[#allocation8 + $0xa8] sm:$0xff]  ;;  %v3605_v40 = vcombine.low %v901_v29, %v905_v30 }
  0x6a   :  { %v217_v52 = vld [vmem:[#allocation5 + $0x138] sm:$0xff] }
  0x6b   :  { %v3556_v3 = vcombine.low %v213_v51, %v217_v52 }
  0x6c   :  { %537 = vmatpush1.bf16.msra.mxu0 %v3550_v57  ;;  %610 = vmatpush1.bf16.msra.mxu1 %v3552_v58  ;;  %v3557_v57 = vcombine.high %v213_v51, %v217_v52  ;;  %v928_v52 = vld [vmem:[#allocation8 + $0x120] sm:$0xff] }
  0x6d   :  { %538 = vmatprep.subr.bf16.mxu0 %v3559_v59  ;;  %611 = vmatprep.subr.bf16.mxu1 %v3561_v60  ;;  %v220_v60 = vld [vmem:[#allocation5 + $0x150] sm:$0xff] }
  0x6e   :  { %v3563_v5 = vcombine.high %v220_v60, %v224_v61 }
  0x70   :  { %539 = vmatpush1.bf16.msra.mxu0 %v3558_v63  ;;  %612 = vmatpush1.bf16.msra.mxu1 %v3560_v1  ;;  %v225_v63 = vld [vmem:[#allocation5 + $0x178] sm:$0xff] }
  0x71   :  { %3574 = vmatprep.subr.msk.bf16.mxu0 %vm503_vm0, %v3567_v2  ;;  %3579 = vmatprep.subr.msk.bf16.mxu1 %vm503_vm0, %v3569_v4  ;;  %v3564_v10 = vcombine.low %v221_v62, %v225_v63 }
  0x74   :  { %541 = vmatpush1.bf16.msra.mxu0 %v505_v6  ;;  %614 = vmatpush1.bf16.msra.mxu1 %v511_v7  ;;  %v228_v6 = vld [vmem:[#allocation5 + $0x190] sm:$0x33]  ;;  %v3565_v7 = vcombine.high %v221_v62, %v225_v63  ;;  %v933_v62 = vld [vmem:[#allocation8 + $0x148] sm:$0xff] }
  0x75   :  { %674 = vmatprep.subr.bf16.mxu0 %v3523_v8  ;;  %747 = vmatprep.subr.bf16.mxu1 %v3525_v9  ;;  %v229_v8 = vld [vmem:[#allocation5 + $0x198] sm:$0x33]  ;;  %v3562_v9 = vcombine.low %v220_v60, %v224_v61  ;;  %v932_v60 = vld [vmem:[#allocation8 + $0x140] sm:$0xff]  ;;  %v937_v63 = vld [vmem:[#allocation8 + $0x168] sm:$0xff] }
  0x76   :  { %v3572_v15 = vcombine.low %v229_v8, %v229_v8  ;;  %v936_v61 = vld [vmem:[#allocation8 + $0x160] sm:$0xff] }
  0xd5   :  { %v128_v12 = vpop.permute.xlu0 %127  ;;  %v134_v13 = vpop.permute.xlu1 %133 }
  0xd6   :  { %vm150_vm1 = vcmp.eq.s32.totalorder %v128_v12, %v4564_v11  ;;  %vm152_vm4 = vcmp.eq.s32.totalorder %v134_v13, %v4564_v11  ;;  %v3571_v12 = vcombine.high %v228_v6, %v228_v6  ;;  %v3570_v13 = vcombine.low %v228_v6, %v228_v6  ;;  %v941_v6 = vld [vmem:[#allocation8 + $0x188] sm:$0x33] }
  0xd7   :  { %v3510_v20 = vsel %vm150_vm1, 1.0, %v4403_v19  ;;  %v3512_v35 = vsel %vm152_vm4, 1.0, %v4403_v19 }
  0xd8   :  { %v517_v24 = vsel %vm503_vm0, %v3570_v13, 0  ;;  %v3645_v13 = vcombine.low %v941_v6, %v941_v6 }
  0xd9   :  { %v131_v14 = vpop.permute.xlu0 %130  ;;  %v137_v25 = vpop.permute.xlu1 %136 }
  0xda   :  { %vm151_vm2 = vcmp.eq.s32.totalorder %v131_v14, %v4564_v11  ;;  %vm153_vm5 = vcmp.eq.s32.totalorder %v137_v25, %v4564_v11  ;;  %v3573_v14 = vcombine.high %v229_v8, %v229_v8  ;;  %v523_v25 = vsel %vm503_vm0, %v3572_v15, 0  ;;  %v898_v15 = vld [vmem:[#allocation8 + $0x30] sm:$0xff] }
  0xdb   :  { %v3511_v21 = vsel %vm151_vm2, 1.0, %v4403_v19  ;;  %v3513_v36 = vsel %vm153_vm5, 1.0, %v4403_v19  ;;  %v3637_v8 = vcombine.low %v933_v62, %v937_v63 }
  0xdc   :  { %v4570_v22 = vpack.c.bf16 %v3511_v21, %v3510_v20  ;;  %v4590_v45 = vpack.c.bf16 %v3513_v36, %v3512_v35  ;;  %v893_v20 = vld [vmem:[#allocation8 + $0x8] sm:$0xff]  ;;  %v3606_v35 = vcombine.high %v901_v29, %v905_v30  ;;  %v912_v36 = vld [vmem:[#allocation8 + $0xa0] sm:$0xff]  ;;  %v910_v30 = vld [vmem:[#allocation8 + $0x90] sm:$0xff] }
  0xdd   :  { %v143_v42 = vpop.permute.xlu1 %142  ;;  %v897_v21 = vld [vmem:[#allocation8 + $0x28] sm:$0xff] }
  0xde   :  { %v140_v26 = vpop.permute.xlu0 %139  ;;  %3575 = vmatmul.mubr.msk.bf16.vlgmr.msra.gmra.mrb[0].mxu0 %vm490_vm3, %v4570_v22  ;;  %3580 = vmatmul.mubr.msk.bf16.vlgmr.msra.gmra.mrb[0].mxu1 %vm490_vm3, %v4570_v22  ;;  %vm155_vm6 = vcmp.eq.s32.totalorder %v143_v42, %v4564_v11 }
  0xdf   :  { %675 = vmatpush1.bf16.msra.mxu0 %v3522_v47  ;;  %748 = vmatpush1.bf16.msra.mxu1 %v3524_v48  ;;  %v212_v47 = vld [vmem:[#allocation5 + $0x110] sm:$0xff]  ;;  %vm154_vm7 = vcmp.eq.s32.totalorder %v140_v26, %v4564_v11  ;;  %v3515_v58 = vsel %vm155_vm6, 1.0, %v4403_v19  ;;  %v3598_v26 = vcombine.high %v893_v20, %v897_v21 }
  0xe0   :  { %676 = vmatprep.subr.bf16.mxu0 %v3531_v23  ;;  %570 = vmatprep.mubr.bf16.mxu0 %v6796_v0  ;;  %v3555_v56 = vcombine.high %v212_v47, %v216_v50  ;;  %v3514_v59 = vsel %vm154_vm7, 1.0, %v4403_v19  ;;  %v3554_v2 = vcombine.low %v212_v47, %v216_v50  ;;  %v921_v47 = vld [vmem:[#allocation8 + $0xe8] sm:$0xff]  ;;  %v924_v50 = vld [vmem:[#allocation8 + $0x100] sm:$0xff] }
  0xe1   :  { %643 = vmatprep.mubr.bf16.mxu1 %v6796_v0  ;;  %749 = vmatprep.subr.bf16.mxu1 %v3533_v27  ;;  %v149_v1 = vpop.permute.xlu1 %148  ;;  %v4606_v4 = vpack.c.bf16 %v3515_v58, %v3514_v59  ;;  %v900_v27 = vld [vmem:[#allocation8 + $0x40] sm:$0xff]  ;;  %v3628_v58 = vcombine.high %v924_v50, %v928_v52 }
  0xe2   :  { %v4587_v39 = vpop.permute.xlu0 %145  ;;  %vm157_vm9 = vcmp.eq.s32.totalorder %v149_v1, %v4564_v11  ;;  %v3603_v38 = vcombine.low %v900_v27, %v904_v28  ;;  %v3627_v1 = vcombine.low %v924_v50, %v928_v52 }
  0xe3   :  { %677 = vmatpush1.bf16.msra.mxu0 %v3530_v31  ;;  %750 = vmatpush1.bf16.msra.mxu1 %v3532_v32  ;;  %vm156_vm10 = vcmp.eq.s32.totalorder %v4587_v39, %v4564_v11  ;;  %v3517_v16 = vsel %vm157_vm9, 1.0, %v4403_v19  ;;  %v3595_v31 = vcombine.low %v892_v17, %v896_v18  ;;  %v3597_v32 = vcombine.low %v893_v20, %v897_v21  ;;  %v909_v39 = vld [vmem:[#allocation8 + $0x88] sm:$0xff]  ;;  %v902_v21 = vld [vmem:[#allocation8 + $0x50] sm:$0xff] }
  0xe4   :  { %678 = vmatprep.subr.bf16.mxu0 %v3539_v33  ;;  %751 = vmatprep.subr.bf16.mxu1 %v3541_v34  ;;  %v3604_v33 = vcombine.high %v900_v27, %v904_v28  ;;  %v908_v34 = vld [vmem:[#allocation8 + $0x80] sm:$0xff]  ;;  %v3614_v42 = vcombine.high %v909_v39, %v913_v37 }
  0xe5   :  { %v3612_v41 = vcombine.high %v908_v34, %v912_v36 }
  0xe6   :  { %v887_v48 = vpop.permute.xlu0 %886  ;;  %3576 = vmatmul.mubr.msk.bf16.gmra.mrb[4].mxu0 %vm490_vm3, %v4590_v45  ;;  %3581 = vmatmul.mubr.msk.bf16.gmra.mrb[4].mxu1 %vm490_vm3, %v4590_v45 }
  0xe7   :  { %vm888_vm8 = vcmp.eq.s32.totalorder %v887_v48, %v4564_v11  ;;  %679 = vmatpush1.bf16.msra.mxu0 %v3538_v43  ;;  %752 = vmatpush1.bf16.msra.mxu1 %v3540_v44  ;;  %v3516_v11 = vsel %vm156_vm10, 1.0, %v4403_v19  ;;  %v916_v43 = vld [vmem:[#allocation8 + $0xc0] sm:$0xff]  ;;  %v3611_v48 = vcombine.low %v908_v34, %v912_v36 }
  0xe8   :  { %v4600_v53 = vsel %vm888_vm8, 1.0, %v4403_v19  ;;  %680 = vmatprep.subr.bf16.mxu0 %v3547_v46  ;;  %580 = vmatprep.mubr.bf16.mxu0 %v6796_v0  ;;  %v4619_v23 = vpack.c.bf16 %v3517_v16, %v3516_v11  ;;  %v3596_v19 = vcombine.high %v892_v17, %v896_v18  ;;  %v920_v44 = vld [vmem:[#allocation8 + $0xe0] sm:$0xff]  ;;  %v917_v46 = vld [vmem:[#allocation8 + $0xc8] sm:$0xff]  ;;  %v895_v16 = vld [vmem:[#allocation8 + $0x18] sm:$0xff]  ;;  %v1214_v17 = vsel %vm503_vm0, %v3645_v13, 0 }
  0xe9   :  { %653 = vmatprep.mubr.bf16.mxu1 %v6796_v0  ;;  %753 = vmatprep.subr.bf16.mxu1 %v3549_v49  ;;  %v3620_v49 = vcombine.high %v916_v43, %v920_v44  ;;  %v3622_v51 = vcombine.high %v917_v46, %v921_v47  ;;  %v899_v11 = vld [vmem:[#allocation8 + $0x38] sm:$0xff]  ;;  %v4661_v28 = vpack.c.bf16 %v4600_v53, %v4600_v53 }
  0xea   :  { %v3602_v20 = vcombine.high %v895_v16, %v899_v11  ;;  %v3601_v27 = vcombine.low %v895_v16, %v899_v11 }
  0xeb   :  { %681 = vmatpush1.bf16.msra.mxu0 %v3546_v54  ;;  %754 = vmatpush1.bf16.msra.mxu1 %v3548_v55  ;;  %v925_v54 = vld [vmem:[#allocation8 + $0x108] sm:$0xff] }
  0xec   :  { %682 = vmatprep.subr.bf16.mxu0 %v3555_v56  ;;  %755 = vmatprep.subr.bf16.mxu1 %v3557_v57  ;;  %v929_v55 = vld [vmem:[#allocation8 + $0x128] sm:$0xff]  ;;  %v3619_v56 = vcombine.low %v916_v43, %v920_v44  ;;  %v3621_v57 = vcombine.low %v917_v46, %v921_v47  ;;  %v926_v46 = vld [vmem:[#allocation8 + $0x110] sm:$0xff] }
  0xed   :  { %v3630_v59 = vcombine.high %v925_v54, %v929_v55  ;;  %v930_v47 = vld [vmem:[#allocation8 + $0x130] sm:$0xff] }
  0xee   :  { %3577 = vmatmul.mubr.msk.bf16.gmra.mrb[8].mxu0 %vm490_vm3, %v4606_v4  ;;  %3582 = vmatmul.mubr.msk.bf16.gmra.mrb[8].mxu1 %vm490_vm3, %v4606_v4 }
  0xef   :  { %683 = vmatpush1.bf16.msra.mxu0 %v3554_v2  ;;  %756 = vmatpush1.bf16.msra.mxu1 %v3556_v3  ;;  %v3636_v2 = vcombine.high %v932_v60, %v936_v61  ;;  %v940_v3 = vld [vmem:[#allocation8 + $0x180] sm:$0x33] }
  0xf0   :  { %684 = vmatprep.subr.bf16.mxu0 %v3563_v5  ;;  %590 = vmatprep.mubr.bf16.mxu0 %v6796_v0  ;;  %v3638_v5 = vcombine.high %v933_v62, %v937_v63  ;;  %v942_v62 = vld [vmem:[#allocation8 + $0x190] sm:$0x33]  ;;  %v943_v63 = vld [vmem:[#allocation8 + $0x198] sm:$0x33] }
  0xf1   :  { %663 = vmatprep.mubr.bf16.mxu1 %v6796_v0  ;;  %757 = vmatprep.subr.bf16.mxu1 %v3565_v7  ;;  %v3635_v7 = vcombine.low %v932_v60, %v936_v61 }
  0xf3   :  { %685 = vmatpush1.bf16.msra.mxu0 %v3562_v9  ;;  %758 = vmatpush1.bf16.msra.mxu1 %v3564_v10  ;;  %v3644_v9 = vcombine.high %v940_v3, %v940_v3  ;;  %v3646_v10 = vcombine.high %v941_v6, %v941_v6  ;;  %v3649_v6 = vcombine.low %v943_v63, %v943_v63 }
  0xf4   :  { %3584 = vmatprep.subr.msk.bf16.mxu0 %vm503_vm0, %v3571_v12  ;;  %3589 = vmatprep.subr.msk.bf16.mxu1 %vm503_vm0, %v3573_v14  ;;  %v3643_v12 = vcombine.low %v940_v3, %v940_v3  ;;  %v894_v14 = vld [vmem:[#allocation8 + $0x10] sm:$0xff]  ;;  %v3650_v3 = vcombine.high %v943_v63, %v943_v63 }
  0xf5   :  { %v3600_v18 = vcombine.high %v894_v14, %v898_v15 }
  0xf6   :  { %3578 = vmatmul.mubr.msk.bf16.gmra.mrb[12].mxu0 %vm490_vm3, %v4619_v23  ;;  %3583 = vmatmul.mubr.msk.bf16.gmra.mrb[12].mxu1 %vm490_vm3, %v4619_v23 }
  0xf7   :  { %687 = vmatpush1.bf16.msra.mxu0 %v517_v24  ;;  %760 = vmatpush1.bf16.msra.mxu1 %v523_v25  ;;  %v906_v24 = vld [vmem:[#allocation8 + $0x70] sm:$0xff]  ;;  %v903_v25 = vld [vmem:[#allocation8 + $0x58] sm:$0xff] }
  0xf8   :  { %706 = vmatprep.mubr.bf16.mxu0 %v6796_v0  ;;  %779 = vmatprep.mubr.bf16.mxu1 %v6796_v0  ;;  %v3608_v29 = vcombine.high %v902_v21, %v906_v24  ;;  %v3607_v34 = vcombine.low %v902_v21, %v906_v24 }
  0xf9   :  { %1231 = vmatprep.subr.bf16.mxu0 %v3596_v19  ;;  %1272 = vmatprep.subr.bf16.mxu1 %v3598_v26  ;;  %v907_v19 = vld [vmem:[#allocation8 + $0x78] sm:$0xff]  ;;  %v3599_v26 = vcombine.low %v894_v14, %v898_v15 }
  0xfe   :  { %3585 = vmatmul.mubr.msk.bf16.vlgmr.msra.gmra.mrb[16].mxu0 %vm490_vm3, %v4570_v22  ;;  %3590 = vmatmul.mubr.msk.bf16.vlgmr.msra.gmra.mrb[16].mxu1 %vm490_vm3, %v4570_v22  ;;  %v3613_v22 = vcombine.low %v909_v39, %v913_v37  ;;  %v918_v39 = vld [vmem:[#allocation8 + $0xd0] sm:$0xff] }
  0xff   :  { %1232 = vmatpush1.bf16.msra.mxu0 %v3595_v31  ;;  %1273 = vmatpush1.bf16.msra.mxu1 %v3597_v32  ;;  %v914_v31 = vld [vmem:[#allocation8 + $0xb0] sm:$0xff]  ;;  %v911_v32 = vld [vmem:[#allocation8 + $0x98] sm:$0xff] }
 0x100   :  { %1233 = vmatprep.subr.bf16.mxu0 %v3604_v33  ;;  %716 = vmatprep.mubr.bf16.mxu0 %v6796_v0  ;;  %v915_v33 = vld [vmem:[#allocation8 + $0xb8] sm:$0xff]  ;;  %v3616_v53 = vcombine.high %v910_v30, %v914_v31  ;;  %v922_v37 = vld [vmem:[#allocation8 + $0xf0] sm:$0xff] }
 0x101   :  { %789 = vmatprep.mubr.bf16.mxu1 %v6796_v0  ;;  %1274 = vmatprep.subr.bf16.mxu1 %v3606_v35  ;;  %v3609_v35 = vcombine.low %v903_v25, %v907_v19  ;;  %v3618_v36 = vcombine.high %v911_v32, %v915_v33  ;;  %v3624_v43 = vcombine.high %v918_v39, %v922_v37 }
 0x103   :  { %1234 = vmatpush1.bf16.msra.mxu0 %v3603_v38  ;;  %1275 = vmatpush1.bf16.msra.mxu1 %v3605_v40  ;;  %v919_v38 = vld [vmem:[#allocation8 + $0xd8] sm:$0xff] }
 0x104   :  { %1235 = vmatprep.subr.bf16.mxu0 %v3612_v41  ;;  %1276 = vmatprep.subr.bf16.mxu1 %v3614_v42  ;;  %v923_v40 = vld [vmem:[#allocation8 + $0xf8] sm:$0xff]  ;;  %v3615_v41 = vcombine.low %v910_v30, %v914_v31  ;;  %v3617_v42 = vcombine.low %v911_v32, %v915_v33 }
 0x105   :  { %v3626_v44 = vcombine.high %v919_v38, %v923_v40  ;;  %v3625_v50 = vcombine.low %v919_v38, %v923_v40 }
 0x106   :  { %3586 = vmatmul.mubr.msk.bf16.gmra.mrb[20].mxu0 %vm490_vm3, %v4590_v45  ;;  %3591 = vmatmul.mubr.msk.bf16.gmra.mrb[20].mxu1 %vm490_vm3, %v4590_v45  ;;  %v3629_v45 = vcombine.low %v925_v54, %v929_v55  ;;  %v934_v54 = vld [vmem:[#allocation8 + $0x150] sm:$0xff] }
 0x107   :  { %1236 = vmatpush1.bf16.msra.mxu0 %v3611_v48  ;;  %1277 = vmatpush1.bf16.msra.mxu1 %v3613_v22  ;;  %v927_v48 = vld [vmem:[#allocation8 + $0x118] sm:$0xff]  ;;  %v938_v55 = vld [vmem:[#allocation8 + $0x170] sm:$0xff] }
 0x108   :  { %1237 = vmatprep.subr.bf16.mxu0 %v3620_v49  ;;  %726 = vmatprep.mubr.bf16.mxu0 %v6796_v0  ;;  %v931_v22 = vld [vmem:[#allocation8 + $0x138] sm:$0xff]  ;;  %v3623_v49 = vcombine.low %v918_v39, %v922_v37  ;;  %v3640_v60 = vcombine.high %v934_v54, %v938_v55 }
 0x109   :  { %799 = vmatprep.mubr.bf16.mxu1 %v6796_v0  ;;  %1278 = vmatprep.subr.bf16.mxu1 %v3622_v51  ;;  %v3632_v51 = vcombine.high %v926_v46, %v930_v47  ;;  %v3634_v52 = vcombine.high %v927_v48, %v931_v22 }
 0x10b   :  { %1238 = vmatpush1.bf16.msra.mxu0 %v3619_v56  ;;  %1279 = vmatpush1.bf16.msra.mxu1 %v3621_v57  ;;  %v935_v56 = vld [vmem:[#allocation8 + $0x158] sm:$0xff] }
 0x10c   :  { %1239 = vmatprep.subr.bf16.mxu0 %v3628_v58  ;;  %1280 = vmatprep.subr.bf16.mxu1 %v3630_v59  ;;  %v939_v57 = vld [vmem:[#allocation8 + $0x178] sm:$0xff]  ;;  %v3631_v58 = vcombine.low %v926_v46, %v930_v47  ;;  %v3633_v59 = vcombine.low %v927_v48, %v931_v22 }
 0x10d   :  { %v3642_v61 = vcombine.high %v935_v56, %v939_v57 }
 0x10e   :  { %3587 = vmatmul.mubr.msk.bf16.gmra.mrb[24].mxu0 %vm490_vm3, %v4606_v4  ;;  %3592 = vmatmul.mubr.msk.bf16.gmra.mrb[24].mxu1 %vm490_vm3, %v4606_v4  ;;  %v1208_v4 = vsel %vm503_vm0, %v3643_v12, 0 }
 0x10f   :  { %1240 = vmatpush1.bf16.msra.mxu0 %v3627_v1  ;;  %1281 = vmatpush1.bf16.msra.mxu1 %v3629_v45  ;;  %v3639_v1 = vcombine.low %v934_v54, %v938_v55  ;;  %v3641_v45 = vcombine.low %v935_v56, %v939_v57 }
 0x110   :  { %1241 = vmatprep.subr.bf16.mxu0 %v3636_v2  ;;  %736 = vmatprep.mubr.bf16.mxu0 %v6796_v0  ;;  %v3648_v2 = vcombine.high %v942_v62, %v942_v62 }
 0x111   :  { %809 = vmatprep.mubr.bf16.mxu1 %v6796_v0  ;;  %1282 = vmatprep.subr.bf16.mxu1 %v3638_v5  ;;  %v3647_v5 = vcombine.low %v942_v62, %v942_v62 }
 0x113   :  { %1242 = vmatpush1.bf16.msra.mxu0 %v3635_v7  ;;  %1283 = vmatpush1.bf16.msra.mxu1 %v3637_v8  ;;  %v1220_v7 = vsel %vm503_vm0, %v3647_v5, 0  ;;  %v1226_v8 = vsel %vm503_vm0, %v3649_v6, 0 }
 0x114   :  { %3651 = vmatprep.subr.msk.bf16.mxu0 %vm503_vm0, %v3644_v9  ;;  %3653 = vmatprep.subr.msk.bf16.mxu1 %vm503_vm0, %v3646_v10 }
 0x116   :  { %3588 = vmatmul.mubr.msk.bf16.gmra.mrb[28].mxu0 %vm490_vm3, %v4619_v23  ;;  %3593 = vmatmul.mubr.msk.bf16.gmra.mrb[28].mxu1 %vm490_vm3, %v4619_v23  ;;  %v3610_v23 = vcombine.high %v903_v25, %v907_v19 }
 0x117   :  { %1244 = vmatpush1.bf16.msra.mxu0 %v1208_v4  ;;  %1285 = vmatpush1.bf16.msra.mxu1 %v1214_v17 }
 0x118   :  { %1263 = vmatprep.mubr.bf16.mxu0 %v6796_v0  ;;  %1304 = vmatprep.mubr.bf16.mxu1 %v6796_v0 }
 0x119   :  { %1313 = vmatprep.subr.bf16.mxu0 %v3600_v18  ;;  %1354 = vmatprep.subr.bf16.mxu1 %v3602_v20 }
 0x11e   :  { %3652 = vmatmul.mubr.msk.bf16.vlgmr.msra.gmra.mrb[32].mxu0 %vm490_vm3, %v4661_v28  ;;  %3654 = vmatmul.mubr.msk.bf16.vlgmr.msra.gmra.mrb[32].mxu1 %vm490_vm3, %v4661_v28 }
 0x11f   :  { %1314 = vmatpush1.bf16.msra.mxu0 %v3599_v26  ;;  %1355 = vmatpush1.bf16.msra.mxu1 %v3601_v27 }
 0x120   :  { %1315 = vmatprep.subr.bf16.mxu0 %v3608_v29  ;;  %1356 = vmatprep.subr.bf16.mxu1 %v3610_v23 }
 0x121   :  { %1345 = vmatprep.mubr.bf16.mxu0 %v6796_v0  ;;  %1386 = vmatprep.mubr.bf16.mxu1 %v6796_v0 }
 0x123   :  { %1316 = vmatpush1.bf16.msra.mxu0 %v3607_v34  ;;  %1357 = vmatpush1.bf16.msra.mxu1 %v3609_v35 }
 0x124   :  { %1317 = vmatprep.subr.bf16.mxu0 %v3616_v53  ;;  %1358 = vmatprep.subr.bf16.mxu1 %v3618_v36 }
 0x127   :  { %1318 = vmatpush1.bf16.msra.mxu0 %v3615_v41  ;;  %1359 = vmatpush1.bf16.msra.mxu1 %v3617_v42 }
 0x128   :  { %1319 = vmatprep.subr.bf16.mxu0 %v3624_v43  ;;  %1360 = vmatprep.subr.bf16.mxu1 %v3626_v44 }
 0x12b   :  { %1320 = vmatpush1.bf16.msra.mxu0 %v3623_v49  ;;  %1361 = vmatpush1.bf16.msra.mxu1 %v3625_v50 }
 0x12c   :  { %1321 = vmatprep.subr.bf16.mxu0 %v3632_v51  ;;  %1362 = vmatprep.subr.bf16.mxu1 %v3634_v52 }
 0x12f   :  { %1322 = vmatpush1.bf16.msra.mxu0 %v3631_v58  ;;  %1363 = vmatpush1.bf16.msra.mxu1 %v3633_v59 }
 0x130   :  { %1323 = vmatprep.subr.bf16.mxu0 %v3640_v60  ;;  %1364 = vmatprep.subr.bf16.mxu1 %v3642_v61 }
 0x133   :  { %1324 = vmatpush1.bf16.msra.mxu0 %v3639_v1  ;;  %1365 = vmatpush1.bf16.msra.mxu1 %v3641_v45 }
 0x134   :  { %3655 = vmatprep.subr.msk.bf16.mxu0 %vm503_vm0, %v3648_v2  ;;  %3657 = vmatprep.subr.msk.bf16.mxu1 %vm503_vm0, %v3650_v3 }
 0x137   :  { %1326 = vmatpush1.bf16.msra.mxu0 %v1220_v7  ;;  %1367 = vmatpush1.bf16.msra.mxu1 %v1226_v8 }
 0x13a   :  { %3656 = vmatmul.mubr.msk.bf16.vlgmr.msra.gmra.mrb[36].mxu0 %vm490_vm3, %v4661_v28  ;;  %3658 = vmatmul.mubr.msk.bf16.vlgmr.msra.gmra.mrb[36].mxu1 %vm490_vm3, %v4661_v28 }
 0x1b1   :  { %v4677_v9 = vpop.f32.mrb[0].mxu0  ;;  %v4679_v10 = vpop.f32.mrb[0].mxu1 }
 0x1b2   :  { %7177 = vst [vmem:[#allocation21_spill] sm:$0xff] %v4677_v9  ;;  %7178 = vst [vmem:[#allocation22_spill] sm:$0xff] %v4679_v10  ;;  %v4681_v12 = vpop.f32.mrb[1].mxu0  ;;  %v4683_v13 = vpop.f32.mrb[1].mxu1 }
 0x1b3   :  { %7179 = vst [vmem:[#allocation23_spill] sm:$0xff] %v4681_v12  ;;  %7180 = vst [vmem:[#allocation24_spill] sm:$0xff] %v4683_v13  ;;  %v4685_v14 = vpop.f32.mrb[2].mxu0  ;;  %v4687_v15 = vpop.f32.mrb[2].mxu1 }
 0x1b4   :  { %7181 = vst [vmem:[#allocation25_spill] sm:$0xff] %v4685_v14  ;;  %7182 = vst [vmem:[#allocation26_spill] sm:$0xff] %v4687_v15  ;;  %v4689_v16 = vpop.f32.mrb[3].mxu0  ;;  %v4691_v11 = vpop.f32.mrb[3].mxu1 }
 0x1b5   :  { %7183 = vst [vmem:[#allocation27_spill] sm:$0xff] %v4689_v16  ;;  %7184 = vst [vmem:[#allocation28_spill] sm:$0xff] %v4691_v11 }
 0x1b9   :  { %v4693_v4 = vpop.f32.mrb[4].mxu0  ;;  %v4695_v17 = vpop.f32.mrb[4].mxu1 }
 0x1ba   :  { %7185 = vst [vmem:[#allocation29_spill] sm:$0xff] %v4693_v4  ;;  %7186 = vst [vmem:[#allocation30_spill] sm:$0xff] %v4695_v17  ;;  %v4697_v18 = vpop.f32.mrb[5].mxu0  ;;  %v4699_v20 = vpop.f32.mrb[5].mxu1 }
 0x1bb   :  { %7187 = vst [vmem:[#allocation31_spill] sm:$0xff] %v4697_v18  ;;  %7188 = vst [vmem:[#allocation32_spill] sm:$0xff] %v4699_v20  ;;  %v4701_v21 = vpop.f32.mrb[6].mxu0  ;;  %v4703_v24 = vpop.f32.mrb[6].mxu1 }
 0x1bc   :  { %7189 = vst [vmem:[#allocation33_spill] sm:$0xff] %v4701_v21  ;;  %7190 = vst [vmem:[#allocation34_spill] sm:$0xff] %v4703_v24  ;;  %v4705_v25 = vpop.f32.mrb[7].mxu0  ;;  %v4707_v19 = vpop.f32.mrb[7].mxu1 }
 0x1bd   :  { %7191 = vst [vmem:[#allocation35_spill] sm:$0xff] %v4705_v25  ;;  %7192 = vst [vmem:[#allocation36_spill] sm:$0xff] %v4707_v19 }
 0x1c1   :  { %v4709_v26 = vpop.f32.mrb[8].mxu0  ;;  %v4711_v27 = vpop.f32.mrb[8].mxu1 }
 0x1c2   :  { %7193 = vst [vmem:[#allocation37_spill] sm:$0xff] %v4709_v26  ;;  %7194 = vst [vmem:[#allocation38_spill] sm:$0xff] %v4711_v27  ;;  %v4713_v28 = vpop.f32.mrb[9].mxu0  ;;  %v4715_v29 = vpop.f32.mrb[9].mxu1 }
 0x1c3   :  { %7195 = vst [vmem:[#allocation39_spill] sm:$0xff] %v4713_v28  ;;  %7196 = vst [vmem:[#allocation40_spill] sm:$0xff] %v4715_v29  ;;  %v4717_v23 = vpop.f32.mrb[10].mxu0  ;;  %v4719_v30 = vpop.f32.mrb[10].mxu1 }
 0x1c4   :  { %7197 = vst [vmem:[#allocation41_spill] sm:$0xff] %v4717_v23  ;;  %7198 = vst [vmem:[#allocation42_spill] sm:$0xff] %v4719_v30  ;;  %v4721_v31 = vpop.f32.mrb[11].mxu0  ;;  %v4723_v32 = vpop.f32.mrb[11].mxu1 }
 0x1c5   :  { %7199 = vst [vmem:[#allocation43_spill] sm:$0xff] %v4721_v31  ;;  %7200 = vst [vmem:[#allocation44_spill] sm:$0xff] %v4723_v32 }
 0x1c9   :  { %v4725_v33 = vpop.f32.mrb[12].mxu0  ;;  %v4727_v34 = vpop.f32.mrb[12].mxu1 }
 0x1ca   :  { %7201 = vst [vmem:[#allocation45_spill] sm:$0xff] %v4725_v33  ;;  %7202 = vst [vmem:[#allocation46_spill] sm:$0xff] %v4727_v34  ;;  %v4729_v35 = vpop.f32.mrb[13].mxu0  ;;  %v4731_v53 = vpop.f32.mrb[13].mxu1 }
 0x1cb   :  { %7203 = vst [vmem:[#allocation47_spill] sm:$0xff] %v4729_v35  ;;  %7204 = vst [vmem:[#allocation48_spill] sm:$0xff] %v4731_v53  ;;  %v4733_v36 = vpop.f32.mrb[14].mxu0  ;;  %v4735_v39 = vpop.f32.mrb[14].mxu1 }
 0x1cc   :  { %7205 = vst [vmem:[#allocation49_spill] sm:$0xff] %v4733_v36  ;;  %7206 = vst [vmem:[#allocation50_spill] sm:$0xff] %v4735_v39  ;;  %v4737_v37 = vpop.f32.mrb[15].mxu0  ;;  %v4739_v38 = vpop.f32.mrb[15].mxu1 }
 0x1cd   :  { %7207 = vst [vmem:[#allocation51_spill] sm:$0xff] %v4737_v37  ;;  %7208 = vst [vmem:[#allocation52_spill] sm:$0xff] %v4739_v38 }
 0x1d1   :  { %v4741_v40 = vpop.f32.mrb[16].mxu0  ;;  %v4743_v41 = vpop.f32.mrb[16].mxu1 }
 0x1d2   :  { %7209 = vst [vmem:[#allocation53_spill] sm:$0xff] %v4741_v40  ;;  %7210 = vst [vmem:[#allocation54_spill] sm:$0xff] %v4743_v41  ;;  %v4745_v42 = vpop.f32.mrb[17].mxu0  ;;  %v4747_v43 = vpop.f32.mrb[17].mxu1 }
 0x1d3   :  { %7211 = vst [vmem:[#allocation55_spill] sm:$0xff] %v4745_v42  ;;  %7212 = vst [vmem:[#allocation56_spill] sm:$0xff] %v4747_v43  ;;  %v4749_v44 = vpop.f32.mrb[18].mxu0  ;;  %v4751_v46 = vpop.f32.mrb[18].mxu1 }
 0x1d4   :  { %7213 = vst [vmem:[#allocation57_spill] sm:$0xff] %v4749_v44  ;;  %7214 = vst [vmem:[#allocation58_spill] sm:$0xff] %v4751_v46  ;;  %v4753_v47 = vpop.f32.mrb[19].mxu0  ;;  %v4755_v48 = vpop.f32.mrb[19].mxu1 }
 0x1d5   :  { %7215 = vst [vmem:[#allocation59_spill] sm:$0xff] %v4753_v47  ;;  %7216 = vst [vmem:[#allocation60_spill] sm:$0xff] %v4755_v48 }
 0x1d9   :  { %v4757_v22 = vpop.f32.mrb[20].mxu0  ;;  %v4759_v49 = vpop.f32.mrb[20].mxu1 }
 0x1da   :  { %7217 = vst [vmem:[#allocation61_spill] sm:$0xff] %v4757_v22  ;;  %7218 = vst [vmem:[#allocation62_spill] sm:$0xff] %v4759_v49  ;;  %v4761_v50 = vpop.f32.mrb[21].mxu0  ;;  %v4763_v51 = vpop.f32.mrb[21].mxu1 }
 0x1db   :  { %7219 = vst [vmem:[#allocation63_spill] sm:$0xff] %v4761_v50  ;;  %7220 = vst [vmem:[#allocation64_spill] sm:$0xff] %v4763_v51  ;;  %v4765_v52 = vpop.f32.mrb[22].mxu0  ;;  %v4767_v54 = vpop.f32.mrb[22].mxu1 }
 0x1dc   :  { %7221 = vst [vmem:[#allocation65_spill] sm:$0xff] %v4765_v52  ;;  %7222 = vst [vmem:[#allocation66_spill] sm:$0xff] %v4767_v54  ;;  %v4769_v55 = vpop.f32.mrb[23].mxu0  ;;  %v4771_v56 = vpop.f32.mrb[23].mxu1 }
 0x1dd   :  { %7223 = vst [vmem:[#allocation67_spill] sm:$0xff] %v4769_v55  ;;  %7224 = vst [vmem:[#allocation68_spill] sm:$0xff] %v4771_v56 }
 0x1e1   :  { %v4773_v57 = vpop.f32.mrb[24].mxu0  ;;  %v4775_v58 = vpop.f32.mrb[24].mxu1 }
 0x1e2   :  { %7225 = vst [vmem:[#allocation69_spill] sm:$0xff] %v4773_v57  ;;  %7226 = vst [vmem:[#allocation70_spill] sm:$0xff] %v4775_v58  ;;  %v4777_v59 = vpop.f32.mrb[25].mxu0  ;;  %v4779_v60 = vpop.f32.mrb[25].mxu1 }
 0x1e3   :  { %7227 = vst [vmem:[#allocation71_spill] sm:$0xff] %v4777_v59  ;;  %7228 = vst [vmem:[#allocation72_spill] sm:$0xff] %v4779_v60  ;;  %v4781_v61 = vpop.f32.mrb[26].mxu0  ;;  %v4783_v62 = vpop.f32.mrb[26].mxu1 }
 0x1e4   :  { %7229 = vst [vmem:[#allocation73_spill] sm:$0xff] %v4781_v61  ;;  %7230 = vst [vmem:[#allocation74_spill] sm:$0xff] %v4783_v62  ;;  %v4785_v63 = vpop.f32.mrb[27].mxu0  ;;  %v4787_v1 = vpop.f32.mrb[27].mxu1 }
 0x1e5   :  { %7231 = vst [vmem:[#allocation75_spill] sm:$0xff] %v4785_v63  ;;  %7232 = vst [vmem:[#allocation76_spill] sm:$0xff] %v4787_v1 }
 0x1e9   :  { %v4789_v45 = vpop.f32.mrb[28].mxu0  ;;  %v4791_v2 = vpop.f32.mrb[28].mxu1 }
 0x1ea   :  { %7233 = vst [vmem:[#allocation77_spill] sm:$0xff] %v4789_v45  ;;  %7234 = vst [vmem:[#allocation78_spill] sm:$0xff] %v4791_v2  ;;  %v4793_v3 = vpop.f32.mrb[29].mxu0  ;;  %v4795_v5 = vpop.f32.mrb[29].mxu1 }
 0x1eb   :  { %7235 = vst [vmem:[#allocation79_spill] sm:$0xff] %v4793_v3  ;;  %7236 = vst [vmem:[#allocation80_spill] sm:$0xff] %v4795_v5  ;;  %v4797_v6 = vpop.f32.mrb[30].mxu0  ;;  %v4799_v7 = vpop.f32.mrb[30].mxu1 }
 0x1ec   :  { %7237 = vst [vmem:[#allocation81_spill] sm:$0xff] %v4797_v6  ;;  %7238 = vst [vmem:[#allocation82_spill] sm:$0xff] %v4799_v7  ;;  %v4801_v8 = vpop.f32.mrb[31].mxu0  ;;  %v4803_v0 = vpop.f32.mrb[31].mxu1 }
 0x1ed   :  { %7239 = vst [vmem:[#allocation83_spill] sm:$0xff] %v4801_v8  ;;  %7240 = vst [vmem:[#allocation84_spill] sm:$0xff] %v4803_v0 }
 0x1f1   :  { %v1265_v37 = vpop.f32.mrb[32].mxu0  ;;  %v1306_v36 = vpop.f32.mrb[32].mxu1 }
 0x1f2   :  { %v1267_v38 = vpop.f32.mrb[33].mxu0  ;;  %v1308_v39 = vpop.f32.mrb[33].mxu1  ;;  %v1403_v53 = vmul.f32 0.5, %v1306_v36  ;;  %v1395_v34 = vmul.f32 0.5, %v1265_v37 }
 0x1f3   :  { %v1269_v35 = vpop.f32.mrb[34].mxu0  ;;  %v1310_v45 = vpop.f32.mrb[34].mxu1  ;;  %v1404_v3 = vmul.f32 0.5, %v1308_v39  ;;  %v1396_v5 = vmul.f32 0.5, %v1267_v38 }
 0x1f4   :  { %v1270_v33 = vpop.f32.mrb[35].mxu0  ;;  %v1311_v2 = vpop.f32.mrb[35].mxu1  ;;  %3831 = vtanh.f32 %v1403_v53 }
 0x1f5   :  { %3833 = vtanh.f32 %v1404_v3 }
 0x1f6   :  { %3835 = vtanh.f32 %v1395_v34 }
 0x1f7   :  { %3837 = vtanh.f32 %v1396_v5 }
 0x1fe   :  { %v3832_v6 = vpop.eup %3831 }
 0x1ff   :  { %v3834_v63 = vpop.eup %3833  ;;  %v1407_v37 = vmul.f32 0.5, %v3832_v6 }
 0x200   :  { %v3836_v33 = vpop.eup %3835  ;;  %v1408_v53 = vmul.f32 0.5, %v3834_v63 }
 0x201   :  { %v3838_v39 = vpop.eup %3837  ;;  %v1399_v34 = vmul.f32 0.5, %v3836_v33  ;;  %v1409_v62 = vadd.f32 0.5, %v1407_v37 }
 0x202   :  { %v1400_v5 = vmul.f32 0.5, %v3838_v39  ;;  %v1410_v61 = vadd.f32 0.5, %v1408_v53 }
 0x204   :  { %v1402_v23 = vadd.f32 0.5, %v1400_v5  ;;  %v1422_v32 = vmul.f32 0.0, %v1410_v61 }
 0x20d   :  { %v1347_v7 = vpop.f32.mrb[36].mxu0  ;;  %v1388_v8 = vpop.f32.mrb[36].mxu1 }
 0x20e   :  { %3839 = vtanh.f32 %v1347_v7  ;;  %v1349_v0 = vpop.f32.mrb[37].mxu0  ;;  %v1390_v1 = vpop.f32.mrb[37].mxu1  ;;  %v1413_v38 = vmul.f32 0.5, %v1388_v8  ;;  %v1401_v7 = vadd.f32 0.5, %v1399_v34 }
 0x20f   :  { %3841 = vtanh.f32 %v1349_v0  ;;  %v1351_v35 = vpop.f32.mrb[38].mxu0  ;;  %v1392_v45 = vpop.f32.mrb[38].mxu1  ;;  %v1414_v3 = vmul.f32 0.5, %v1390_v1 }
 0x210   :  { %v1352_v2 = vpop.f32.mrb[39].mxu0  ;;  %v1393_v36 = vpop.f32.mrb[39].mxu1  ;;  %3843 = vtanh.f32 %v1413_v38  ;;  %v1421_v35 = vmul.f32 0.0, %v1409_v62 }
 0x211   :  { %3845 = vtanh.f32 %v1414_v3 }
 0x218   :  { %v3840_v31 = vpop.eup %3839 }
 0x219   :  { %v3842_v0 = vpop.eup %3841  ;;  %v1423_v45 = vmul.f32 %v3840_v31, %v1401_v7 }
 0x21a   :  { %v1424_v2 = vmul.f32 %v3842_v0, %v1402_v23  ;;  %v3844_v63 = vpop.eup %3843 }
 0x21b   :  { %v1425_v36 = vadd.f32 %v1423_v45, %v1421_v35  ;;  %v3846_v1 = vpop.eup %3845  ;;  %v1417_v6 = vmul.f32 0.5, %v3844_v63 }
 0x21c   :  { %v1426_v30 = vadd.f32 %v1424_v2, %v1422_v32  ;;  %v1418_v8 = vmul.f32 0.5, %v3846_v1 }
 0x21d   :  { %3847 = vtanh.f32 %v1425_v36  ;;  %v1419_v33 = vadd.f32 0.5, %v1417_v6 }
 0x21e   :  { %3849 = vtanh.f32 %v1426_v30  ;;  %v1420_v37 = vadd.f32 0.5, %v1418_v8 }
 0x227   :  { %v3848_v39 = vpop.eup %3847 }
 0x228   :  { %v3850_v38 = vpop.eup %3849  ;;  %v4805_v53 = vmul.f32 %v3848_v39, %v1419_v33 }
 0x229   :  { %v4807_v3 = vmul.f32 %v3850_v38, %v1420_v37 }
 0x22a   :  { %7241 = vst [vmem:[#allocation85_spill] sm:$0xff] %v4805_v53 }
 0x22b   :  { %7242 = vst [vmem:[#allocation86_spill] sm:$0xff] %v4807_v3 }
 0x22c   :  { %4383 = dma.done.wait [#allocation4], 16384 }
 0x22d   :  { %4384 = vsyncadd [#allocation4], 4294950912  ;;  %v7243_v31 = vmov 0   ;;  %v4811_v23 = vld [vmem:[#allocation3 + $0x8] sm:$0xff]  ;;  %v4813_v30 = vld [vmem:[#allocation3] sm:$0xff]  ;;  %s4404_s5 = smov [#allocation13]  }
 0x22e   :  { %1606 = vmatprep.mubr.bf16.mxu0 %v7243_v31  ;;  %1647 = vmatprep.mubr.bf16.mxu1 %v7243_v31  ;;  %v4815_v32 = vld [vmem:[#allocation3 + $0x48] sm:$0xff]  ;;  %v4818_v61 = vld [vmem:[#allocation3 + $0x18] sm:$0xff]  ;;  %v4820_v62 = vld [vmem:[#allocation3 + $0x10] sm:$0xff]  ;;  %s3484_s30 = sshll.u32 %s4404_s5, 4  ;;  %s3485_s30 = int_to_ptr.vmem [resolvable:$true] %s3484_s30 }
 0x22f   :  { %1574 = vmatprep.subr.bf16.mxu0 %v4811_v23  ;;  %1615 = vmatprep.subr.bf16.mxu1 %v4818_v61  ;;  %v4824_v34 = vld [vmem:[#allocation3 + $0x58] sm:$0xff]  ;;  %v4827_v5 = vld [vmem:[#allocation3 + $0x40] sm:$0xff]  ;;  %v4830_v7 = vld [vmem:[#allocation3 + $0x88] sm:$0xff]  ;;  %s4355_s8 = scalar_lea.vmem %s3485_s30, 128  ;;  %p4360_p5 = scmp.lt.s32.totalorder %s3485_s30, %s3485_s30 }
 0x230   :  { %1575 = vmatpush1.bf16.msra.mxu0 %v4813_v30  ;;  %1616 = vmatpush1.bf16.msra.mxu1 %v4820_v62  ;;  %v4833_v0 = vld [vmem:[#allocation3 + $0x50] sm:$0xff]  ;;  %v4835_v35 = vld [vmem:[#allocation3 + $0x98] sm:$0xff]  ;;  %v4839_v45 = vld [vmem:[#allocation3 + $0x80] sm:$0xff]  ;;  %p4356_p4 = scmp.ne.s32.totalorder %s3485_s30, %s4355_s8  ;;  %p4361_p6 = scmp.lt.s32.totalorder %s4355_s8, %s4355_s8 }
 0x231   :  { %1576 = vmatprep.subr.bf16.mxu0 %v4815_v32  ;;  %1617 = vmatprep.subr.bf16.mxu1 %v4824_v34  ;;  %v4842_v2 = vld [vmem:[#allocation3 + $0xc8] sm:$0xff]  ;;  %v4845_v36 = vld [vmem:[#allocation3 + $0x90] sm:$0xff]  ;;  %v4847_v63 = vld [vmem:[#allocation3 + $0xd8] sm:$0xff] }
 0x232   :  { %v4851_v1 = vld [vmem:[#allocation3 + $0xc0] sm:$0xff]  ;;  %v4854_v6 = vld [vmem:[#allocation3 + $0x108] sm:$0xff]  ;;  %v4857_v8 = vld [vmem:[#allocation3 + $0xd0] sm:$0xff]  ;;  %p4362_p7 = por %p4361_p6, %p4360_p5 }
 0x233   :  { %v4859_v33 = vld [vmem:[#allocation3 + $0x118] sm:$0xff]  ;;  %v4863_v39 = vld [vmem:[#allocation3 + $0x100] sm:$0xff]  ;;  %v4866_v37 = vld [vmem:[#allocation3 + $0x148] sm:$0xff] }
 0x234   :  { %1577 = vmatpush1.bf16.msra.mxu0 %v4827_v5  ;;  %1618 = vmatpush1.bf16.msra.mxu1 %v4833_v0  ;;  %v4869_v38 = vld [vmem:[#allocation3 + $0x110] sm:$0xff]  ;;  %v4871_v53 = vld [vmem:[#allocation3 + $0x158] sm:$0xff]  ;;  %v4875_v3 = vld [vmem:[#allocation3 + $0x140] sm:$0xff]  ;;  %p4363_p8 = pnand %p4362_p7, %p4356_p4 }
 0x235   :  { %1578 = vmatprep.subr.bf16.mxu0 %v4830_v7  ;;  %1619 = vmatprep.subr.bf16.mxu1 %v4835_v35  ;;  %v4878_v60 = vld [vmem:[#allocation3 + $0x188] sm:$0xff]  ;;  %v4881_v59 = vld [vmem:[#allocation3 + $0x150] sm:$0xff]  ;;  %v4883_v58 = vld [vmem:[#allocation3 + $0x198] sm:$0xff] }
 0x236   :  { %v4887_v57 = vld [vmem:[#allocation3 + $0x180] sm:$0xff]  ;;  %v4890_v28 = vld [vmem:[#allocation3 + $0x1c8] sm:$0xff]  ;;  %v4893_v26 = vld [vmem:[#allocation3 + $0x190] sm:$0xff] }
 0x237   :  { %v4895_v29 = vld [vmem:[#allocation3 + $0x1d8] sm:$0xff]  ;;  %v4899_v27 = vld [vmem:[#allocation3 + $0x1c0] sm:$0xff]  ;;  %v4902_v56 = vld [vmem:[#allocation3 + $0x208] sm:$0xff] }
 0x238   :  { %1579 = vmatpush1.bf16.msra.mxu0 %v4839_v45  ;;  %1620 = vmatpush1.bf16.msra.mxu1 %v4845_v36  ;;  %v4905_v55 = vld [vmem:[#allocation3 + $0x1d0] sm:$0xff]  ;;  %v4907_v54 = vld [vmem:[#allocation3 + $0x218] sm:$0xff]  ;;  %v4911_v52 = vld [vmem:[#allocation3 + $0x200] sm:$0xff] }
 0x239   :  { %1580 = vmatprep.subr.bf16.mxu0 %v4842_v2  ;;  %1621 = vmatprep.subr.bf16.mxu1 %v4847_v63  ;;  %7244 = vst [vmem:[#allocation87_spill] sm:$0xff] %v4907_v54  ;;  %7245 = vst [vmem:[#allocation88_spill] sm:$0xff] %v4911_v52  ;;  %v4914_v25 = vld [vmem:[#allocation3 + $0x248] sm:$0xff]  ;;  %v4917_v21 = vld [vmem:[#allocation3 + $0x210] sm:$0xff] }
 0x23a   :  { %7246 = vst [vmem:[#allocation89_spill] sm:$0xff] %v4914_v25  ;;  %7247 = vst [vmem:[#allocation90_spill] sm:$0xff] %v4917_v21  ;;  %v4919_v19 = vld [vmem:[#allocation3 + $0x258] sm:$0xff]  ;;  %v4923_v24 = vld [vmem:[#allocation3 + $0x240] sm:$0xff] }
 0x23b   :  { %7248 = vst [vmem:[#allocation91_spill] sm:$0xff] %v4919_v19  ;;  %7249 = vst [vmem:[#allocation92_spill] sm:$0xff] %v4923_v24  ;;  %v4926_v51 = vld [vmem:[#allocation3 + $0x288] sm:$0xff]  ;;  %v4929_v50 = vld [vmem:[#allocation3 + $0x250] sm:$0xff] }
 0x23c   :  { %1581 = vmatpush1.bf16.msra.mxu0 %v4851_v1  ;;  %1622 = vmatpush1.bf16.msra.mxu1 %v4857_v8  ;;  %7250 = vst [vmem:[#allocation93_spill] sm:$0xff] %v4926_v51  ;;  %7251 = vst [vmem:[#allocation94_spill] sm:$0xff] %v4929_v50  ;;  %v4931_v49 = vld [vmem:[#allocation3 + $0x298] sm:$0xff]  ;;  %v4935_v22 = vld [vmem:[#allocation3 + $0x280] sm:$0xff] }
 0x23d   :  { %1582 = vmatprep.subr.bf16.mxu0 %v4854_v6  ;;  %1623 = vmatprep.subr.bf16.mxu1 %v4859_v33  ;;  %7252 = vst [vmem:[#allocation95_spill] sm:$0xff] %v4931_v49  ;;  %7253 = vst [vmem:[#allocation96_spill] sm:$0xff] %v4935_v22  ;;  %v4938_v18 = vld [vmem:[#allocation3 + $0x2c8] sm:$0xff]  ;;  %v4941_v4 = vld [vmem:[#allocation3 + $0x290] sm:$0xff] }
 0x23e   :  { %7254 = vst [vmem:[#allocation97_spill] sm:$0xff] %v4938_v18  ;;  %7255 = vst [vmem:[#allocation98_spill] sm:$0xff] %v4941_v4  ;;  %v4943_v20 = vld [vmem:[#allocation3 + $0x2d8] sm:$0xff]  ;;  %v4947_v17 = vld [vmem:[#allocation3 + $0x2c0] sm:$0xff] }
 0x23f   :  { %7256 = vst [vmem:[#allocation99_spill] sm:$0xff] %v4943_v20  ;;  %7257 = vst [vmem:[#allocation100_spill] sm:$0xff] %v4947_v17  ;;  %v4950_v48 = vld [vmem:[#allocation3 + $0x308] sm:$0xff]  ;;  %v4953_v47 = vld [vmem:[#allocation3 + $0x2d0] sm:$0xff] }
 0x240   :  { %1583 = vmatpush1.bf16.msra.mxu0 %v4863_v39  ;;  %1624 = vmatpush1.bf16.msra.mxu1 %v4869_v38  ;;  %7258 = vst [vmem:[#allocation101_spill] sm:$0xff] %v4950_v48  ;;  %7259 = vst [vmem:[#allocation102_spill] sm:$0xff] %v4953_v47  ;;  %v4955_v46 = vld [vmem:[#allocation3 + $0x318] sm:$0xff]  ;;  %v4959_v44 = vld [vmem:[#allocation3 + $0x300] sm:$0xff] }
 0x241   :  { %1584 = vmatprep.subr.bf16.mxu0 %v4866_v37  ;;  %1625 = vmatprep.subr.bf16.mxu1 %v4871_v53  ;;  %7260 = vst [vmem:[#allocation103_spill] sm:$0xff] %v4955_v46  ;;  %7261 = vst [vmem:[#allocation104_spill] sm:$0xff] %v4959_v44  ;;  %v4962_v16 = vld [vmem:[#allocation3 + $0x348] sm:$0xff]  ;;  %v4965_v14 = vld [vmem:[#allocation3 + $0x310] sm:$0xff] }
 0x242   :  { %7262 = vst [vmem:[#allocation105_spill] sm:$0xff] %v4962_v16  ;;  %7263 = vst [vmem:[#allocation106_spill] sm:$0xff] %v4965_v14  ;;  %v4967_v11 = vld [vmem:[#allocation3 + $0x358] sm:$0xff]  ;;  %v4971_v15 = vld [vmem:[#allocation3 + $0x340] sm:$0xff] }
 0x243   :  { %7264 = vst [vmem:[#allocation107_spill] sm:$0xff] %v4967_v11  ;;  %7265 = vst [vmem:[#allocation108_spill] sm:$0xff] %v4971_v15  ;;  %v4974_v43 = vld [vmem:[#allocation3 + $0x388] sm:$0xff]  ;;  %v4977_v41 = vld [vmem:[#allocation3 + $0x350] sm:$0xff] }
 0x244   :  { %1585 = vmatpush1.bf16.msra.mxu0 %v4875_v3  ;;  %1626 = vmatpush1.bf16.msra.mxu1 %v4881_v59  ;;  %7266 = vst [vmem:[#allocation109_spill] sm:$0xff] %v4974_v43  ;;  %7267 = vst [vmem:[#allocation110_spill] sm:$0xff] %v4977_v41  ;;  %v4979_v42 = vld [vmem:[#allocation3 + $0x398] sm:$0xff]  ;;  %v4983_v40 = vld [vmem:[#allocation3 + $0x380] sm:$0xff] }
 0x245   :  { %1586 = vmatprep.subr.bf16.mxu0 %v4878_v60  ;;  %1627 = vmatprep.subr.bf16.mxu1 %v4883_v58  ;;  %7268 = vst [vmem:[#allocation111_spill] sm:$0xff] %v4979_v42  ;;  %7269 = vst [vmem:[#allocation112_spill] sm:$0xff] %v4983_v40  ;;  %v4986_v12 = vld [vmem:[#allocation3 + $0x3c8] sm:$0xff]  ;;  %v4989_v9 = vld [vmem:[#allocation3 + $0x390] sm:$0xff] }
 0x246   :  { %7270 = vst [vmem:[#allocation113_spill] sm:$0xff] %v4986_v12  ;;  %7271 = vst [vmem:[#allocation114_spill] sm:$0xff] %v4989_v9  ;;  %v4991_v13 = vld [vmem:[#allocation3 + $0x3d8] sm:$0xff]  ;;  %v4995_v10 = vld [vmem:[#allocation3 + $0x3c0] sm:$0xff] }
 0x247   :  { %7272 = vst [vmem:[#allocation115_spill] sm:$0xff] %v4991_v13  ;;  %7273 = vst [vmem:[#allocation116_spill] sm:$0xff] %v4995_v10 }
 0x248   :  { %1587 = vmatpush1.bf16.msra.mxu0 %v4887_v57  ;;  %1628 = vmatpush1.bf16.msra.mxu1 %v4893_v26 }
 0x249   :  { %1588 = vmatprep.subr.bf16.mxu0 %v4890_v28  ;;  %1629 = vmatprep.subr.bf16.mxu1 %v4895_v29 }
 0x24c   :  { %1589 = vmatpush1.bf16.msra.mxu0 %v4899_v27  ;;  %1630 = vmatpush1.bf16.msra.mxu1 %v4905_v55 }
 0x24d   :  { %1590 = vmatprep.subr.bf16.mxu0 %v4902_v56  ;;  %1631 = vmatprep.subr.bf16.mxu1 %v4907_v54 }
 0x250   :  { %1591 = vmatpush1.bf16.msra.mxu0 %v4911_v52  ;;  %1632 = vmatpush1.bf16.msra.mxu1 %v4917_v21 }
 0x251   :  { %1592 = vmatprep.subr.bf16.mxu0 %v4914_v25  ;;  %1633 = vmatprep.subr.bf16.mxu1 %v4919_v19 }
 0x254   :  { %1593 = vmatpush1.bf16.msra.mxu0 %v4923_v24  ;;  %1634 = vmatpush1.bf16.msra.mxu1 %v4929_v50 }
 0x255   :  { %1594 = vmatprep.subr.bf16.mxu0 %v4926_v51  ;;  %1635 = vmatprep.subr.bf16.mxu1 %v4931_v49 }
 0x258   :  { %1595 = vmatpush1.bf16.msra.mxu0 %v4935_v22  ;;  %1636 = vmatpush1.bf16.msra.mxu1 %v4941_v4 }
 0x259   :  { %1596 = vmatprep.subr.bf16.mxu0 %v4938_v18  ;;  %1637 = vmatprep.subr.bf16.mxu1 %v4943_v20 }
 0x25c   :  { %1597 = vmatpush1.bf16.msra.mxu0 %v4947_v17  ;;  %1638 = vmatpush1.bf16.msra.mxu1 %v4953_v47 }
 0x25d   :  { %1598 = vmatprep.subr.bf16.mxu0 %v4950_v48  ;;  %1639 = vmatprep.subr.bf16.mxu1 %v4955_v46 }
 0x260   :  { %1599 = vmatpush1.bf16.msra.mxu0 %v4959_v44  ;;  %1640 = vmatpush1.bf16.msra.mxu1 %v4965_v14 }
 0x261   :  { %1600 = vmatprep.subr.bf16.mxu0 %v4962_v16  ;;  %1641 = vmatprep.subr.bf16.mxu1 %v4967_v11 }
 0x264   :  { %1601 = vmatpush1.bf16.msra.mxu0 %v4971_v15  ;;  %1642 = vmatpush1.bf16.msra.mxu1 %v4977_v41  ;;  %v5001_v41 = vld [vmem:[#allocation3 + $0x3d0] sm:$0xff]  ;;  %v5003_v15 = vld [vmem:[#allocation3 + $0x38] sm:$0xff] }
 0x265   :  { %1602 = vmatprep.subr.bf16.mxu0 %v4974_v43  ;;  %1643 = vmatprep.subr.bf16.mxu1 %v4979_v42  ;;  %v4998_v43 = vld [vmem:[#allocation3 + $0x28] sm:$0xff]  ;;  %7275 = vst [vmem:[#allocation118_spill] sm:$0xff] %v5001_v41  ;;  %7276 = vst [vmem:[#allocation119_spill] sm:$0xff] %v5003_v15  ;;  %v5007_v42 = vld [vmem:[#allocation3 + $0x20] sm:$0xff] }
 0x266   :  { %7274 = vst [vmem:[#allocation117_spill] sm:$0xff] %v4998_v43  ;;  %7277 = vst [vmem:[#allocation120_spill] sm:$0xff] %v5007_v42 }
 0x268   :  { %1603 = vmatpush1.bf16.msra.mxu0 %v4983_v40  ;;  %1644 = vmatpush1.bf16.msra.mxu1 %v4989_v9  ;;  %v5013_v9 = vld [vmem:[#allocation3 + $0x30] sm:$0xff]  ;;  %v5047_v40 = vld [vmem:[#allocation3 + $0xe0] sm:$0xff] }
 0x269   :  { %1604 = vmatprep.subr.bf16.mxu0 %v4986_v12  ;;  %1645 = vmatprep.subr.bf16.mxu1 %v4991_v13  ;;  %v5010_v12 = vld [vmem:[#allocation3 + $0x68] sm:$0xff]  ;;  %7279 = vst [vmem:[#allocation122_spill] sm:$0xff] %v5013_v9  ;;  %v5016_v13 = vld [vmem:[#allocation3 + $0x78] sm:$0xff]  ;;  %7289 = vst [vmem:[#allocation132_spill] sm:$0xff] %v5047_v40 }
 0x26a   :  { %7278 = vst [vmem:[#allocation121_spill] sm:$0xff] %v5010_v12  ;;  %7280 = vst [vmem:[#allocation123_spill] sm:$0xff] %v5016_v13 }
 0x26c   :  { %1605 = vmatpush1.bf16.msra.mxu0 %v4995_v10  ;;  %1646 = vmatpush1.bf16.msra.mxu1 %v5001_v41  ;;  %v5024_v41 = vld [vmem:[#allocation3 + $0xa8] sm:$0xff]  ;;  %v5030_v10 = vld [vmem:[#allocation3 + $0xb8] sm:$0xff] }
 0x26d   :  { %1656 = vmatprep.subr.bf16.mxu0 %v4998_v43  ;;  %1697 = vmatprep.subr.bf16.mxu1 %v5003_v15  ;;  %v5021_v43 = vld [vmem:[#allocation3 + $0x60] sm:$0xff]  ;;  %7282 = vst [vmem:[#allocation125_spill] sm:$0xff] %v5024_v41  ;;  %v5027_v15 = vld [vmem:[#allocation3 + $0x70] sm:$0xff]  ;;  %7284 = vst [vmem:[#allocation127_spill] sm:$0xff] %v5030_v10 }
 0x26e   :  { %7281 = vst [vmem:[#allocation124_spill] sm:$0xff] %v5021_v43  ;;  %7283 = vst [vmem:[#allocation126_spill] sm:$0xff] %v5027_v15 }
 0x26f   :  { %1607 = vmatmul.mubr.bf16.vlgmr.msra.gmra.mrb[40].mxu0 %v7243_v31  ;;  %1648 = vmatmul.mubr.bf16.vlgmr.msra.gmra.mrb[40].mxu1 %v7243_v31 }
 0x270   :  { %1657 = vmatpush1.bf16.msra.mxu0 %v5007_v42  ;;  %1698 = vmatpush1.bf16.msra.mxu1 %v5013_v9  ;;  %v5038_v9 = vld [vmem:[#allocation3 + $0xe8] sm:$0xff]  ;;  %v5043_v42 = vld [vmem:[#allocation3 + $0xf8] sm:$0xff] }
 0x271   :  { %1658 = vmatprep.subr.bf16.mxu0 %v5010_v12  ;;  %1699 = vmatprep.subr.bf16.mxu1 %v5016_v13  ;;  %v5035_v12 = vld [vmem:[#allocation3 + $0xa0] sm:$0xff]  ;;  %7286 = vst [vmem:[#allocation129_spill] sm:$0xff] %v5038_v9  ;;  %v5041_v13 = vld [vmem:[#allocation3 + $0xb0] sm:$0xff]  ;;  %7288 = vst [vmem:[#allocation131_spill] sm:$0xff] %v5043_v42 }
 0x272   :  { %1688 = vmatprep.mubr.bf16.mxu0 %v7243_v31  ;;  %1729 = vmatprep.mubr.bf16.mxu1 %v7243_v31  ;;  %7285 = vst [vmem:[#allocation128_spill] sm:$0xff] %v5035_v12  ;;  %7287 = vst [vmem:[#allocation130_spill] sm:$0xff] %v5041_v13 }
 0x274   :  { %1659 = vmatpush1.bf16.msra.mxu0 %v5021_v43  ;;  %1700 = vmatpush1.bf16.msra.mxu1 %v5027_v15  ;;  %v5053_v15 = vld [vmem:[#allocation3 + $0xf0] sm:$0xff]  ;;  %v5055_v43 = vld [vmem:[#allocation3 + $0x138] sm:$0xff] }
 0x275   :  { %1660 = vmatprep.subr.bf16.mxu0 %v5024_v41  ;;  %1701 = vmatprep.subr.bf16.mxu1 %v5030_v10  ;;  %v5050_v41 = vld [vmem:[#allocation3 + $0x128] sm:$0xff]  ;;  %7291 = vst [vmem:[#allocation134_spill] sm:$0xff] %v5053_v15  ;;  %7292 = vst [vmem:[#allocation135_spill] sm:$0xff] %v5055_v43  ;;  %v5059_v10 = vld [vmem:[#allocation3 + $0x120] sm:$0xff] }
 0x276   :  { %7290 = vst [vmem:[#allocation133_spill] sm:$0xff] %v5050_v41  ;;  %7293 = vst [vmem:[#allocation136_spill] sm:$0xff] %v5059_v10 }
 0x278   :  { %1661 = vmatpush1.bf16.msra.mxu0 %v5035_v12  ;;  %1702 = vmatpush1.bf16.msra.mxu1 %v5041_v13  ;;  %v5065_v13 = vld [vmem:[#allocation3 + $0x130] sm:$0xff]  ;;  %v5067_v12 = vld [vmem:[#allocation3 + $0x178] sm:$0xff] }
 0x279   :  { %1662 = vmatprep.subr.bf16.mxu0 %v5038_v9  ;;  %1703 = vmatprep.subr.bf16.mxu1 %v5043_v42  ;;  %v5062_v9 = vld [vmem:[#allocation3 + $0x168] sm:$0xff]  ;;  %7295 = vst [vmem:[#allocation138_spill] sm:$0xff] %v5065_v13  ;;  %7296 = vst [vmem:[#allocation139_spill] sm:$0xff] %v5067_v12  ;;  %v5071_v42 = vld [vmem:[#allocation3 + $0x160] sm:$0xff] }
 0x27a   :  { %7294 = vst [vmem:[#allocation137_spill] sm:$0xff] %v5062_v9  ;;  %7297 = vst [vmem:[#allocation140_spill] sm:$0xff] %v5071_v42 }
 0x27c   :  { %1663 = vmatpush1.bf16.msra.mxu0 %v5047_v40  ;;  %1704 = vmatpush1.bf16.msra.mxu1 %v5053_v15  ;;  %v5077_v15 = vld [vmem:[#allocation3 + $0x170] sm:$0xff]  ;;  %v5079_v40 = vld [vmem:[#allocation3 + $0x1b8] sm:$0xff] }
 0x27d   :  { %1664 = vmatprep.subr.bf16.mxu0 %v5050_v41  ;;  %1705 = vmatprep.subr.bf16.mxu1 %v5055_v43  ;;  %v5074_v41 = vld [vmem:[#allocation3 + $0x1a8] sm:$0xff]  ;;  %7299 = vst [vmem:[#allocation142_spill] sm:$0xff] %v5077_v15  ;;  %7300 = vst [vmem:[#allocation143_spill] sm:$0xff] %v5079_v40  ;;  %v5083_v43 = vld [vmem:[#allocation3 + $0x1a0] sm:$0xff] }
 0x27e   :  { %7298 = vst [vmem:[#allocation141_spill] sm:$0xff] %v5074_v41  ;;  %7301 = vst [vmem:[#allocation144_spill] sm:$0xff] %v5083_v43 }
 0x280   :  { %1665 = vmatpush1.bf16.msra.mxu0 %v5059_v10  ;;  %1706 = vmatpush1.bf16.msra.mxu1 %v5065_v13  ;;  %v5089_v13 = vld [vmem:[#allocation3 + $0x1b0] sm:$0xff]  ;;  %v5091_v10 = vld [vmem:[#allocation3 + $0x1f8] sm:$0xff] }
 0x281   :  { %1666 = vmatprep.subr.bf16.mxu0 %v5062_v9  ;;  %1707 = vmatprep.subr.bf16.mxu1 %v5067_v12  ;;  %v5086_v9 = vld [vmem:[#allocation3 + $0x1e8] sm:$0xff]  ;;  %7303 = vst [vmem:[#allocation146_spill] sm:$0xff] %v5089_v13  ;;  %7304 = vst [vmem:[#allocation147_spill] sm:$0xff] %v5091_v10  ;;  %v5095_v12 = vld [vmem:[#allocation3 + $0x1e0] sm:$0xff] }
 0x282   :  { %7302 = vst [vmem:[#allocation145_spill] sm:$0xff] %v5086_v9  ;;  %7305 = vst [vmem:[#allocation148_spill] sm:$0xff] %v5095_v12 }
 0x284   :  { %1667 = vmatpush1.bf16.msra.mxu0 %v5071_v42  ;;  %1708 = vmatpush1.bf16.msra.mxu1 %v5077_v15  ;;  %v5101_v15 = vld [vmem:[#allocation3 + $0x1f0] sm:$0xff]  ;;  %v5103_v42 = vld [vmem:[#allocation3 + $0x238] sm:$0xff] }
 0x285   :  { %1668 = vmatprep.subr.bf16.mxu0 %v5074_v41  ;;  %1709 = vmatprep.subr.bf16.mxu1 %v5079_v40  ;;  %v5098_v41 = vld [vmem:[#allocation3 + $0x228] sm:$0xff]  ;;  %7307 = vst [vmem:[#allocation150_spill] sm:$0xff] %v5101_v15  ;;  %7308 = vst [vmem:[#allocation151_spill] sm:$0xff] %v5103_v42  ;;  %v5107_v40 = vld [vmem:[#allocation3 + $0x220] sm:$0xff] }
 0x286   :  { %7306 = vst [vmem:[#allocation149_spill] sm:$0xff] %v5098_v41  ;;  %7309 = vst [vmem:[#allocation152_spill] sm:$0xff] %v5107_v40 }
 0x288   :  { %1669 = vmatpush1.bf16.msra.mxu0 %v5083_v43  ;;  %1710 = vmatpush1.bf16.msra.mxu1 %v5089_v13  ;;  %v5113_v13 = vld [vmem:[#allocation3 + $0x230] sm:$0xff]  ;;  %v5115_v43 = vld [vmem:[#allocation3 + $0x278] sm:$0xff] }
 0x289   :  { %1670 = vmatprep.subr.bf16.mxu0 %v5086_v9  ;;  %1711 = vmatprep.subr.bf16.mxu1 %v5091_v10  ;;  %v5110_v9 = vld [vmem:[#allocation3 + $0x268] sm:$0xff]  ;;  %7311 = vst [vmem:[#allocation154_spill] sm:$0xff] %v5113_v13  ;;  %7312 = vst [vmem:[#allocation155_spill] sm:$0xff] %v5115_v43  ;;  %v5119_v10 = vld [vmem:[#allocation3 + $0x260] sm:$0xff] }
 0x28a   :  { %7310 = vst [vmem:[#allocation153_spill] sm:$0xff] %v5110_v9  ;;  %7313 = vst [vmem:[#allocation156_spill] sm:$0xff] %v5119_v10 }
 0x28c   :  { %1671 = vmatpush1.bf16.msra.mxu0 %v5095_v12  ;;  %1712 = vmatpush1.bf16.msra.mxu1 %v5101_v15  ;;  %v5125_v15 = vld [vmem:[#allocation3 + $0x270] sm:$0xff]  ;;  %v5127_v12 = vld [vmem:[#allocation3 + $0x2b8] sm:$0xff] }
 0x28d   :  { %1672 = vmatprep.subr.bf16.mxu0 %v5098_v41  ;;  %1713 = vmatprep.subr.bf16.mxu1 %v5103_v42  ;;  %v5122_v41 = vld [vmem:[#allocation3 + $0x2a8] sm:$0xff]  ;;  %7315 = vst [vmem:[#allocation158_spill] sm:$0xff] %v5125_v15  ;;  %7316 = vst [vmem:[#allocation159_spill] sm:$0xff] %v5127_v12  ;;  %v5131_v42 = vld [vmem:[#allocation3 + $0x2a0] sm:$0xff] }
 0x28e   :  { %7314 = vst [vmem:[#allocation157_spill] sm:$0xff] %v5122_v41  ;;  %7317 = vst [vmem:[#allocation160_spill] sm:$0xff] %v5131_v42 }
 0x290   :  { %1673 = vmatpush1.bf16.msra.mxu0 %v5107_v40  ;;  %1714 = vmatpush1.bf16.msra.mxu1 %v5113_v13  ;;  %v5137_v13 = vld [vmem:[#allocation3 + $0x2b0] sm:$0xff]  ;;  %v5139_v40 = vld [vmem:[#allocation3 + $0x2f8] sm:$0xff] }
 0x291   :  { %1674 = vmatprep.subr.bf16.mxu0 %v5110_v9  ;;  %1715 = vmatprep.subr.bf16.mxu1 %v5115_v43  ;;  %v5134_v9 = vld [vmem:[#allocation3 + $0x2e8] sm:$0xff]  ;;  %7319 = vst [vmem:[#allocation162_spill] sm:$0xff] %v5137_v13  ;;  %7320 = vst [vmem:[#allocation163_spill] sm:$0xff] %v5139_v40  ;;  %v5143_v43 = vld [vmem:[#allocation3 + $0x2e0] sm:$0xff] }
 0x292   :  { %7318 = vst [vmem:[#allocation161_spill] sm:$0xff] %v5134_v9  ;;  %7321 = vst [vmem:[#allocation164_spill] sm:$0xff] %v5143_v43 }
 0x294   :  { %1675 = vmatpush1.bf16.msra.mxu0 %v5119_v10  ;;  %1716 = vmatpush1.bf16.msra.mxu1 %v5125_v15  ;;  %v5149_v15 = vld [vmem:[#allocation3 + $0x2f0] sm:$0xff]  ;;  %v5151_v10 = vld [vmem:[#allocation3 + $0x338] sm:$0xff] }
 0x295   :  { %1676 = vmatprep.subr.bf16.mxu0 %v5122_v41  ;;  %1717 = vmatprep.subr.bf16.mxu1 %v5127_v12  ;;  %v5146_v41 = vld [vmem:[#allocation3 + $0x328] sm:$0xff]  ;;  %7323 = vst [vmem:[#allocation166_spill] sm:$0xff] %v5149_v15  ;;  %7324 = vst [vmem:[#allocation167_spill] sm:$0xff] %v5151_v10  ;;  %v5155_v12 = vld [vmem:[#allocation3 + $0x320] sm:$0xff] }
 0x296   :  { %7322 = vst [vmem:[#allocation165_spill] sm:$0xff] %v5146_v41  ;;  %7325 = vst [vmem:[#allocation168_spill] sm:$0xff] %v5155_v12 }
 0x298   :  { %1677 = vmatpush1.bf16.msra.mxu0 %v5131_v42  ;;  %1718 = vmatpush1.bf16.msra.mxu1 %v5137_v13  ;;  %v5161_v13 = vld [vmem:[#allocation3 + $0x330] sm:$0xff]  ;;  %v5163_v42 = vld [vmem:[#allocation3 + $0x378] sm:$0xff] }
 0x299   :  { %1678 = vmatprep.subr.bf16.mxu0 %v5134_v9  ;;  %1719 = vmatprep.subr.bf16.mxu1 %v5139_v40  ;;  %v5158_v9 = vld [vmem:[#allocation3 + $0x368] sm:$0xff]  ;;  %7327 = vst [vmem:[#allocation170_spill] sm:$0xff] %v5161_v13  ;;  %7328 = vst [vmem:[#allocation171_spill] sm:$0xff] %v5163_v42  ;;  %v5167_v40 = vld [vmem:[#allocation3 + $0x360] sm:$0xff] }
 0x29a   :  { %7326 = vst [vmem:[#allocation169_spill] sm:$0xff] %v5158_v9 }
 0x29c   :  { %1679 = vmatpush1.bf16.msra.mxu0 %v5143_v43  ;;  %1720 = vmatpush1.bf16.msra.mxu1 %v5149_v15  ;;  %v5173_v15 = vld [vmem:[#allocation3 + $0x370] sm:$0xff]  ;;  %v5175_v43 = vld [vmem:[#allocation3 + $0x3b8] sm:$0xff] }
 0x29d   :  { %1680 = vmatprep.subr.bf16.mxu0 %v5146_v41  ;;  %1721 = vmatprep.subr.bf16.mxu1 %v5151_v10  ;;  %v5170_v41 = vld [vmem:[#allocation3 + $0x3a8] sm:$0xff]  ;;  %v5179_v10 = vld [vmem:[#allocation3 + $0x3a0] sm:$0xff] }
 0x29e   :  { %7329 = vst [vmem:[#allocation172_spill] sm:$0xff] %v5170_v41 }
 0x2a0   :  { %1681 = vmatpush1.bf16.msra.mxu0 %v5155_v12  ;;  %1722 = vmatpush1.bf16.msra.mxu1 %v5161_v13  ;;  %v5185_v13 = vld [vmem:[#allocation3 + $0x3b0] sm:$0xff]  ;;  %v5187_v12 = vld [vmem:[#allocation3 + $0x3f8] sm:$0xff] }
 0x2a1   :  { %1682 = vmatprep.subr.bf16.mxu0 %v5158_v9  ;;  %1723 = vmatprep.subr.bf16.mxu1 %v5163_v42  ;;  %v5182_v9 = vld [vmem:[#allocation3 + $0x3e8] sm:$0xff]  ;;  %v5191_v42 = vld [vmem:[#allocation3 + $0x3e0] sm:$0xff] }
 0x2a4   :  { %1683 = vmatpush1.bf16.msra.mxu0 %v5167_v40  ;;  %1724 = vmatpush1.bf16.msra.mxu1 %v5173_v15 }
 0x2a5   :  { %1684 = vmatprep.subr.bf16.mxu0 %v5170_v41  ;;  %1725 = vmatprep.subr.bf16.mxu1 %v5175_v43  ;;  %v5195_v41 = vld [vmem:[#allocation3 + $0x3f0] sm:$0xff] }
 0x2a8   :  { %1685 = vmatpush1.bf16.msra.mxu0 %v5179_v10  ;;  %1726 = vmatpush1.bf16.msra.mxu1 %v5185_v13 }
 0x2a9   :  { %1686 = vmatprep.subr.bf16.mxu0 %v5182_v9  ;;  %1727 = vmatprep.subr.bf16.mxu1 %v5187_v12 }
 0x2ac   :  { %1687 = vmatpush1.bf16.msra.mxu0 %v5191_v42  ;;  %1728 = vmatpush1.bf16.msra.mxu1 %v5195_v41 }
 0x2ad   :  { %1787 = vmatprep.subr.bf16.mxu0 %v4811_v23  ;;  %1828 = vmatprep.subr.bf16.mxu1 %v4818_v61 }
 0x2af   :  { %1689 = vmatmul.mubr.bf16.vlgmr.msra.gmra.mrb[44].mxu0 %v7243_v31  ;;  %1730 = vmatmul.mubr.bf16.vlgmr.msra.gmra.mrb[44].mxu1 %v7243_v31  ;;  %v7330_v31 = vld [vmem:[#allocation108_spill] sm:$0xff] }
 0x2b0   :  { %1788 = vmatpush1.bf16.msra.mxu0 %v4813_v30  ;;  %1829 = vmatpush1.bf16.msra.mxu1 %v4820_v62 }
 0x2b1   :  { %1789 = vmatprep.subr.bf16.mxu0 %v4815_v32  ;;  %1830 = vmatprep.subr.bf16.mxu1 %v4824_v34 }
 0x2b4   :  { %1790 = vmatpush1.bf16.msra.mxu0 %v4827_v5  ;;  %1831 = vmatpush1.bf16.msra.mxu1 %v4833_v0 }
 0x2b5   :  { %1791 = vmatprep.subr.bf16.mxu0 %v4830_v7  ;;  %1832 = vmatprep.subr.bf16.mxu1 %v4835_v35 }
 0x2b8   :  { %1792 = vmatpush1.bf16.msra.mxu0 %v4839_v45  ;;  %1833 = vmatpush1.bf16.msra.mxu1 %v4845_v36 }
 0x2b9   :  { %1793 = vmatprep.subr.bf16.mxu0 %v4842_v2  ;;  %1834 = vmatprep.subr.bf16.mxu1 %v4847_v63 }
 0x2bc   :  { %1794 = vmatpush1.bf16.msra.mxu0 %v4851_v1  ;;  %1835 = vmatpush1.bf16.msra.mxu1 %v4857_v8 }
 0x2bd   :  { %1795 = vmatprep.subr.bf16.mxu0 %v4854_v6  ;;  %1836 = vmatprep.subr.bf16.mxu1 %v4859_v33 }
 0x2c0   :  { %1796 = vmatpush1.bf16.msra.mxu0 %v4863_v39  ;;  %1837 = vmatpush1.bf16.msra.mxu1 %v4869_v38 }
 0x2c1   :  { %1797 = vmatprep.subr.bf16.mxu0 %v4866_v37  ;;  %1838 = vmatprep.subr.bf16.mxu1 %v4871_v53 }
 0x2c4   :  { %1798 = vmatpush1.bf16.msra.mxu0 %v4875_v3  ;;  %1839 = vmatpush1.bf16.msra.mxu1 %v4881_v59 }
 0x2c5   :  { %1799 = vmatprep.subr.bf16.mxu0 %v4878_v60  ;;  %1840 = vmatprep.subr.bf16.mxu1 %v4883_v58 }
 0x2c8   :  { %1800 = vmatpush1.bf16.msra.mxu0 %v4887_v57  ;;  %1841 = vmatpush1.bf16.msra.mxu1 %v4893_v26 }
 0x2c9   :  { %1801 = vmatprep.subr.bf16.mxu0 %v4890_v28  ;;  %1842 = vmatprep.subr.bf16.mxu1 %v4895_v29 }
 0x2cc   :  { %1802 = vmatpush1.bf16.msra.mxu0 %v4899_v27  ;;  %1843 = vmatpush1.bf16.msra.mxu1 %v4905_v55 }
 0x2cd   :  { %1803 = vmatprep.subr.bf16.mxu0 %v4902_v56  ;;  %1844 = vmatprep.subr.bf16.mxu1 %v4907_v54 }
 0x2d0   :  { %1804 = vmatpush1.bf16.msra.mxu0 %v4911_v52  ;;  %1845 = vmatpush1.bf16.msra.mxu1 %v4917_v21 }
 0x2d1   :  { %1805 = vmatprep.subr.bf16.mxu0 %v4914_v25  ;;  %1846 = vmatprep.subr.bf16.mxu1 %v4919_v19  ;;  %v7345_v19 = vld [vmem:[#allocation23_spill] sm:$0xff] }
 0x2d4   :  { %1806 = vmatpush1.bf16.msra.mxu0 %v4923_v24  ;;  %1847 = vmatpush1.bf16.msra.mxu1 %v4929_v50  ;;  %v7343_v50 = vld [vmem:[#allocation24_spill] sm:$0xff]  ;;  %v7344_v24 = vld [vmem:[#allocation21_spill] sm:$0xff] }
 0x2d5   :  { %1807 = vmatprep.subr.bf16.mxu0 %v4926_v51  ;;  %1848 = vmatprep.subr.bf16.mxu1 %v4931_v49  ;;  %v7342_v51 = vld [vmem:[#allocation22_spill] sm:$0xff] }
 0x2d8   :  { %1808 = vmatpush1.bf16.msra.mxu0 %v4935_v22  ;;  %1849 = vmatpush1.bf16.msra.mxu1 %v4941_v4 }
 0x2d9   :  { %1809 = vmatprep.subr.bf16.mxu0 %v4938_v18  ;;  %1850 = vmatprep.subr.bf16.mxu1 %v4943_v20  ;;  %v7331_v18 = vld [vmem:[#allocation110_spill] sm:$0xff]  ;;  %v7332_v20 = vld [vmem:[#allocation109_spill] sm:$0xff] }
 0x2dc   :  { %1810 = vmatpush1.bf16.msra.mxu0 %v4947_v17  ;;  %1851 = vmatpush1.bf16.msra.mxu1 %v4953_v47  ;;  %v7333_v17 = vld [vmem:[#allocation111_spill] sm:$0xff]  ;;  %v7334_v47 = vld [vmem:[#allocation112_spill] sm:$0xff] }
 0x2dd   :  { %1811 = vmatprep.subr.bf16.mxu0 %v4950_v48  ;;  %1852 = vmatprep.subr.bf16.mxu1 %v4955_v46  ;;  %v7335_v48 = vld [vmem:[#allocation114_spill] sm:$0xff]  ;;  %v7336_v46 = vld [vmem:[#allocation113_spill] sm:$0xff] }
 0x2e0   :  { %1812 = vmatpush1.bf16.msra.mxu0 %v4959_v44  ;;  %1853 = vmatpush1.bf16.msra.mxu1 %v4965_v14  ;;  %v7337_v44 = vld [vmem:[#allocation115_spill] sm:$0xff]  ;;  %v7338_v14 = vld [vmem:[#allocation116_spill] sm:$0xff] }
 0x2e1   :  { %1813 = vmatprep.subr.bf16.mxu0 %v4962_v16  ;;  %1854 = vmatprep.subr.bf16.mxu1 %v4967_v11  ;;  %v7339_v16 = vld [vmem:[#allocation118_spill] sm:$0xff]  ;;  %v7340_v11 = vld [vmem:[#allocation117_spill] sm:$0xff] }
 0x2e4   :  { %1814 = vmatpush1.bf16.msra.mxu0 %v7330_v31  ;;  %1855 = vmatpush1.bf16.msra.mxu1 %v7331_v18  ;;  %v7341_v31 = vld [vmem:[#allocation119_spill] sm:$0xff] }
 0x2e5   :  { %1815 = vmatprep.subr.bf16.mxu0 %v7332_v20  ;;  %1856 = vmatprep.subr.bf16.mxu1 %v7333_v17 }
 0x2e8   :  { %1816 = vmatpush1.bf16.msra.mxu0 %v7334_v47  ;;  %1857 = vmatpush1.bf16.msra.mxu1 %v7335_v48 }
 0x2e9   :  { %1817 = vmatprep.subr.bf16.mxu0 %v7336_v46  ;;  %1858 = vmatprep.subr.bf16.mxu1 %v7337_v44 }
 0x2ec   :  { %1818 = vmatpush1.bf16.msra.mxu0 %v7338_v14  ;;  %1859 = vmatpush1.bf16.msra.mxu1 %v7339_v16 }
 0x2ed   :  { %1869 = vmatprep.subr.bf16.mxu0 %v7340_v11  ;;  %1910 = vmatprep.subr.bf16.mxu1 %v7341_v31 }
 0x342   :  { %v1608_v18 = vpop.f32.mrb[40].mxu0  ;;  %v1649_v4 = vpop.f32.mrb[40].mxu1 }
 0x343   :  { %v1610_v20 = vpop.f32.mrb[41].mxu0  ;;  %v1651_v22 = vpop.f32.mrb[41].mxu1  ;;  %v1650_v46 = vadd.f32 %v1649_v4, %v7342_v51  ;;  %v1609_v14 = vadd.f32 %v1608_v18, %v7344_v24  ;;  %v7347_v4 = vld [vmem:[#allocation55_spill] sm:$0xff] }
 0x344   :  { %v1612_v17 = vpop.f32.mrb[42].mxu0  ;;  %v1653_v49 = vpop.f32.mrb[42].mxu1  ;;  %v1652_v44 = vadd.f32 %v1651_v22, %v7343_v50  ;;  %v1611_v16 = vadd.f32 %v1610_v20, %v7345_v19  ;;  %v7348_v50 = vld [vmem:[#allocation54_spill] sm:$0xff] }
 0x345   :  { %v1613_v47 = vpop.f32.mrb[43].mxu0  ;;  %v1654_v48 = vpop.f32.mrb[43].mxu1  ;;  %v1746_v25 = vmul.f32 0.5, %v1650_v46  ;;  %v1738_v21 = vmul.f32 0.5, %v1609_v14  ;;  %v7349_v14 = vld [vmem:[#allocation56_spill] sm:$0xff] }
 0x346   :  { %v1747_v11 = vmul.f32 0.5, %v1652_v44  ;;  %v1739_v31 = vmul.f32 0.5, %v1611_v16  ;;  %v7346_v47 = vld [vmem:[#allocation53_spill] sm:$0xff] }
 0x347   :  { %3851 = vtanh.f32 %v1746_v25 }
 0x348   :  { %3853 = vtanh.f32 %v1747_v11 }
 0x349   :  { %3855 = vtanh.f32 %v1738_v21 }
 0x34a   :  { %3857 = vtanh.f32 %v1739_v31 }
 0x351   :  { %v3852_v20 = vpop.eup %3851 }
 0x352   :  { %v3854_v11 = vpop.eup %3853 }
 0x353   :  { %v3856_v46 = vpop.eup %3855  ;;  %v1751_v54 = vmul.f32 0.5, %v3854_v11 }
 0x382   :  { %v1690_v17 = vpop.f32.mrb[44].mxu0  ;;  %v1731_v52 = vpop.f32.mrb[44].mxu1 }
 0x383   :  { %v1691_v49 = vadd.f32 %v1690_v17, %v7346_v47  ;;  %v1692_v48 = vpop.f32.mrb[45].mxu0  ;;  %v1732_v18 = vadd.f32 %v1731_v52, %v7348_v50  ;;  %v1733_v24 = vpop.f32.mrb[45].mxu1  ;;  %v1750_v47 = vmul.f32 0.5, %v3852_v20 }
 0x384   :  { %v1693_v51 = vadd.f32 %v1692_v48, %v7347_v4  ;;  %v1694_v22 = vpop.f32.mrb[46].mxu0  ;;  %v1734_v16 = vadd.f32 %v1733_v24, %v7349_v14  ;;  %v1735_v25 = vpop.f32.mrb[46].mxu1  ;;  %v1742_v48 = vmul.f32 0.5, %v3856_v46 }
 0x385   :  { %3859 = vtanh.f32 %v1691_v49  ;;  %v1695_v19 = vpop.f32.mrb[47].mxu0  ;;  %v1756_v21 = vmul.f32 0.5, %v1732_v18  ;;  %v1736_v44 = vpop.f32.mrb[47].mxu1  ;;  %v1752_v52 = vadd.f32 0.5, %v1750_v47  ;;  %v1753_v22 = vadd.f32 0.5, %v1751_v54 }
 0x386   :  { %3861 = vtanh.f32 %v1693_v51  ;;  %v1757_v31 = vmul.f32 0.5, %v1734_v16  ;;  %v3858_v17 = vpop.eup %3857  ;;  %v1744_v49 = vadd.f32 0.5, %v1742_v48 }
 0x387   :  { %3863 = vtanh.f32 %v1756_v21  ;;  %v1743_v4 = vmul.f32 0.5, %v3858_v17  ;;  %v1764_v14 = vmul.f32 0.0, %v1752_v52  ;;  %v1765_v51 = vmul.f32 0.0, %v1753_v22 }
 0x388   :  { %3865 = vtanh.f32 %v1757_v31 }
 0x389   :  { %v1745_v19 = vadd.f32 0.5, %v1743_v4 }
 0x38f   :  { %v3860_v50 = vpop.eup %3859 }
 0x390   :  { %v3862_v24 = vpop.eup %3861  ;;  %v1766_v25 = vmul.f32 %v3860_v50, %v1744_v49  ;;  %v7350_v49 = vld [vmem:[#allocation120_spill] sm:$0xff]  ;;  %v7351_v50 = vld [vmem:[#allocation122_spill] sm:$0xff] }
 0x391   :  { %v1767_v18 = vmul.f32 %v3862_v24, %v1745_v19  ;;  %v3864_v20 = vpop.eup %3863  ;;  %v7352_v19 = vld [vmem:[#allocation121_spill] sm:$0xff]  ;;  %v7353_v24 = vld [vmem:[#allocation123_spill] sm:$0xff] }
 0x392   :  { %v5275_v44 = vadd.f32 %v1766_v25, %v1764_v14  ;;  %v3866_v11 = vpop.eup %3865  ;;  %v1760_v21 = vmul.f32 0.5, %v3864_v20  ;;  %v7354_v14 = vld [vmem:[#allocation124_spill] sm:$0xff]  ;;  %v7355_v25 = vld [vmem:[#allocation126_spill] sm:$0xff] }
 0x393   :  { %v5277_v16 = vadd.f32 %v1767_v18, %v1765_v51  ;;  %v1761_v54 = vmul.f32 0.5, %v3866_v11  ;;  %v7356_v51 = vld [vmem:[#allocation125_spill] sm:$0xff]  ;;  %v7357_v18 = vld [vmem:[#allocation127_spill] sm:$0xff]  ;;  %v7358_v20 = vld [vmem:[#allocation128_spill] sm:$0xff] }
 0x394   :  { %3867 = vtanh.f32 %v5275_v44  ;;  %v1762_v46 = vadd.f32 0.5, %v1760_v21  ;;  %v7359_v11 = vld [vmem:[#allocation130_spill] sm:$0xff]  ;;  %v7360_v21 = vld [vmem:[#allocation129_spill] sm:$0xff] }
 0x395   :  { %3869 = vtanh.f32 %v5277_v16  ;;  %v1763_v31 = vadd.f32 0.5, %v1761_v54  ;;  %v7361_v54 = vld [vmem:[#allocation131_spill] sm:$0xff] }
 0x39e   :  { %v3868_v17 = vpop.eup %3867 }
 0x39f   :  { %v3870_v47 = vpop.eup %3869  ;;  %v1772_v48 = vmul.f32 %v3868_v17, %v1762_v46  ;;  %v7362_v46 = vld [vmem:[#allocation132_spill] sm:$0xff]  ;;  %v7364_v17 = vld [vmem:[#allocation133_spill] sm:$0xff] }
 0x3a0   :  { %v1773_v4 = vmul.f32 %v3870_v47, %v1763_v31  ;;  %v7363_v31 = vld [vmem:[#allocation134_spill] sm:$0xff]  ;;  %v7365_v47 = vld [vmem:[#allocation135_spill] sm:$0xff] }
 0x3a1   :  { %v5281_v22 = vpack.c.bf16 %v1772_v48, %v1772_v48  ;;  %v7366_v48 = vld [vmem:[#allocation136_spill] sm:$0xff] }
 0x3a2   :  { %v1775_v52 = vpack.c.bf16 %v1773_v4, %v1773_v4  ;;  %v7367_v4 = vld [vmem:[#allocation138_spill] sm:$0xff] }
 0x3a4   :  { %1819 = vmatprep.mubr.bf16.mxu0 %v1775_v52  ;;  %1860 = vmatprep.mubr.bf16.mxu1 %v1775_v52 }
 0x3a5   :  { %1820 = vmatmul.mubr.bf16.vlgmr.msra.gmra.mrb[48].mxu0 %v5281_v22  ;;  %1861 = vmatmul.mubr.bf16.vlgmr.msra.gmra.mrb[48].mxu1 %v5281_v22 }
 0x3a6   :  { %1870 = vmatpush1.bf16.msra.mxu0 %v7350_v49  ;;  %1911 = vmatpush1.bf16.msra.mxu1 %v7351_v50 }
 0x3a7   :  { %1901 = vmatprep.mubr.bf16.mxu0 %v1775_v52  ;;  %1942 = vmatprep.mubr.bf16.mxu1 %v1775_v52  ;;  %v7368_v52 = vld [vmem:[#allocation137_spill] sm:$0xff] }
 0x3a8   :  { %1871 = vmatprep.subr.bf16.mxu0 %v7352_v19  ;;  %1912 = vmatprep.subr.bf16.mxu1 %v7353_v24 }
 0x3aa   :  { %1872 = vmatpush1.bf16.msra.mxu0 %v7354_v14  ;;  %1913 = vmatpush1.bf16.msra.mxu1 %v7355_v25 }
 0x3ab   :  { %1873 = vmatprep.subr.bf16.mxu0 %v7356_v51  ;;  %1914 = vmatprep.subr.bf16.mxu1 %v7357_v18 }
 0x3ae   :  { %1874 = vmatpush1.bf16.msra.mxu0 %v7358_v20  ;;  %1915 = vmatpush1.bf16.msra.mxu1 %v7359_v11  ;;  %v7369_v20 = vld [vmem:[#allocation139_spill] sm:$0xff]  ;;  %v7370_v11 = vld [vmem:[#allocation140_spill] sm:$0xff] }
 0x3af   :  { %1875 = vmatprep.subr.bf16.mxu0 %v7360_v21  ;;  %1916 = vmatprep.subr.bf16.mxu1 %v7361_v54  ;;  %v7371_v21 = vld [vmem:[#allocation142_spill] sm:$0xff]  ;;  %v7372_v54 = vld [vmem:[#allocation141_spill] sm:$0xff] }
 0x3b2   :  { %1876 = vmatpush1.bf16.msra.mxu0 %v7362_v46  ;;  %1917 = vmatpush1.bf16.msra.mxu1 %v7363_v31  ;;  %v7373_v46 = vld [vmem:[#allocation143_spill] sm:$0xff]  ;;  %v7374_v31 = vld [vmem:[#allocation144_spill] sm:$0xff] }
 0x3b3   :  { %1877 = vmatprep.subr.bf16.mxu0 %v7364_v17  ;;  %1918 = vmatprep.subr.bf16.mxu1 %v7365_v47  ;;  %v7375_v17 = vld [vmem:[#allocation146_spill] sm:$0xff]  ;;  %v7376_v47 = vld [vmem:[#allocation145_spill] sm:$0xff] }
 0x3b6   :  { %1878 = vmatpush1.bf16.msra.mxu0 %v7366_v48  ;;  %1919 = vmatpush1.bf16.msra.mxu1 %v7367_v4  ;;  %v7377_v48 = vld [vmem:[#allocation147_spill] sm:$0xff]  ;;  %v7378_v4 = vld [vmem:[#allocation148_spill] sm:$0xff] }
 0x3b7   :  { %1879 = vmatprep.subr.bf16.mxu0 %v7368_v52  ;;  %1920 = vmatprep.subr.bf16.mxu1 %v7369_v20  ;;  %v7379_v52 = vld [vmem:[#allocation150_spill] sm:$0xff]  ;;  %v7380_v20 = vld [vmem:[#allocation149_spill] sm:$0xff] }
 0x3ba   :  { %1880 = vmatpush1.bf16.msra.mxu0 %v7370_v11  ;;  %1921 = vmatpush1.bf16.msra.mxu1 %v7371_v21  ;;  %v7381_v11 = vld [vmem:[#allocation151_spill] sm:$0xff]  ;;  %v7382_v21 = vld [vmem:[#allocation152_spill] sm:$0xff] }
 0x3bb   :  { %1881 = vmatprep.subr.bf16.mxu0 %v7372_v54  ;;  %1922 = vmatprep.subr.bf16.mxu1 %v7373_v46  ;;  %v7383_v54 = vld [vmem:[#allocation154_spill] sm:$0xff]  ;;  %v7384_v46 = vld [vmem:[#allocation153_spill] sm:$0xff] }
 0x3be   :  { %1882 = vmatpush1.bf16.msra.mxu0 %v7374_v31  ;;  %1923 = vmatpush1.bf16.msra.mxu1 %v7375_v17  ;;  %v7385_v31 = vld [vmem:[#allocation155_spill] sm:$0xff]  ;;  %v7386_v17 = vld [vmem:[#allocation156_spill] sm:$0xff] }
 0x3bf   :  { %1883 = vmatprep.subr.bf16.mxu0 %v7376_v47  ;;  %1924 = vmatprep.subr.bf16.mxu1 %v7377_v48  ;;  %v7387_v47 = vld [vmem:[#allocation158_spill] sm:$0xff]  ;;  %v7388_v48 = vld [vmem:[#allocation157_spill] sm:$0xff] }
 0x3c2   :  { %1884 = vmatpush1.bf16.msra.mxu0 %v7378_v4  ;;  %1925 = vmatpush1.bf16.msra.mxu1 %v7379_v52  ;;  %v7389_v4 = vld [vmem:[#allocation159_spill] sm:$0xff]  ;;  %v7390_v52 = vld [vmem:[#allocation160_spill] sm:$0xff] }
 0x3c3   :  { %1885 = vmatprep.subr.bf16.mxu0 %v7380_v20  ;;  %1926 = vmatprep.subr.bf16.mxu1 %v7381_v11  ;;  %v7391_v20 = vld [vmem:[#allocation162_spill] sm:$0xff]  ;;  %v7392_v11 = vld [vmem:[#allocation161_spill] sm:$0xff] }
 0x3c6   :  { %1886 = vmatpush1.bf16.msra.mxu0 %v7382_v21  ;;  %1927 = vmatpush1.bf16.msra.mxu1 %v7383_v54  ;;  %v7393_v21 = vld [vmem:[#allocation163_spill] sm:$0xff]  ;;  %v7394_v54 = vld [vmem:[#allocation164_spill] sm:$0xff] }
 0x3c7   :  { %1887 = vmatprep.subr.bf16.mxu0 %v7384_v46  ;;  %1928 = vmatprep.subr.bf16.mxu1 %v7385_v31  ;;  %v7395_v46 = vld [vmem:[#allocation166_spill] sm:$0xff]  ;;  %v7396_v31 = vld [vmem:[#allocation165_spill] sm:$0xff] }
 0x3ca   :  { %1888 = vmatpush1.bf16.msra.mxu0 %v7386_v17  ;;  %1929 = vmatpush1.bf16.msra.mxu1 %v7387_v47  ;;  %v7397_v17 = vld [vmem:[#allocation167_spill] sm:$0xff]  ;;  %v7398_v47 = vld [vmem:[#allocation168_spill] sm:$0xff] }
 0x3cb   :  { %1889 = vmatprep.subr.bf16.mxu0 %v7388_v48  ;;  %1930 = vmatprep.subr.bf16.mxu1 %v7389_v4  ;;  %v7399_v48 = vld [vmem:[#allocation170_spill] sm:$0xff]  ;;  %v7400_v4 = vld [vmem:[#allocation169_spill] sm:$0xff] }
 0x3ce   :  { %1890 = vmatpush1.bf16.msra.mxu0 %v7390_v52  ;;  %1931 = vmatpush1.bf16.msra.mxu1 %v7391_v20  ;;  %v7401_v52 = vld [vmem:[#allocation171_spill] sm:$0xff] }
 0x3cf   :  { %1891 = vmatprep.subr.bf16.mxu0 %v7392_v11  ;;  %1932 = vmatprep.subr.bf16.mxu1 %v7393_v21  ;;  %v7402_v21 = vld [vmem:[#allocation172_spill] sm:$0xff] }
 0x3d2   :  { %1892 = vmatpush1.bf16.msra.mxu0 %v7394_v54  ;;  %1933 = vmatpush1.bf16.msra.mxu1 %v7395_v46 }
 0x3d3   :  { %1893 = vmatprep.subr.bf16.mxu0 %v7396_v31  ;;  %1934 = vmatprep.subr.bf16.mxu1 %v7397_v17 }
 0x3d6   :  { %1894 = vmatpush1.bf16.msra.mxu0 %v7398_v47  ;;  %1935 = vmatpush1.bf16.msra.mxu1 %v7399_v48 }
 0x3d7   :  { %1895 = vmatprep.subr.bf16.mxu0 %v7400_v4  ;;  %1936 = vmatprep.subr.bf16.mxu1 %v7401_v52 }
 0x3da   :  { %1896 = vmatpush1.bf16.msra.mxu0 %v5167_v40  ;;  %1937 = vmatpush1.bf16.msra.mxu1 %v5173_v15 }
 0x3db   :  { %1897 = vmatprep.subr.bf16.mxu0 %v7402_v21  ;;  %1938 = vmatprep.subr.bf16.mxu1 %v5175_v43 }
 0x3de   :  { %1898 = vmatpush1.bf16.msra.mxu0 %v5179_v10  ;;  %1939 = vmatpush1.bf16.msra.mxu1 %v5185_v13 }
 0x3df   :  { %1899 = vmatprep.subr.bf16.mxu0 %v5182_v9  ;;  %1940 = vmatprep.subr.bf16.mxu1 %v5187_v12 }
 0x3e2   :  { %1900 = vmatpush1.bf16.msra.mxu0 %v5191_v42  ;;  %1941 = vmatpush1.bf16.msra.mxu1 %v5195_v41 }
 0x3e3   :  { %2000 = vmatprep.subr.bf16.mxu0 %v4811_v23  ;;  %2041 = vmatprep.subr.bf16.mxu1 %v4818_v61  ;;  %v7415_v23 = vld [vmem:[#allocation99_spill] sm:$0xff]  ;;  %v7418_v61 = vld [vmem:[#allocation101_spill] sm:$0xff] }
 0x3e5   :  { %1902 = vmatmul.mubr.bf16.vlgmr.msra.gmra.mrb[52].mxu0 %v5281_v22  ;;  %1943 = vmatmul.mubr.bf16.vlgmr.msra.gmra.mrb[52].mxu1 %v5281_v22 }
 0x3e6   :  { %2001 = vmatpush1.bf16.msra.mxu0 %v4813_v30  ;;  %2042 = vmatpush1.bf16.msra.mxu1 %v4820_v62  ;;  %v7416_v30 = vld [vmem:[#allocation100_spill] sm:$0xff]  ;;  %v7419_v62 = vld [vmem:[#allocation103_spill] sm:$0xff] }
 0x3e7   :  { %2002 = vmatprep.subr.bf16.mxu0 %v4815_v32  ;;  %2043 = vmatprep.subr.bf16.mxu1 %v4824_v34  ;;  %v7417_v32 = vld [vmem:[#allocation102_spill] sm:$0xff]  ;;  %v7420_v34 = vld [vmem:[#allocation104_spill] sm:$0xff] }
 0x3ea   :  { %2003 = vmatpush1.bf16.msra.mxu0 %v4827_v5  ;;  %2044 = vmatpush1.bf16.msra.mxu1 %v4833_v0  ;;  %v7421_v5 = vld [vmem:[#allocation106_spill] sm:$0xff]  ;;  %v7423_v0 = vld [vmem:[#allocation107_spill] sm:$0xff] }
 0x3eb   :  { %2004 = vmatprep.subr.bf16.mxu0 %v4830_v7  ;;  %2045 = vmatprep.subr.bf16.mxu1 %v4835_v35  ;;  %v7422_v7 = vld [vmem:[#allocation105_spill] sm:$0xff]  ;;  %v7424_v35 = vld [vmem:[#allocation108_spill] sm:$0xff] }
 0x3ee   :  { %2005 = vmatpush1.bf16.msra.mxu0 %v4839_v45  ;;  %2046 = vmatpush1.bf16.msra.mxu1 %v4845_v36  ;;  %v7425_v45 = vld [vmem:[#allocation110_spill] sm:$0xff]  ;;  %v7427_v36 = vld [vmem:[#allocation111_spill] sm:$0xff] }
 0x3ef   :  { %2006 = vmatprep.subr.bf16.mxu0 %v4842_v2  ;;  %2047 = vmatprep.subr.bf16.mxu1 %v4847_v63  ;;  %v7426_v2 = vld [vmem:[#allocation109_spill] sm:$0xff]  ;;  %v7428_v63 = vld [vmem:[#allocation112_spill] sm:$0xff] }
 0x3f2   :  { %2007 = vmatpush1.bf16.msra.mxu0 %v4851_v1  ;;  %2048 = vmatpush1.bf16.msra.mxu1 %v4857_v8  ;;  %v7429_v1 = vld [vmem:[#allocation114_spill] sm:$0xff]  ;;  %v7431_v8 = vld [vmem:[#allocation115_spill] sm:$0xff] }
 0x3f3   :  { %2008 = vmatprep.subr.bf16.mxu0 %v4854_v6  ;;  %2049 = vmatprep.subr.bf16.mxu1 %v4859_v33  ;;  %v7430_v6 = vld [vmem:[#allocation113_spill] sm:$0xff]  ;;  %v7432_v33 = vld [vmem:[#allocation116_spill] sm:$0xff] }
 0x3f6   :  { %2009 = vmatpush1.bf16.msra.mxu0 %v4863_v39  ;;  %2050 = vmatpush1.bf16.msra.mxu1 %v4869_v38  ;;  %v7433_v39 = vld [vmem:[#allocation118_spill] sm:$0xff]  ;;  %v7435_v38 = vld [vmem:[#allocation119_spill] sm:$0xff] }
 0x3f7   :  { %2010 = vmatprep.subr.bf16.mxu0 %v4866_v37  ;;  %2051 = vmatprep.subr.bf16.mxu1 %v4871_v53  ;;  %v7403_v53 = vld [vmem:[#allocation87_spill] sm:$0xff]  ;;  %v7434_v37 = vld [vmem:[#allocation117_spill] sm:$0xff] }
 0x3fa   :  { %2011 = vmatpush1.bf16.msra.mxu0 %v4875_v3  ;;  %2052 = vmatpush1.bf16.msra.mxu1 %v4881_v59  ;;  %v7404_v59 = vld [vmem:[#allocation88_spill] sm:$0xff]  ;;  %v7414_v3 = vld [vmem:[#allocation97_spill] sm:$0xff] }
 0x3fb   :  { %2012 = vmatprep.subr.bf16.mxu0 %v4878_v60  ;;  %2053 = vmatprep.subr.bf16.mxu1 %v4883_v58  ;;  %v7405_v60 = vld [vmem:[#allocation90_spill] sm:$0xff]  ;;  %v7406_v58 = vld [vmem:[#allocation89_spill] sm:$0xff] }
 0x3fe   :  { %2013 = vmatpush1.bf16.msra.mxu0 %v4887_v57  ;;  %2054 = vmatpush1.bf16.msra.mxu1 %v4893_v26  ;;  %v7407_v57 = vld [vmem:[#allocation91_spill] sm:$0xff]  ;;  %v7408_v26 = vld [vmem:[#allocation92_spill] sm:$0xff] }
 0x3ff   :  { %2014 = vmatprep.subr.bf16.mxu0 %v4890_v28  ;;  %2055 = vmatprep.subr.bf16.mxu1 %v4895_v29  ;;  %v7409_v28 = vld [vmem:[#allocation94_spill] sm:$0xff]  ;;  %v7410_v29 = vld [vmem:[#allocation93_spill] sm:$0xff] }
 0x402   :  { %2015 = vmatpush1.bf16.msra.mxu0 %v4899_v27  ;;  %2056 = vmatpush1.bf16.msra.mxu1 %v4905_v55  ;;  %v7411_v27 = vld [vmem:[#allocation95_spill] sm:$0xff]  ;;  %v7412_v55 = vld [vmem:[#allocation96_spill] sm:$0xff] }
 0x403   :  { %2016 = vmatprep.subr.bf16.mxu0 %v4902_v56  ;;  %2057 = vmatprep.subr.bf16.mxu1 %v7403_v53  ;;  %v7413_v56 = vld [vmem:[#allocation98_spill] sm:$0xff] }
 0x406   :  { %2017 = vmatpush1.bf16.msra.mxu0 %v7404_v59  ;;  %2058 = vmatpush1.bf16.msra.mxu1 %v7405_v60 }
 0x407   :  { %2018 = vmatprep.subr.bf16.mxu0 %v7406_v58  ;;  %2059 = vmatprep.subr.bf16.mxu1 %v7407_v57 }
 0x40a   :  { %2019 = vmatpush1.bf16.msra.mxu0 %v7408_v26  ;;  %2060 = vmatpush1.bf16.msra.mxu1 %v7409_v28 }
 0x40b   :  { %2020 = vmatprep.subr.bf16.mxu0 %v7410_v29  ;;  %2061 = vmatprep.subr.bf16.mxu1 %v7411_v27  ;;  %v7436_v29 = vld [vmem:[#allocation26_spill] sm:$0xff] }
 0x40e   :  { %2021 = vmatpush1.bf16.msra.mxu0 %v7412_v55  ;;  %2062 = vmatpush1.bf16.msra.mxu1 %v7413_v56  ;;  %v7437_v55 = vld [vmem:[#allocation28_spill] sm:$0xff] }
 0x40f   :  { %2022 = vmatprep.subr.bf16.mxu0 %v7414_v3  ;;  %2063 = vmatprep.subr.bf16.mxu1 %v7415_v23  ;;  %v7438_v3 = vld [vmem:[#allocation25_spill] sm:$0xff] }
 0x412   :  { %2023 = vmatpush1.bf16.msra.mxu0 %v7416_v30  ;;  %2064 = vmatpush1.bf16.msra.mxu1 %v7417_v32  ;;  %v7439_v30 = vld [vmem:[#allocation27_spill] sm:$0xff] }
 0x413   :  { %2024 = vmatprep.subr.bf16.mxu0 %v7418_v61  ;;  %2065 = vmatprep.subr.bf16.mxu1 %v7419_v62 }
 0x416   :  { %2025 = vmatpush1.bf16.msra.mxu0 %v7420_v34  ;;  %2066 = vmatpush1.bf16.msra.mxu1 %v7421_v5 }
 0x417   :  { %2026 = vmatprep.subr.bf16.mxu0 %v7422_v7  ;;  %2067 = vmatprep.subr.bf16.mxu1 %v7423_v0 }
 0x41a   :  { %2027 = vmatpush1.bf16.msra.mxu0 %v7424_v35  ;;  %2068 = vmatpush1.bf16.msra.mxu1 %v7425_v45  ;;  %v7440_v35 = vld [vmem:[#allocation57_spill] sm:$0xff] }
 0x41b   :  { %2028 = vmatprep.subr.bf16.mxu0 %v7426_v2  ;;  %2069 = vmatprep.subr.bf16.mxu1 %v7427_v36 }
 0x41e   :  { %2029 = vmatpush1.bf16.msra.mxu0 %v7428_v63  ;;  %2070 = vmatpush1.bf16.msra.mxu1 %v7429_v1  ;;  %v7441_v63 = vld [vmem:[#allocation58_spill] sm:$0xff] }
 0x41f   :  { %2030 = vmatprep.subr.bf16.mxu0 %v7430_v6  ;;  %2071 = vmatprep.subr.bf16.mxu1 %v7431_v8  ;;  %v7442_v6 = vld [vmem:[#allocation59_spill] sm:$0xff] }
 0x422   :  { %2031 = vmatpush1.bf16.msra.mxu0 %v7432_v33  ;;  %2072 = vmatpush1.bf16.msra.mxu1 %v7433_v39 }
 0x423   :  { %2082 = vmatprep.subr.bf16.mxu0 %v7434_v37  ;;  %2123 = vmatprep.subr.bf16.mxu1 %v7435_v38  ;;  %v7443_v38 = vld [vmem:[#allocation60_spill] sm:$0xff] }
 0x478   :  { %v1821_v22 = vpop.f32.mrb[48].mxu0  ;;  %v1862_v53 = vpop.f32.mrb[48].mxu1 }
 0x479   :  { %v1823_v59 = vpop.f32.mrb[49].mxu0  ;;  %v1864_v60 = vpop.f32.mrb[49].mxu1  ;;  %v1863_v27 = vadd.f32 %v1862_v53, %v7436_v29  ;;  %v1822_v23 = vadd.f32 %v1821_v22, %v7438_v3 }
 0x47a   :  { %v1825_v58 = vpop.f32.mrb[50].mxu0  ;;  %v1866_v57 = vpop.f32.mrb[50].mxu1  ;;  %v1865_v56 = vadd.f32 %v1864_v60, %v7437_v55  ;;  %v1824_v32 = vadd.f32 %v1823_v59, %v7439_v30 }
 0x47b   :  { %v1826_v26 = vpop.f32.mrb[51].mxu0  ;;  %v1867_v28 = vpop.f32.mrb[51].mxu1  ;;  %v1959_v61 = vmul.f32 0.5, %v1863_v27  ;;  %v1951_v34 = vmul.f32 0.5, %v1822_v23 }
 0x47c   :  { %v1960_v62 = vmul.f32 0.5, %v1865_v56  ;;  %v1952_v5 = vmul.f32 0.5, %v1824_v32 }
 0x47d   :  { %3871 = vtanh.f32 %v1959_v61 }
 0x47e   :  { %3873 = vtanh.f32 %v1960_v62 }
 0x47f   :  { %3875 = vtanh.f32 %v1951_v34 }
 0x480   :  { %3877 = vtanh.f32 %v1952_v5 }
 0x487   :  { %v3872_v37 = vpop.eup %3871 }
 0x488   :  { %v3874_v60 = vpop.eup %3873  ;;  %v1963_v26 = vmul.f32 0.5, %v3872_v37 }
 0x489   :  { %v3876_v58 = vpop.eup %3875  ;;  %v1964_v29 = vmul.f32 0.5, %v3874_v60  ;;  %v7455_v60 = vld [vmem:[#allocation139_spill] sm:$0xff] }
 0x48a   :  { %v3878_v57 = vpop.eup %3877  ;;  %v1955_v55 = vmul.f32 0.5, %v3876_v58  ;;  %v1965_v3 = vadd.f32 0.5, %v1963_v26  ;;  %v7456_v58 = vld [vmem:[#allocation140_spill] sm:$0xff]  ;;  %v7458_v26 = vld [vmem:[#allocation141_spill] sm:$0xff] }
 0x48b   :  { %v1956_v56 = vmul.f32 0.5, %v3878_v57  ;;  %v1966_v23 = vadd.f32 0.5, %v1964_v29  ;;  %v7457_v57 = vld [vmem:[#allocation142_spill] sm:$0xff]  ;;  %v7460_v29 = vld [vmem:[#allocation144_spill] sm:$0xff] }
 0x48c   :  { %v1957_v30 = vadd.f32 0.5, %v1955_v55  ;;  %v1977_v34 = vmul.f32 %v1965_v3, %v5275_v44  ;;  %v7462_v55 = vld [vmem:[#allocation145_spill] sm:$0xff]  ;;  %v7464_v3 = vld [vmem:[#allocation148_spill] sm:$0xff] }
 0x48d   :  { %v1958_v61 = vadd.f32 0.5, %v1956_v56  ;;  %v7463_v56 = vld [vmem:[#allocation147_spill] sm:$0xff] }
 0x4b8   :  { %v1903_v7 = vpop.f32.mrb[52].mxu0  ;;  %v1944_v0 = vpop.f32.mrb[52].mxu1 }
 0x4b9   :  { %v1904_v45 = vadd.f32 %v1903_v7, %v7440_v35  ;;  %v1905_v2 = vpop.f32.mrb[53].mxu0  ;;  %v1946_v36 = vpop.f32.mrb[53].mxu1  ;;  %v1945_v1 = vadd.f32 %v1944_v0, %v7441_v63  ;;  %v1978_v7 = vmul.f32 %v1966_v23, %v5277_v16  ;;  %v7465_v23 = vld [vmem:[#allocation150_spill] sm:$0xff] }
 0x4ba   :  { %v1906_v8 = vadd.f32 %v1905_v2, %v7442_v6  ;;  %v1907_v33 = vpop.f32.mrb[54].mxu0  ;;  %v1948_v39 = vpop.f32.mrb[54].mxu1  ;;  %v1947_v22 = vadd.f32 %v1946_v36, %v7443_v38 }
 0x4bb   :  { %3879 = vtanh.f32 %v1904_v45  ;;  %v1908_v53 = vpop.f32.mrb[55].mxu0  ;;  %v1949_v59 = vpop.f32.mrb[55].mxu1  ;;  %v1969_v28 = vmul.f32 0.5, %v1945_v1 }
 0x4bc   :  { %3881 = vtanh.f32 %v1906_v8  ;;  %v1970_v27 = vmul.f32 0.5, %v1947_v22  ;;  %v7444_v22 = vld [vmem:[#allocation128_spill] sm:$0xff]  ;;  %v7445_v53 = vld [vmem:[#allocation130_spill] sm:$0xff] }
 0x4bd   :  { %3883 = vtanh.f32 %v1969_v28  ;;  %v7448_v59 = vld [vmem:[#allocation132_spill] sm:$0xff]  ;;  %v7459_v28 = vld [vmem:[#allocation143_spill] sm:$0xff] }
 0x4be   :  { %3885 = vtanh.f32 %v1970_v27  ;;  %v7461_v27 = vld [vmem:[#allocation146_spill] sm:$0xff] }
 0x4c5   :  { %v3880_v32 = vpop.eup %3879 }
 0x4c6   :  { %v3882_v62 = vpop.eup %3881  ;;  %v1979_v5 = vmul.f32 %v3880_v32, %v1957_v30  ;;  %v7466_v30 = vld [vmem:[#allocation149_spill] sm:$0xff]  ;;  %v7467_v32 = vld [vmem:[#allocation151_spill] sm:$0xff] }
 0x4c7   :  { %v1980_v0 = vmul.f32 %v3882_v62, %v1958_v61  ;;  %v3884_v2 = vpop.eup %3883  ;;  %v7468_v61 = vld [vmem:[#allocation152_spill] sm:$0xff]  ;;  %v7469_v62 = vld [vmem:[#allocation154_spill] sm:$0xff] }
 0x4c8   :  { %v5425_v35 = vadd.f32 %v1979_v5, %v1977_v34  ;;  %v3886_v36 = vpop.eup %3885  ;;  %v1973_v63 = vmul.f32 0.5, %v3884_v2  ;;  %v7470_v34 = vld [vmem:[#allocation153_spill] sm:$0xff]  ;;  %v7471_v5 = vld [vmem:[#allocation155_spill] sm:$0xff] }
 0x4c9   :  { %v5427_v45 = vadd.f32 %v1980_v0, %v1978_v7  ;;  %v1974_v1 = vmul.f32 0.5, %v3886_v36  ;;  %v7472_v7 = vld [vmem:[#allocation156_spill] sm:$0xff]  ;;  %v7473_v0 = vld [vmem:[#allocation158_spill] sm:$0xff]  ;;  %v7474_v2 = vld [vmem:[#allocation157_spill] sm:$0xff] }
 0x4ca   :  { %3887 = vtanh.f32 %v5425_v35  ;;  %v1975_v6 = vadd.f32 0.5, %v1973_v63  ;;  %v7475_v36 = vld [vmem:[#allocation159_spill] sm:$0xff]  ;;  %v7476_v63 = vld [vmem:[#allocation160_spill] sm:$0xff] }
 0x4cb   :  { %3889 = vtanh.f32 %v5427_v45  ;;  %v1976_v33 = vadd.f32 0.5, %v1974_v1  ;;  %v7477_v1 = vld [vmem:[#allocation163_spill] sm:$0xff] }
 0x4d4   :  { %v3888_v8 = vpop.eup %3887 }
 0x4d5   :  { %v3890_v44 = vpop.eup %3889  ;;  %v1985_v39 = vmul.f32 %v3888_v8, %v1975_v6  ;;  %v5559_v6 = vld [vmem:[#allocation3 + $0x148] sm:$0xff]  ;;  %v5562_v8 = vld [vmem:[#allocation3 + $0x158] sm:$0xff] }
 0x4d6   :  { %v1986_v37 = vmul.f32 %v3890_v44, %v1976_v33  ;;  %7481 = vst [vmem:[#allocation23_spill] sm:$0xff] %v5559_v6  ;;  %7482 = vst [vmem:[#allocation53_spill] sm:$0xff] %v5562_v8  ;;  %v5565_v33 = vld [vmem:[#allocation3 + $0x140] sm:$0xff]  ;;  %v5568_v44 = vld [vmem:[#allocation3 + $0x150] sm:$0xff] }
 0x4d7   :  { %v5431_v38 = vpack.c.bf16 %v1985_v39, %v1985_v39  ;;  %7483 = vst [vmem:[#allocation55_spill] sm:$0xff] %v5565_v33  ;;  %7484 = vst [vmem:[#allocation54_spill] sm:$0xff] %v5568_v44  ;;  %v5571_v39 = vld [vmem:[#allocation3 + $0x188] sm:$0xff] }
 0x4d8   :  { %v1988_v16 = vpack.c.bf16 %v1986_v37, %v1986_v37  ;;  %7485 = vst [vmem:[#allocation56_spill] sm:$0xff] %v5571_v39  ;;  %v5574_v37 = vld [vmem:[#allocation3 + $0x198] sm:$0xff] }
 0x4d9   :  { %7486 = vst [vmem:[#allocation120_spill] sm:$0xff] %v5574_v37 }
 0x4da   :  { %2032 = vmatprep.mubr.bf16.mxu0 %v1988_v16  ;;  %2073 = vmatprep.mubr.bf16.mxu1 %v1988_v16 }
 0x4db   :  { %2033 = vmatmul.mubr.bf16.vlgmr.msra.gmra.mrb[56].mxu0 %v5431_v38  ;;  %2074 = vmatmul.mubr.bf16.vlgmr.msra.gmra.mrb[56].mxu1 %v5431_v38 }
 0x4dc   :  { %2083 = vmatpush1.bf16.msra.mxu0 %v7350_v49  ;;  %2124 = vmatpush1.bf16.msra.mxu1 %v7351_v50  ;;  %v7446_v49 = vld [vmem:[#allocation129_spill] sm:$0xff]  ;;  %v7447_v50 = vld [vmem:[#allocation131_spill] sm:$0xff] }
 0x4dd   :  { %2114 = vmatprep.mubr.bf16.mxu0 %v1988_v16  ;;  %2155 = vmatprep.mubr.bf16.mxu1 %v1988_v16  ;;  %v5577_v16 = vld [vmem:[#allocation3 + $0x180] sm:$0xff] }
 0x4de   :  { %2084 = vmatprep.subr.bf16.mxu0 %v7352_v19  ;;  %2125 = vmatprep.subr.bf16.mxu1 %v7353_v24  ;;  %v7449_v19 = vld [vmem:[#allocation134_spill] sm:$0xff]  ;;  %v7450_v24 = vld [vmem:[#allocation133_spill] sm:$0xff]  ;;  %7487 = vst [vmem:[#allocation122_spill] sm:$0xff] %v5577_v16 }
 0x4e0   :  { %2085 = vmatpush1.bf16.msra.mxu0 %v7354_v14  ;;  %2126 = vmatpush1.bf16.msra.mxu1 %v7355_v25  ;;  %v7451_v14 = vld [vmem:[#allocation135_spill] sm:$0xff]  ;;  %v7452_v25 = vld [vmem:[#allocation136_spill] sm:$0xff] }
 0x4e1   :  { %2086 = vmatprep.subr.bf16.mxu0 %v7356_v51  ;;  %2127 = vmatprep.subr.bf16.mxu1 %v7357_v18  ;;  %v7453_v51 = vld [vmem:[#allocation138_spill] sm:$0xff]  ;;  %v7454_v18 = vld [vmem:[#allocation137_spill] sm:$0xff] }
 0x4e4   :  { %2087 = vmatpush1.bf16.msra.mxu0 %v7444_v22  ;;  %2128 = vmatpush1.bf16.msra.mxu1 %v7445_v53  ;;  %v5583_v22 = vld [vmem:[#allocation3 + $0x1c8] sm:$0xff]  ;;  %v5586_v53 = vld [vmem:[#allocation3 + $0x1d8] sm:$0xff] }
 0x4e5   :  { %2088 = vmatprep.subr.bf16.mxu0 %v7446_v49  ;;  %2129 = vmatprep.subr.bf16.mxu1 %v7447_v50  ;;  %7489 = vst [vmem:[#allocation123_spill] sm:$0xff] %v5583_v22  ;;  %7490 = vst [vmem:[#allocation124_spill] sm:$0xff] %v5586_v53  ;;  %v5589_v49 = vld [vmem:[#allocation3 + $0x1c0] sm:$0xff]  ;;  %v5592_v50 = vld [vmem:[#allocation3 + $0x1d0] sm:$0xff] }
 0x4e6   :  { %7491 = vst [vmem:[#allocation126_spill] sm:$0xff] %v5589_v49  ;;  %7492 = vst [vmem:[#allocation125_spill] sm:$0xff] %v5592_v50 }
 0x4e8   :  { %2089 = vmatpush1.bf16.msra.mxu0 %v7448_v59  ;;  %2130 = vmatpush1.bf16.msra.mxu1 %v7449_v19  ;;  %v5595_v59 = vld [vmem:[#allocation3 + $0x208] sm:$0xff]  ;;  %v5598_v19 = vld [vmem:[#allocation3 + $0x218] sm:$0xff] }
 0x4e9   :  { %2090 = vmatprep.subr.bf16.mxu0 %v7450_v24  ;;  %2131 = vmatprep.subr.bf16.mxu1 %v7451_v14  ;;  %7493 = vst [vmem:[#allocation127_spill] sm:$0xff] %v5595_v59  ;;  %7494 = vst [vmem:[#allocation162_spill] sm:$0xff] %v5598_v19  ;;  %v5601_v24 = vld [vmem:[#allocation3 + $0x200] sm:$0xff]  ;;  %v5604_v14 = vld [vmem:[#allocation3 + $0x210] sm:$0xff] }
 0x4ea   :  { %7495 = vst [vmem:[#allocation161_spill] sm:$0xff] %v5601_v24  ;;  %7496 = vst [vmem:[#allocation164_spill] sm:$0xff] %v5604_v14 }
 0x4ec   :  { %2091 = vmatpush1.bf16.msra.mxu0 %v7452_v25  ;;  %2132 = vmatpush1.bf16.msra.mxu1 %v7453_v51  ;;  %v5607_v25 = vld [vmem:[#allocation3 + $0x248] sm:$0xff]  ;;  %v5610_v51 = vld [vmem:[#allocation3 + $0x258] sm:$0xff] }
 0x4ed   :  { %2092 = vmatprep.subr.bf16.mxu0 %v7454_v18  ;;  %2133 = vmatprep.subr.bf16.mxu1 %v7455_v60  ;;  %7497 = vst [vmem:[#allocation166_spill] sm:$0xff] %v5607_v25  ;;  %7498 = vst [vmem:[#allocation165_spill] sm:$0xff] %v5610_v51  ;;  %v5613_v18 = vld [vmem:[#allocation3 + $0x240] sm:$0xff]  ;;  %v5616_v60 = vld [vmem:[#allocation3 + $0x250] sm:$0xff] }
 0x4ee   :  { %7499 = vst [vmem:[#allocation167_spill] sm:$0xff] %v5613_v18  ;;  %7500 = vst [vmem:[#allocation168_spill] sm:$0xff] %v5616_v60 }
 0x4f0   :  { %2093 = vmatpush1.bf16.msra.mxu0 %v7456_v58  ;;  %2134 = vmatpush1.bf16.msra.mxu1 %v7457_v57  ;;  %v5619_v58 = vld [vmem:[#allocation3 + $0x288] sm:$0xff]  ;;  %v5622_v57 = vld [vmem:[#allocation3 + $0x298] sm:$0xff] }
 0x4f1   :  { %2094 = vmatprep.subr.bf16.mxu0 %v7458_v26  ;;  %2135 = vmatprep.subr.bf16.mxu1 %v7459_v28  ;;  %7501 = vst [vmem:[#allocation170_spill] sm:$0xff] %v5619_v58  ;;  %7502 = vst [vmem:[#allocation169_spill] sm:$0xff] %v5622_v57  ;;  %v5625_v26 = vld [vmem:[#allocation3 + $0x280] sm:$0xff]  ;;  %v5628_v28 = vld [vmem:[#allocation3 + $0x290] sm:$0xff] }
 0x4f2   :  { %7503 = vst [vmem:[#allocation171_spill] sm:$0xff] %v5625_v26  ;;  %7504 = vst [vmem:[#allocation172_spill] sm:$0xff] %v5628_v28 }
 0x4f4   :  { %2095 = vmatpush1.bf16.msra.mxu0 %v7460_v29  ;;  %2136 = vmatpush1.bf16.msra.mxu1 %v7461_v27  ;;  %v5631_v29 = vld [vmem:[#allocation3 + $0x2c8] sm:$0xff]  ;;  %v5634_v27 = vld [vmem:[#allocation3 + $0x2d8] sm:$0xff] }
 0x4f5   :  { %2096 = vmatprep.subr.bf16.mxu0 %v7462_v55  ;;  %2137 = vmatprep.subr.bf16.mxu1 %v7463_v56  ;;  %7505 = vst [vmem:[#allocation87_spill] sm:$0xff] %v5631_v29  ;;  %7506 = vst [vmem:[#allocation88_spill] sm:$0xff] %v5634_v27  ;;  %v5637_v55 = vld [vmem:[#allocation3 + $0x2c0] sm:$0xff]  ;;  %v5640_v56 = vld [vmem:[#allocation3 + $0x2d0] sm:$0xff] }
 0x4f6   :  { %7507 = vst [vmem:[#allocation90_spill] sm:$0xff] %v5637_v55  ;;  %7508 = vst [vmem:[#allocation89_spill] sm:$0xff] %v5640_v56 }
 0x4f8   :  { %2097 = vmatpush1.bf16.msra.mxu0 %v7464_v3  ;;  %2138 = vmatpush1.bf16.msra.mxu1 %v7465_v23  ;;  %v5643_v3 = vld [vmem:[#allocation3 + $0x308] sm:$0xff]  ;;  %v5646_v23 = vld [vmem:[#allocation3 + $0x318] sm:$0xff] }
 0x4f9   :  { %2098 = vmatprep.subr.bf16.mxu0 %v7466_v30  ;;  %2139 = vmatprep.subr.bf16.mxu1 %v7467_v32  ;;  %7509 = vst [vmem:[#allocation91_spill] sm:$0xff] %v5643_v3  ;;  %7510 = vst [vmem:[#allocation92_spill] sm:$0xff] %v5646_v23  ;;  %v5649_v30 = vld [vmem:[#allocation3 + $0x300] sm:$0xff]  ;;  %v5652_v32 = vld [vmem:[#allocation3 + $0x310] sm:$0xff] }
 0x4fa   :  { %7511 = vst [vmem:[#allocation94_spill] sm:$0xff] %v5649_v30  ;;  %7512 = vst [vmem:[#allocation93_spill] sm:$0xff] %v5652_v32 }
 0x4fc   :  { %2099 = vmatpush1.bf16.msra.mxu0 %v7468_v61  ;;  %2140 = vmatpush1.bf16.msra.mxu1 %v7469_v62  ;;  %v5655_v61 = vld [vmem:[#allocation3 + $0x348] sm:$0xff]  ;;  %v5658_v62 = vld [vmem:[#allocation3 + $0x358] sm:$0xff] }
 0x4fd   :  { %2100 = vmatprep.subr.bf16.mxu0 %v7470_v34  ;;  %2141 = vmatprep.subr.bf16.mxu1 %v7471_v5  ;;  %7513 = vst [vmem:[#allocation95_spill] sm:$0xff] %v5655_v61  ;;  %7514 = vst [vmem:[#allocation96_spill] sm:$0xff] %v5658_v62  ;;  %v5661_v34 = vld [vmem:[#allocation3 + $0x340] sm:$0xff]  ;;  %v5664_v5 = vld [vmem:[#allocation3 + $0x350] sm:$0xff] }
 0x4fe   :  { %7515 = vst [vmem:[#allocation98_spill] sm:$0xff] %v5661_v34  ;;  %7516 = vst [vmem:[#allocation97_spill] sm:$0xff] %v5664_v5 }
 0x500   :  { %2101 = vmatpush1.bf16.msra.mxu0 %v7472_v7  ;;  %2142 = vmatpush1.bf16.msra.mxu1 %v7473_v0  ;;  %v5667_v7 = vld [vmem:[#allocation3 + $0x388] sm:$0xff]  ;;  %v5670_v0 = vld [vmem:[#allocation3 + $0x398] sm:$0xff] }
 0x501   :  { %2102 = vmatprep.subr.bf16.mxu0 %v7474_v2  ;;  %2143 = vmatprep.subr.bf16.mxu1 %v7475_v36  ;;  %7517 = vst [vmem:[#allocation99_spill] sm:$0xff] %v5667_v7  ;;  %7518 = vst [vmem:[#allocation100_spill] sm:$0xff] %v5670_v0  ;;  %v5673_v2 = vld [vmem:[#allocation3 + $0x380] sm:$0xff]  ;;  %v5676_v36 = vld [vmem:[#allocation3 + $0x390] sm:$0xff] }
 0x502   :  { %7519 = vst [vmem:[#allocation102_spill] sm:$0xff] %v5673_v2  ;;  %7520 = vst [vmem:[#allocation101_spill] sm:$0xff] %v5676_v36 }
 0x504   :  { %2103 = vmatpush1.bf16.msra.mxu0 %v7476_v63  ;;  %2144 = vmatpush1.bf16.msra.mxu1 %v7391_v20  ;;  %v5497_v20 = vld [vmem:[#allocation3 + $0x8] sm:$0xff] }
 0x505   :  { %2104 = vmatprep.subr.bf16.mxu0 %v7392_v11  ;;  %2145 = vmatprep.subr.bf16.mxu1 %v7477_v1  ;;  %v5529_v11 = vld [vmem:[#allocation3 + $0x80] sm:$0xff]  ;;  %v5679_v63 = vld [vmem:[#allocation3 + $0x3c8] sm:$0xff]  ;;  %v5682_v1 = vld [vmem:[#allocation3 + $0x3d8] sm:$0xff] }
 0x506   :  { %7521 = vst [vmem:[#allocation103_spill] sm:$0xff] %v5679_v63  ;;  %7522 = vst [vmem:[#allocation104_spill] sm:$0xff] %v5682_v1 }
 0x508   :  { %2105 = vmatpush1.bf16.msra.mxu0 %v7394_v54  ;;  %2146 = vmatpush1.bf16.msra.mxu1 %v7395_v46  ;;  %v5535_v54 = vld [vmem:[#allocation3 + $0xc8] sm:$0xff]  ;;  %v5538_v46 = vld [vmem:[#allocation3 + $0xd8] sm:$0xff] }
 0x509   :  { %2106 = vmatprep.subr.bf16.mxu0 %v7396_v31  ;;  %2147 = vmatprep.subr.bf16.mxu1 %v7397_v17  ;;  %v5541_v31 = vld [vmem:[#allocation3 + $0xc0] sm:$0xff]  ;;  %v5544_v17 = vld [vmem:[#allocation3 + $0xd0] sm:$0xff] }
 0x50c   :  { %2107 = vmatpush1.bf16.msra.mxu0 %v7398_v47  ;;  %2148 = vmatpush1.bf16.msra.mxu1 %v7399_v48  ;;  %v5547_v47 = vld [vmem:[#allocation3 + $0x108] sm:$0xff]  ;;  %v5550_v48 = vld [vmem:[#allocation3 + $0x118] sm:$0xff] }
 0x50d   :  { %2108 = vmatprep.subr.bf16.mxu0 %v7400_v4  ;;  %2149 = vmatprep.subr.bf16.mxu1 %v7401_v52  ;;  %7478 = vst [vmem:[#allocation22_spill] sm:$0xff] %v5550_v48  ;;  %v5553_v4 = vld [vmem:[#allocation3 + $0x100] sm:$0xff]  ;;  %v5556_v52 = vld [vmem:[#allocation3 + $0x110] sm:$0xff] }
 0x50e   :  { %7479 = vst [vmem:[#allocation24_spill] sm:$0xff] %v5553_v4  ;;  %7480 = vst [vmem:[#allocation21_spill] sm:$0xff] %v5556_v52 }
 0x510   :  { %2109 = vmatpush1.bf16.msra.mxu0 %v5167_v40  ;;  %2150 = vmatpush1.bf16.msra.mxu1 %v5173_v15  ;;  %v5500_v15 = vld [vmem:[#allocation3 + $0x18] sm:$0xff]  ;;  %v5517_v40 = vld [vmem:[#allocation3 + $0x40] sm:$0xff] }
 0x511   :  { %2110 = vmatprep.subr.bf16.mxu0 %v7402_v21  ;;  %2151 = vmatprep.subr.bf16.mxu1 %v5175_v43  ;;  %v5526_v43 = vld [vmem:[#allocation3 + $0x98] sm:$0xff]  ;;  %v5532_v21 = vld [vmem:[#allocation3 + $0x90] sm:$0xff] }
 0x514   :  { %2111 = vmatpush1.bf16.msra.mxu0 %v5179_v10  ;;  %2152 = vmatpush1.bf16.msra.mxu1 %v5185_v13  ;;  %v5505_v10 = vld [vmem:[#allocation3] sm:$0xff]  ;;  %v5514_v13 = vld [vmem:[#allocation3 + $0x58] sm:$0xff] }
 0x515   :  { %2112 = vmatprep.subr.bf16.mxu0 %v5182_v9  ;;  %2153 = vmatprep.subr.bf16.mxu1 %v5187_v12  ;;  %v5508_v9 = vld [vmem:[#allocation3 + $0x10] sm:$0xff]  ;;  %v5511_v12 = vld [vmem:[#allocation3 + $0x48] sm:$0xff] }
 0x518   :  { %2113 = vmatpush1.bf16.msra.mxu0 %v5191_v42  ;;  %2154 = vmatpush1.bf16.msra.mxu1 %v5195_v41  ;;  %v5520_v41 = vld [vmem:[#allocation3 + $0x50] sm:$0xff]  ;;  %v5523_v42 = vld [vmem:[#allocation3 + $0x88] sm:$0xff] }
 0x519   :  { %2213 = vmatprep.subr.bf16.mxu0 %v5497_v20  ;;  %2254 = vmatprep.subr.bf16.mxu1 %v5500_v15 }
 0x51b   :  { %2115 = vmatmul.mubr.bf16.vlgmr.msra.gmra.mrb[60].mxu0 %v5431_v38  ;;  %2156 = vmatmul.mubr.bf16.vlgmr.msra.gmra.mrb[60].mxu1 %v5431_v38  ;;  %v5580_v38 = vld [vmem:[#allocation3 + $0x190] sm:$0xff] }
 0x51c   :  { %2214 = vmatpush1.bf16.msra.mxu0 %v5505_v10  ;;  %2255 = vmatpush1.bf16.msra.mxu1 %v5508_v9  ;;  %7488 = vst [vmem:[#allocation121_spill] sm:$0xff] %v5580_v38 }
 0x51d   :  { %2215 = vmatprep.subr.bf16.mxu0 %v5511_v12  ;;  %2256 = vmatprep.subr.bf16.mxu1 %v5514_v13 }
 0x520   :  { %2216 = vmatpush1.bf16.msra.mxu0 %v5517_v40  ;;  %2257 = vmatpush1.bf16.msra.mxu1 %v5520_v41 }
 0x521   :  { %2217 = vmatprep.subr.bf16.mxu0 %v5523_v42  ;;  %2258 = vmatprep.subr.bf16.mxu1 %v5526_v43 }
 0x524   :  { %2218 = vmatpush1.bf16.msra.mxu0 %v5529_v11  ;;  %2259 = vmatpush1.bf16.msra.mxu1 %v5532_v21 }
 0x525   :  { %2219 = vmatprep.subr.bf16.mxu0 %v5535_v54  ;;  %2260 = vmatprep.subr.bf16.mxu1 %v5538_v46 }
 0x528   :  { %2220 = vmatpush1.bf16.msra.mxu0 %v5541_v31  ;;  %2261 = vmatpush1.bf16.msra.mxu1 %v5544_v17 }
 0x529   :  { %2221 = vmatprep.subr.bf16.mxu0 %v5547_v47  ;;  %2262 = vmatprep.subr.bf16.mxu1 %v5550_v48 }
 0x52c   :  { %2222 = vmatpush1.bf16.msra.mxu0 %v5553_v4  ;;  %2263 = vmatpush1.bf16.msra.mxu1 %v5556_v52 }
 0x52d   :  { %2223 = vmatprep.subr.bf16.mxu0 %v5559_v6  ;;  %2264 = vmatprep.subr.bf16.mxu1 %v5562_v8 }
 0x530   :  { %2224 = vmatpush1.bf16.msra.mxu0 %v5565_v33  ;;  %2265 = vmatpush1.bf16.msra.mxu1 %v5568_v44 }
 0x531   :  { %2225 = vmatprep.subr.bf16.mxu0 %v5571_v39  ;;  %2266 = vmatprep.subr.bf16.mxu1 %v5574_v37 }
 0x534   :  { %2226 = vmatpush1.bf16.msra.mxu0 %v5577_v16  ;;  %2267 = vmatpush1.bf16.msra.mxu1 %v5580_v38 }
 0x535   :  { %2227 = vmatprep.subr.bf16.mxu0 %v5583_v22  ;;  %2268 = vmatprep.subr.bf16.mxu1 %v5586_v53 }
 0x538   :  { %2228 = vmatpush1.bf16.msra.mxu0 %v5589_v49  ;;  %2269 = vmatpush1.bf16.msra.mxu1 %v5592_v50 }
 0x539   :  { %2229 = vmatprep.subr.bf16.mxu0 %v5595_v59  ;;  %2270 = vmatprep.subr.bf16.mxu1 %v5598_v19 }
 0x53c   :  { %2230 = vmatpush1.bf16.msra.mxu0 %v5601_v24  ;;  %2271 = vmatpush1.bf16.msra.mxu1 %v5604_v14 }
 0x53d   :  { %2231 = vmatprep.subr.bf16.mxu0 %v5607_v25  ;;  %2272 = vmatprep.subr.bf16.mxu1 %v5610_v51 }
 0x540   :  { %2232 = vmatpush1.bf16.msra.mxu0 %v5613_v18  ;;  %2273 = vmatpush1.bf16.msra.mxu1 %v5616_v60 }
 0x541   :  { %2233 = vmatprep.subr.bf16.mxu0 %v5619_v58  ;;  %2274 = vmatprep.subr.bf16.mxu1 %v5622_v57 }
 0x544   :  { %2234 = vmatpush1.bf16.msra.mxu0 %v5625_v26  ;;  %2275 = vmatpush1.bf16.msra.mxu1 %v5628_v28 }
 0x545   :  { %2235 = vmatprep.subr.bf16.mxu0 %v5631_v29  ;;  %2276 = vmatprep.subr.bf16.mxu1 %v5634_v27  ;;  %v7530_v27 = vld [vmem:[#allocation31_spill] sm:$0xff] }
 0x548   :  { %2236 = vmatpush1.bf16.msra.mxu0 %v5637_v55  ;;  %2277 = vmatpush1.bf16.msra.mxu1 %v5640_v56  ;;  %v7529_v56 = vld [vmem:[#allocation29_spill] sm:$0xff] }
 0x549   :  { %2237 = vmatprep.subr.bf16.mxu0 %v5643_v3  ;;  %2278 = vmatprep.subr.bf16.mxu1 %v5646_v23  ;;  %v7528_v3 = vld [vmem:[#allocation32_spill] sm:$0xff] }
 0x54c   :  { %2238 = vmatpush1.bf16.msra.mxu0 %v5649_v30  ;;  %2279 = vmatpush1.bf16.msra.mxu1 %v5652_v32  ;;  %v7527_v30 = vld [vmem:[#allocation30_spill] sm:$0xff] }
 0x54d   :  { %2239 = vmatprep.subr.bf16.mxu0 %v5655_v61  ;;  %2280 = vmatprep.subr.bf16.mxu1 %v5658_v62 }
 0x550   :  { %2240 = vmatpush1.bf16.msra.mxu0 %v5661_v34  ;;  %2281 = vmatpush1.bf16.msra.mxu1 %v5664_v5 }
 0x551   :  { %2241 = vmatprep.subr.bf16.mxu0 %v5667_v7  ;;  %2282 = vmatprep.subr.bf16.mxu1 %v5670_v0  ;;  %v5685_v7 = vld [vmem:[#allocation3 + $0x3c0] sm:$0xff]  ;;  %v5688_v0 = vld [vmem:[#allocation3 + $0x3d0] sm:$0xff] }
 0x552   :  { %7523 = vst [vmem:[#allocation106_spill] sm:$0xff] %v5685_v7  ;;  %7524 = vst [vmem:[#allocation105_spill] sm:$0xff] %v5688_v0 }
 0x554   :  { %2242 = vmatpush1.bf16.msra.mxu0 %v5673_v2  ;;  %2283 = vmatpush1.bf16.msra.mxu1 %v5676_v36  ;;  %v5691_v2 = vld [vmem:[#allocation3 + $0x28] sm:$0xff]  ;;  %v5694_v36 = vld [vmem:[#allocation3 + $0x38] sm:$0xff] }
 0x555   :  { %2243 = vmatprep.subr.bf16.mxu0 %v5679_v63  ;;  %2284 = vmatprep.subr.bf16.mxu1 %v5682_v1  ;;  %7525 = vst [vmem:[#allocation107_spill] sm:$0xff] %v5691_v2  ;;  %7526 = vst [vmem:[#allocation108_spill] sm:$0xff] %v5694_v36 }
 0x558   :  { %2244 = vmatpush1.bf16.msra.mxu0 %v5685_v7  ;;  %2285 = vmatpush1.bf16.msra.mxu1 %v5688_v0 }
 0x559   :  { %2295 = vmatprep.subr.bf16.mxu0 %v5691_v2  ;;  %2336 = vmatprep.subr.bf16.mxu1 %v5694_v36 }
 0x5ae   :  { %v2034_v63 = vpop.f32.mrb[56].mxu0  ;;  %v2075_v5 = vpop.f32.mrb[56].mxu1 }
 0x5af   :  { %v2036_v34 = vpop.f32.mrb[57].mxu0  ;;  %v2077_v1 = vpop.f32.mrb[57].mxu1  ;;  %v2076_v23 = vadd.f32 %v2075_v5, %v7527_v30  ;;  %v2035_v55 = vadd.f32 %v2034_v63, %v7529_v56  ;;  %v7532_v5 = vld [vmem:[#allocation62_spill] sm:$0xff] }
 0x5b0   :  { %v2038_v62 = vpop.f32.mrb[58].mxu0  ;;  %v2079_v61 = vpop.f32.mrb[58].mxu1  ;;  %v2078_v0 = vadd.f32 %v2077_v1, %v7528_v3  ;;  %v2037_v2 = vadd.f32 %v2036_v34, %v7530_v27  ;;  %v7533_v1 = vld [vmem:[#allocation63_spill] sm:$0xff] }
 0x5b1   :  { %v2039_v32 = vpop.f32.mrb[59].mxu0  ;;  %v2080_v7 = vpop.f32.mrb[59].mxu1  ;;  %v2172_v29 = vmul.f32 0.5, %v2076_v23  ;;  %v2164_v26 = vmul.f32 0.5, %v2035_v55  ;;  %v7534_v55 = vld [vmem:[#allocation64_spill] sm:$0xff] }
 0x5b2   :  { %v2173_v28 = vmul.f32 0.5, %v2078_v0  ;;  %v2165_v36 = vmul.f32 0.5, %v2037_v2  ;;  %v7531_v32 = vld [vmem:[#allocation61_spill] sm:$0xff] }
 0x5b3   :  { %3891 = vtanh.f32 %v2172_v29 }
 0x5b4   :  { %3893 = vtanh.f32 %v2173_v28 }
 0x5b5   :  { %3895 = vtanh.f32 %v2164_v26 }
 0x5b6   :  { %3897 = vtanh.f32 %v2165_v36 }
 0x5bd   :  { %v3892_v23 = vpop.eup %3891 }
 0x5be   :  { %v3894_v26 = vpop.eup %3893  ;;  %v2176_v36 = vmul.f32 0.5, %v3892_v23 }
 0x5bf   :  { %v3896_v0 = vpop.eup %3895 }
 0x5c0   :  { %v3898_v2 = vpop.eup %3897  ;;  %v2168_v60 = vmul.f32 0.5, %v3896_v0 }
 0x5ee   :  { %v2116_v62 = vpop.f32.mrb[60].mxu0  ;;  %v2157_v61 = vpop.f32.mrb[60].mxu1 }
 0x5ef   :  { %v2117_v7 = vadd.f32 %v2116_v62, %v7531_v32  ;;  %v2118_v57 = vpop.f32.mrb[61].mxu0  ;;  %v2159_v30 = vpop.f32.mrb[61].mxu1  ;;  %v2158_v3 = vadd.f32 %v2157_v61, %v7532_v5  ;;  %v2177_v32 = vmul.f32 0.5, %v3894_v26  ;;  %v2169_v61 = vmul.f32 0.5, %v3898_v2 }
 0x5f0   :  { %v2119_v56 = vadd.f32 %v2118_v57, %v7533_v1  ;;  %v2120_v63 = vpop.f32.mrb[62].mxu0  ;;  %v2161_v27 = vpop.f32.mrb[62].mxu1  ;;  %v2160_v34 = vadd.f32 %v2159_v30, %v7534_v55  ;;  %v2178_v5 = vadd.f32 0.5, %v2176_v36  ;;  %v2170_v1 = vadd.f32 0.5, %v2168_v60 }
 0x5f1   :  { %3899 = vtanh.f32 %v2117_v7  ;;  %v2121_v29 = vpop.f32.mrb[63].mxu0  ;;  %v2162_v28 = vpop.f32.mrb[63].mxu1  ;;  %v2182_v62 = vmul.f32 0.5, %v2158_v3  ;;  %v2179_v57 = vadd.f32 0.5, %v2177_v32  ;;  %v2171_v63 = vadd.f32 0.5, %v2169_v61  ;;  %v5717_v61 = vld [vmem:[#allocation3 + $0x20] sm:$0xff] }
 0x5f2   :  { %3901 = vtanh.f32 %v2119_v56  ;;  %v2183_v58 = vmul.f32 0.5, %v2160_v34  ;;  %v2190_v27 = vmul.f32 %v2178_v5, %v5425_v35  ;;  %v5720_v5 = vld [vmem:[#allocation3 + $0x30] sm:$0xff] }
 0x5f3   :  { %3903 = vtanh.f32 %v2182_v62  ;;  %v2191_v56 = vmul.f32 %v2179_v57, %v5427_v45  ;;  %v5723_v57 = vld [vmem:[#allocation3 + $0x68] sm:$0xff] }
 0x5f4   :  { %3905 = vtanh.f32 %v2183_v58 }
 0x5fb   :  { %v3900_v7 = vpop.eup %3899 }
 0x5fc   :  { %v3902_v30 = vpop.eup %3901  ;;  %v2192_v55 = vmul.f32 %v3900_v7, %v2170_v1  ;;  %v5726_v1 = vld [vmem:[#allocation3 + $0x78] sm:$0xff]  ;;  %v5729_v7 = vld [vmem:[#allocation3 + $0x60] sm:$0xff] }
 0x5fd   :  { %v2193_v29 = vmul.f32 %v3902_v30, %v2171_v63  ;;  %v3904_v34 = vpop.eup %3903  ;;  %v5732_v63 = vld [vmem:[#allocation3 + $0x70] sm:$0xff]  ;;  %v5735_v30 = vld [vmem:[#allocation3 + $0xa8] sm:$0xff] }
 0x5fe   :  { %v5707_v23 = vadd.f32 %v2192_v55, %v2190_v27  ;;  %v3906_v58 = vpop.eup %3905  ;;  %v2186_v60 = vmul.f32 0.5, %v3904_v34  ;;  %v5738_v27 = vld [vmem:[#allocation3 + $0xb8] sm:$0xff]  ;;  %v5741_v55 = vld [vmem:[#allocation3 + $0xa0] sm:$0xff] }
 0x5ff   :  { %v5709_v3 = vadd.f32 %v2193_v29, %v2191_v56  ;;  %v2187_v28 = vmul.f32 0.5, %v3906_v58  ;;  %v5744_v56 = vld [vmem:[#allocation3 + $0xb0] sm:$0xff]  ;;  %v5747_v29 = vld [vmem:[#allocation3 + $0xe8] sm:$0xff]  ;;  %v5750_v34 = vld [vmem:[#allocation3 + $0xf8] sm:$0xff] }
 0x600   :  { %3907 = vtanh.f32 %v5707_v23  ;;  %v2188_v26 = vadd.f32 0.5, %v2186_v60  ;;  %v5753_v58 = vld [vmem:[#allocation3 + $0xe0] sm:$0xff]  ;;  %v5756_v60 = vld [vmem:[#allocation3 + $0xf0] sm:$0xff] }
 0x601   :  { %3909 = vtanh.f32 %v5709_v3  ;;  %v2189_v2 = vadd.f32 0.5, %v2187_v28  ;;  %v5759_v28 = vld [vmem:[#allocation3 + $0x128] sm:$0xff] }
 0x60a   :  { %v3908_v0 = vpop.eup %3907 }
 0x60b   :  { %v3910_v35 = vpop.eup %3909  ;;  %v2198_v36 = vmul.f32 %v3908_v0, %v2188_v26  ;;  %v5762_v26 = vld [vmem:[#allocation3 + $0x138] sm:$0xff]  ;;  %v5765_v0 = vld [vmem:[#allocation3 + $0x120] sm:$0xff] }
 0x60c   :  { %v2199_v62 = vmul.f32 %v3910_v35, %v2189_v2  ;;  %7535 = vst [vmem:[#allocation110_spill] sm:$0xff] %v5765_v0  ;;  %v5768_v2 = vld [vmem:[#allocation3 + $0x130] sm:$0xff]  ;;  %v5771_v35 = vld [vmem:[#allocation3 + $0x168] sm:$0xff] }
 0x60d   :  { %v5713_v32 = vpack.c.bf16 %v2198_v36, %v2198_v36  ;;  %7536 = vst [vmem:[#allocation109_spill] sm:$0xff] %v5768_v2  ;;  %7537 = vst [vmem:[#allocation111_spill] sm:$0xff] %v5771_v35  ;;  %v5774_v36 = vld [vmem:[#allocation3 + $0x178] sm:$0xff] }
 0x60e   :  { %v2201_v45 = vpack.c.bf16 %v2199_v62, %v2199_v62  ;;  %7538 = vst [vmem:[#allocation112_spill] sm:$0xff] %v5774_v36  ;;  %v5777_v62 = vld [vmem:[#allocation3 + $0x160] sm:$0xff] }
 0x60f   :  { %7539 = vst [vmem:[#allocation114_spill] sm:$0xff] %v5777_v62 }
 0x610   :  { %2245 = vmatprep.mubr.bf16.mxu0 %v2201_v45  ;;  %2286 = vmatprep.mubr.bf16.mxu1 %v2201_v45 }
 0x611   :  { %2246 = vmatmul.mubr.bf16.vlgmr.msra.gmra.mrb[64].mxu0 %v5713_v32  ;;  %2287 = vmatmul.mubr.bf16.vlgmr.msra.gmra.mrb[64].mxu1 %v5713_v32 }
 0x612   :  { %2296 = vmatpush1.bf16.msra.mxu0 %v5717_v61  ;;  %2337 = vmatpush1.bf16.msra.mxu1 %v5720_v5 }
 0x613   :  { %2327 = vmatprep.mubr.bf16.mxu0 %v2201_v45  ;;  %2368 = vmatprep.mubr.bf16.mxu1 %v2201_v45  ;;  %v5780_v45 = vld [vmem:[#allocation3 + $0x170] sm:$0xff] }
 0x614   :  { %2297 = vmatprep.subr.bf16.mxu0 %v5723_v57  ;;  %2338 = vmatprep.subr.bf16.mxu1 %v5726_v1  ;;  %7540 = vst [vmem:[#allocation113_spill] sm:$0xff] %v5780_v45 }
 0x616   :  { %2298 = vmatpush1.bf16.msra.mxu0 %v5729_v7  ;;  %2339 = vmatpush1.bf16.msra.mxu1 %v5732_v63 }
 0x617   :  { %2299 = vmatprep.subr.bf16.mxu0 %v5735_v30  ;;  %2340 = vmatprep.subr.bf16.mxu1 %v5738_v27 }
 0x61a   :  { %2300 = vmatpush1.bf16.msra.mxu0 %v5741_v55  ;;  %2341 = vmatpush1.bf16.msra.mxu1 %v5744_v56 }
 0x61b   :  { %2301 = vmatprep.subr.bf16.mxu0 %v5747_v29  ;;  %2342 = vmatprep.subr.bf16.mxu1 %v5750_v34 }
 0x61e   :  { %2302 = vmatpush1.bf16.msra.mxu0 %v5753_v58  ;;  %2343 = vmatpush1.bf16.msra.mxu1 %v5756_v60 }
 0x61f   :  { %2303 = vmatprep.subr.bf16.mxu0 %v5759_v28  ;;  %2344 = vmatprep.subr.bf16.mxu1 %v5762_v26 }
 0x622   :  { %2304 = vmatpush1.bf16.msra.mxu0 %v5765_v0  ;;  %2345 = vmatpush1.bf16.msra.mxu1 %v5768_v2  ;;  %v5783_v0 = vld [vmem:[#allocation3 + $0x1a8] sm:$0xff]  ;;  %v5786_v2 = vld [vmem:[#allocation3 + $0x1b8] sm:$0xff] }
 0x623   :  { %2305 = vmatprep.subr.bf16.mxu0 %v5771_v35  ;;  %2346 = vmatprep.subr.bf16.mxu1 %v5774_v36  ;;  %7541 = vst [vmem:[#allocation115_spill] sm:$0xff] %v5783_v0  ;;  %7542 = vst [vmem:[#allocation116_spill] sm:$0xff] %v5786_v2  ;;  %v5789_v35 = vld [vmem:[#allocation3 + $0x1a0] sm:$0xff]  ;;  %v5792_v36 = vld [vmem:[#allocation3 + $0x1b0] sm:$0xff] }
 0x624   :  { %7543 = vst [vmem:[#allocation118_spill] sm:$0xff] %v5789_v35  ;;  %7544 = vst [vmem:[#allocation117_spill] sm:$0xff] %v5792_v36 }
 0x626   :  { %2306 = vmatpush1.bf16.msra.mxu0 %v5777_v62  ;;  %2347 = vmatpush1.bf16.msra.mxu1 %v5780_v45  ;;  %v5795_v62 = vld [vmem:[#allocation3 + $0x1e8] sm:$0xff]  ;;  %v5798_v45 = vld [vmem:[#allocation3 + $0x1f8] sm:$0xff] }
 0x627   :  { %2307 = vmatprep.subr.bf16.mxu0 %v5783_v0  ;;  %2348 = vmatprep.subr.bf16.mxu1 %v5786_v2  ;;  %7545 = vst [vmem:[#allocation119_spill] sm:$0xff] %v5795_v62  ;;  %7546 = vst [vmem:[#allocation26_spill] sm:$0xff] %v5798_v45  ;;  %v5801_v0 = vld [vmem:[#allocation3 + $0x1e0] sm:$0xff]  ;;  %v5804_v2 = vld [vmem:[#allocation3 + $0x1f0] sm:$0xff] }
 0x628   :  { %7547 = vst [vmem:[#allocation28_spill] sm:$0xff] %v5801_v0  ;;  %7548 = vst [vmem:[#allocation25_spill] sm:$0xff] %v5804_v2 }
 0x62a   :  { %2308 = vmatpush1.bf16.msra.mxu0 %v5789_v35  ;;  %2349 = vmatpush1.bf16.msra.mxu1 %v5792_v36  ;;  %v5807_v35 = vld [vmem:[#allocation3 + $0x228] sm:$0xff]  ;;  %v5810_v36 = vld [vmem:[#allocation3 + $0x238] sm:$0xff] }
 0x62b   :  { %2309 = vmatprep.subr.bf16.mxu0 %v5795_v62  ;;  %2350 = vmatprep.subr.bf16.mxu1 %v5798_v45  ;;  %7549 = vst [vmem:[#allocation27_spill] sm:$0xff] %v5807_v35  ;;  %7550 = vst [vmem:[#allocation57_spill] sm:$0xff] %v5810_v36  ;;  %v5813_v62 = vld [vmem:[#allocation3 + $0x220] sm:$0xff]  ;;  %v5816_v45 = vld [vmem:[#allocation3 + $0x230] sm:$0xff] }
 0x62c   :  { %7551 = vst [vmem:[#allocation58_spill] sm:$0xff] %v5813_v62  ;;  %7552 = vst [vmem:[#allocation59_spill] sm:$0xff] %v5816_v45 }
 0x62e   :  { %2310 = vmatpush1.bf16.msra.mxu0 %v5801_v0  ;;  %2351 = vmatpush1.bf16.msra.mxu1 %v5804_v2  ;;  %v5819_v0 = vld [vmem:[#allocation3 + $0x268] sm:$0xff]  ;;  %v5822_v2 = vld [vmem:[#allocation3 + $0x278] sm:$0xff] }
 0x62f   :  { %2311 = vmatprep.subr.bf16.mxu0 %v5807_v35  ;;  %2352 = vmatprep.subr.bf16.mxu1 %v5810_v36  ;;  %7553 = vst [vmem:[#allocation60_spill] sm:$0xff] %v5819_v0  ;;  %7554 = vst [vmem:[#allocation128_spill] sm:$0xff] %v5822_v2  ;;  %v5825_v35 = vld [vmem:[#allocation3 + $0x260] sm:$0xff]  ;;  %v5828_v36 = vld [vmem:[#allocation3 + $0x270] sm:$0xff] }
 0x630   :  { %7555 = vst [vmem:[#allocation130_spill] sm:$0xff] %v5825_v35  ;;  %7556 = vst [vmem:[#allocation129_spill] sm:$0xff] %v5828_v36 }
 0x632   :  { %2312 = vmatpush1.bf16.msra.mxu0 %v5813_v62  ;;  %2353 = vmatpush1.bf16.msra.mxu1 %v5816_v45  ;;  %v5831_v62 = vld [vmem:[#allocation3 + $0x2a8] sm:$0xff]  ;;  %v5834_v45 = vld [vmem:[#allocation3 + $0x2b8] sm:$0xff] }
 0x633   :  { %2313 = vmatprep.subr.bf16.mxu0 %v5819_v0  ;;  %2354 = vmatprep.subr.bf16.mxu1 %v5822_v2  ;;  %7557 = vst [vmem:[#allocation131_spill] sm:$0xff] %v5831_v62  ;;  %7558 = vst [vmem:[#allocation132_spill] sm:$0xff] %v5834_v45  ;;  %v5837_v0 = vld [vmem:[#allocation3 + $0x2a0] sm:$0xff]  ;;  %v5840_v2 = vld [vmem:[#allocation3 + $0x2b0] sm:$0xff] }
 0x634   :  { %7559 = vst [vmem:[#allocation134_spill] sm:$0xff] %v5837_v0  ;;  %7560 = vst [vmem:[#allocation133_spill] sm:$0xff] %v5840_v2 }
 0x636   :  { %2314 = vmatpush1.bf16.msra.mxu0 %v5825_v35  ;;  %2355 = vmatpush1.bf16.msra.mxu1 %v5828_v36  ;;  %v5843_v35 = vld [vmem:[#allocation3 + $0x2e8] sm:$0xff]  ;;  %v5846_v36 = vld [vmem:[#allocation3 + $0x2f8] sm:$0xff] }
 0x637   :  { %2315 = vmatprep.subr.bf16.mxu0 %v5831_v62  ;;  %2356 = vmatprep.subr.bf16.mxu1 %v5834_v45  ;;  %7561 = vst [vmem:[#allocation135_spill] sm:$0xff] %v5843_v35  ;;  %7562 = vst [vmem:[#allocation136_spill] sm:$0xff] %v5846_v36  ;;  %v5849_v62 = vld [vmem:[#allocation3 + $0x2e0] sm:$0xff]  ;;  %v5852_v45 = vld [vmem:[#allocation3 + $0x2f0] sm:$0xff] }
 0x638   :  { %7563 = vst [vmem:[#allocation138_spill] sm:$0xff] %v5849_v62  ;;  %7564 = vst [vmem:[#allocation137_spill] sm:$0xff] %v5852_v45 }
 0x63a   :  { %2316 = vmatpush1.bf16.msra.mxu0 %v5837_v0  ;;  %2357 = vmatpush1.bf16.msra.mxu1 %v5840_v2  ;;  %v5855_v0 = vld [vmem:[#allocation3 + $0x328] sm:$0xff]  ;;  %v5858_v2 = vld [vmem:[#allocation3 + $0x338] sm:$0xff] }
 0x63b   :  { %2317 = vmatprep.subr.bf16.mxu0 %v5843_v35  ;;  %2358 = vmatprep.subr.bf16.mxu1 %v5846_v36  ;;  %7565 = vst [vmem:[#allocation139_spill] sm:$0xff] %v5855_v0  ;;  %7566 = vst [vmem:[#allocation140_spill] sm:$0xff] %v5858_v2  ;;  %v5861_v35 = vld [vmem:[#allocation3 + $0x320] sm:$0xff]  ;;  %v5864_v36 = vld [vmem:[#allocation3 + $0x330] sm:$0xff] }
 0x63c   :  { %7567 = vst [vmem:[#allocation142_spill] sm:$0xff] %v5861_v35  ;;  %7568 = vst [vmem:[#allocation141_spill] sm:$0xff] %v5864_v36 }
 0x63e   :  { %2318 = vmatpush1.bf16.msra.mxu0 %v5849_v62  ;;  %2359 = vmatpush1.bf16.msra.mxu1 %v5852_v45  ;;  %v5867_v62 = vld [vmem:[#allocation3 + $0x368] sm:$0xff]  ;;  %v5870_v45 = vld [vmem:[#allocation3 + $0x378] sm:$0xff] }
 0x63f   :  { %2319 = vmatprep.subr.bf16.mxu0 %v5855_v0  ;;  %2360 = vmatprep.subr.bf16.mxu1 %v5858_v2  ;;  %7569 = vst [vmem:[#allocation143_spill] sm:$0xff] %v5867_v62  ;;  %7570 = vst [vmem:[#allocation144_spill] sm:$0xff] %v5870_v45  ;;  %v5873_v0 = vld [vmem:[#allocation3 + $0x360] sm:$0xff]  ;;  %v5876_v2 = vld [vmem:[#allocation3 + $0x370] sm:$0xff] }
 0x640   :  { %7571 = vst [vmem:[#allocation146_spill] sm:$0xff] %v5873_v0  ;;  %7572 = vst [vmem:[#allocation145_spill] sm:$0xff] %v5876_v2 }
 0x642   :  { %2320 = vmatpush1.bf16.msra.mxu0 %v5861_v35  ;;  %2361 = vmatpush1.bf16.msra.mxu1 %v5864_v36  ;;  %v5879_v35 = vld [vmem:[#allocation3 + $0x3a8] sm:$0xff]  ;;  %v5882_v36 = vld [vmem:[#allocation3 + $0x3b8] sm:$0xff] }
 0x643   :  { %2321 = vmatprep.subr.bf16.mxu0 %v5867_v62  ;;  %2362 = vmatprep.subr.bf16.mxu1 %v5870_v45  ;;  %7573 = vst [vmem:[#allocation147_spill] sm:$0xff] %v5879_v35  ;;  %7574 = vst [vmem:[#allocation148_spill] sm:$0xff] %v5882_v36  ;;  %v5885_v62 = vld [vmem:[#allocation3 + $0x3a0] sm:$0xff]  ;;  %v5888_v45 = vld [vmem:[#allocation3 + $0x3b0] sm:$0xff] }
 0x644   :  { %7575 = vst [vmem:[#allocation150_spill] sm:$0xff] %v5888_v45 }
 0x646   :  { %2322 = vmatpush1.bf16.msra.mxu0 %v5873_v0  ;;  %2363 = vmatpush1.bf16.msra.mxu1 %v5876_v2  ;;  %v5891_v0 = vld [vmem:[#allocation3 + $0x3e8] sm:$0xff]  ;;  %v5894_v2 = vld [vmem:[#allocation3 + $0x3f8] sm:$0xff] }
 0x647   :  { %2323 = vmatprep.subr.bf16.mxu0 %v5879_v35  ;;  %2364 = vmatprep.subr.bf16.mxu1 %v5882_v36  ;;  %7576 = vst [vmem:[#allocation149_spill] sm:$0xff] %v5891_v0  ;;  %7577 = vst [vmem:[#allocation151_spill] sm:$0xff] %v5894_v2  ;;  %v5897_v35 = vld [vmem:[#allocation3 + $0x3e0] sm:$0xff]  ;;  %v5900_v36 = vld [vmem:[#allocation3 + $0x3f0] sm:$0xff] }
 0x648   :  { %7578 = vst [vmem:[#allocation152_spill] sm:$0xff] %v5897_v35  ;;  %7579 = vst [vmem:[#allocation154_spill] sm:$0xff] %v5900_v36 }
 0x64a   :  { %2324 = vmatpush1.bf16.msra.mxu0 %v5885_v62  ;;  %2365 = vmatpush1.bf16.msra.mxu1 %v5888_v45 }
 0x64b   :  { %2325 = vmatprep.subr.bf16.mxu0 %v5891_v0  ;;  %2366 = vmatprep.subr.bf16.mxu1 %v5894_v2 }
 0x64e   :  { %2326 = vmatpush1.bf16.msra.mxu0 %v5897_v35  ;;  %2367 = vmatpush1.bf16.msra.mxu1 %v5900_v36 }
 0x64f   :  { %2426 = vmatprep.subr.bf16.mxu0 %v5497_v20  ;;  %2467 = vmatprep.subr.bf16.mxu1 %v5500_v15 }
 0x651   :  { %2328 = vmatmul.mubr.bf16.vlgmr.msra.gmra.mrb[68].mxu0 %v5713_v32  ;;  %2369 = vmatmul.mubr.bf16.vlgmr.msra.gmra.mrb[68].mxu1 %v5713_v32  ;;  %v7580_v32 = vld [vmem:[#allocation168_spill] sm:$0xff] }
 0x652   :  { %2427 = vmatpush1.bf16.msra.mxu0 %v5505_v10  ;;  %2468 = vmatpush1.bf16.msra.mxu1 %v5508_v9 }
 0x653   :  { %2428 = vmatprep.subr.bf16.mxu0 %v5511_v12  ;;  %2469 = vmatprep.subr.bf16.mxu1 %v5514_v13 }
 0x656   :  { %2429 = vmatpush1.bf16.msra.mxu0 %v5517_v40  ;;  %2470 = vmatpush1.bf16.msra.mxu1 %v5520_v41 }
 0x657   :  { %2430 = vmatprep.subr.bf16.mxu0 %v5523_v42  ;;  %2471 = vmatprep.subr.bf16.mxu1 %v5526_v43 }
 0x65a   :  { %2431 = vmatpush1.bf16.msra.mxu0 %v5529_v11  ;;  %2472 = vmatpush1.bf16.msra.mxu1 %v5532_v21 }
 0x65b   :  { %2432 = vmatprep.subr.bf16.mxu0 %v5535_v54  ;;  %2473 = vmatprep.subr.bf16.mxu1 %v5538_v46 }
 0x65e   :  { %2433 = vmatpush1.bf16.msra.mxu0 %v5541_v31  ;;  %2474 = vmatpush1.bf16.msra.mxu1 %v5544_v17 }
 0x65f   :  { %2434 = vmatprep.subr.bf16.mxu0 %v5547_v47  ;;  %2475 = vmatprep.subr.bf16.mxu1 %v5550_v48 }
 0x662   :  { %2435 = vmatpush1.bf16.msra.mxu0 %v5553_v4  ;;  %2476 = vmatpush1.bf16.msra.mxu1 %v5556_v52 }
 0x663   :  { %2436 = vmatprep.subr.bf16.mxu0 %v5559_v6  ;;  %2477 = vmatprep.subr.bf16.mxu1 %v5562_v8 }
 0x666   :  { %2437 = vmatpush1.bf16.msra.mxu0 %v5565_v33  ;;  %2478 = vmatpush1.bf16.msra.mxu1 %v5568_v44  ;;  %v7609_v44 = vld [vmem:[#allocation33_spill] sm:$0xff]  ;;  %v7610_v33 = vld [vmem:[#allocation35_spill] sm:$0xff] }
 0x667   :  { %2438 = vmatprep.subr.bf16.mxu0 %v5571_v39  ;;  %2479 = vmatprep.subr.bf16.mxu1 %v5574_v37  ;;  %v7607_v37 = vld [vmem:[#allocation34_spill] sm:$0xff]  ;;  %v7608_v39 = vld [vmem:[#allocation36_spill] sm:$0xff] }
 0x66a   :  { %2439 = vmatpush1.bf16.msra.mxu0 %v5577_v16  ;;  %2480 = vmatpush1.bf16.msra.mxu1 %v5580_v38 }
 0x66b   :  { %2440 = vmatprep.subr.bf16.mxu0 %v5583_v22  ;;  %2481 = vmatprep.subr.bf16.mxu1 %v5586_v53  ;;  %v7581_v53 = vld [vmem:[#allocation170_spill] sm:$0xff] }
 0x66e   :  { %2441 = vmatpush1.bf16.msra.mxu0 %v5589_v49  ;;  %2482 = vmatpush1.bf16.msra.mxu1 %v5592_v50  ;;  %v7582_v49 = vld [vmem:[#allocation169_spill] sm:$0xff]  ;;  %v7583_v50 = vld [vmem:[#allocation171_spill] sm:$0xff] }
 0x66f   :  { %2442 = vmatprep.subr.bf16.mxu0 %v5595_v59  ;;  %2483 = vmatprep.subr.bf16.mxu1 %v5598_v19  ;;  %v7584_v59 = vld [vmem:[#allocation172_spill] sm:$0xff]  ;;  %v7585_v19 = vld [vmem:[#allocation87_spill] sm:$0xff] }
 0x672   :  { %2443 = vmatpush1.bf16.msra.mxu0 %v5601_v24  ;;  %2484 = vmatpush1.bf16.msra.mxu1 %v5604_v14  ;;  %v7586_v24 = vld [vmem:[#allocation88_spill] sm:$0xff]  ;;  %v7587_v14 = vld [vmem:[#allocation90_spill] sm:$0xff] }
 0x673   :  { %2444 = vmatprep.subr.bf16.mxu0 %v5607_v25  ;;  %2485 = vmatprep.subr.bf16.mxu1 %v5610_v51  ;;  %v7588_v25 = vld [vmem:[#allocation89_spill] sm:$0xff]  ;;  %v7589_v51 = vld [vmem:[#allocation91_spill] sm:$0xff] }
 0x676   :  { %2445 = vmatpush1.bf16.msra.mxu0 %v5613_v18  ;;  %2486 = vmatpush1.bf16.msra.mxu1 %v7580_v32  ;;  %v7590_v18 = vld [vmem:[#allocation92_spill] sm:$0xff]  ;;  %v7591_v32 = vld [vmem:[#allocation94_spill] sm:$0xff] }
 0x677   :  { %2446 = vmatprep.subr.bf16.mxu0 %v7581_v53  ;;  %2487 = vmatprep.subr.bf16.mxu1 %v7582_v49  ;;  %v7592_v53 = vld [vmem:[#allocation93_spill] sm:$0xff]  ;;  %v7593_v49 = vld [vmem:[#allocation95_spill] sm:$0xff] }
 0x67a   :  { %2447 = vmatpush1.bf16.msra.mxu0 %v7583_v50  ;;  %2488 = vmatpush1.bf16.msra.mxu1 %v7584_v59  ;;  %v7594_v50 = vld [vmem:[#allocation96_spill] sm:$0xff]  ;;  %v7595_v59 = vld [vmem:[#allocation98_spill] sm:$0xff] }
 0x67b   :  { %2448 = vmatprep.subr.bf16.mxu0 %v7585_v19  ;;  %2489 = vmatprep.subr.bf16.mxu1 %v7586_v24  ;;  %v7596_v19 = vld [vmem:[#allocation97_spill] sm:$0xff]  ;;  %v7597_v24 = vld [vmem:[#allocation99_spill] sm:$0xff] }
 0x67e   :  { %2449 = vmatpush1.bf16.msra.mxu0 %v7587_v14  ;;  %2490 = vmatpush1.bf16.msra.mxu1 %v7588_v25  ;;  %v7598_v14 = vld [vmem:[#allocation100_spill] sm:$0xff]  ;;  %v7599_v25 = vld [vmem:[#allocation102_spill] sm:$0xff] }
 0x67f   :  { %2450 = vmatprep.subr.bf16.mxu0 %v7589_v51  ;;  %2491 = vmatprep.subr.bf16.mxu1 %v7590_v18  ;;  %v7600_v51 = vld [vmem:[#allocation101_spill] sm:$0xff]  ;;  %v7601_v18 = vld [vmem:[#allocation103_spill] sm:$0xff] }
 0x682   :  { %2451 = vmatpush1.bf16.msra.mxu0 %v7591_v32  ;;  %2492 = vmatpush1.bf16.msra.mxu1 %v7592_v53  ;;  %v7602_v32 = vld [vmem:[#allocation104_spill] sm:$0xff]  ;;  %v7603_v53 = vld [vmem:[#allocation106_spill] sm:$0xff] }
 0x683   :  { %2452 = vmatprep.subr.bf16.mxu0 %v7593_v49  ;;  %2493 = vmatprep.subr.bf16.mxu1 %v7594_v50  ;;  %v7604_v49 = vld [vmem:[#allocation105_spill] sm:$0xff]  ;;  %v7605_v50 = vld [vmem:[#allocation107_spill] sm:$0xff] }
 0x686   :  { %2453 = vmatpush1.bf16.msra.mxu0 %v7595_v59  ;;  %2494 = vmatpush1.bf16.msra.mxu1 %v7596_v19  ;;  %v7606_v59 = vld [vmem:[#allocation108_spill] sm:$0xff] }
 0x687   :  { %2454 = vmatprep.subr.bf16.mxu0 %v7597_v24  ;;  %2495 = vmatprep.subr.bf16.mxu1 %v7598_v14 }
 0x68a   :  { %2455 = vmatpush1.bf16.msra.mxu0 %v7599_v25  ;;  %2496 = vmatpush1.bf16.msra.mxu1 %v7600_v51 }
 0x68b   :  { %2456 = vmatprep.subr.bf16.mxu0 %v7601_v18  ;;  %2497 = vmatprep.subr.bf16.mxu1 %v7602_v32 }
 0x68e   :  { %2457 = vmatpush1.bf16.msra.mxu0 %v7603_v53  ;;  %2498 = vmatpush1.bf16.msra.mxu1 %v7604_v49 }
 0x68f   :  { %2508 = vmatprep.subr.bf16.mxu0 %v7605_v50  ;;  %2549 = vmatprep.subr.bf16.mxu1 %v7606_v59 }
 0x6e4   :  { %v2247_v19 = vpop.f32.mrb[64].mxu0  ;;  %v2288_v24 = vpop.f32.mrb[64].mxu1 }
 0x6e5   :  { %v2249_v22 = vpop.f32.mrb[65].mxu0  ;;  %v2290_v14 = vpop.f32.mrb[65].mxu1  ;;  %v2289_v18 = vadd.f32 %v2288_v24, %v7607_v37  ;;  %v2248_v53 = vadd.f32 %v2247_v19, %v7609_v44  ;;  %v7612_v24 = vld [vmem:[#allocation66_spill] sm:$0xff] }
 0x6e6   :  { %v2251_v38 = vpop.f32.mrb[66].mxu0  ;;  %v2292_v25 = vpop.f32.mrb[66].mxu1  ;;  %v2291_v32 = vadd.f32 %v2290_v14, %v7608_v39  ;;  %v2250_v49 = vadd.f32 %v2249_v22, %v7610_v33  ;;  %v7613_v14 = vld [vmem:[#allocation67_spill] sm:$0xff] }
 0x6e7   :  { %v2252_v16 = vpop.f32.mrb[67].mxu0  ;;  %v2293_v51 = vpop.f32.mrb[67].mxu1  ;;  %v2385_v8 = vmul.f32 0.5, %v2289_v18  ;;  %v2377_v6 = vmul.f32 0.5, %v2248_v53  ;;  %v7614_v53 = vld [vmem:[#allocation68_spill] sm:$0xff] }
 0x6e8   :  { %v2386_v50 = vmul.f32 0.5, %v2291_v32  ;;  %v2378_v59 = vmul.f32 0.5, %v2250_v49  ;;  %v7611_v16 = vld [vmem:[#allocation65_spill] sm:$0xff] }
 0x6e9   :  { %3911 = vtanh.f32 %v2385_v8 }
 0x6ea   :  { %3913 = vtanh.f32 %v2386_v50 }
 0x6eb   :  { %3915 = vtanh.f32 %v2377_v6 }
 0x6ec   :  { %3917 = vtanh.f32 %v2378_v59 }
 0x6f3   :  { %v3912_v22 = vpop.eup %3911 }
 0x6f4   :  { %v3914_v6 = vpop.eup %3913  ;;  %v2389_v32 = vmul.f32 0.5, %v3912_v22 }
 0x6f5   :  { %v3916_v59 = vpop.eup %3915 }
 0x6f6   :  { %v3918_v18 = vpop.eup %3917  ;;  %v2381_v48 = vmul.f32 0.5, %v3916_v59 }
 0x724   :  { %v2329_v38 = vpop.f32.mrb[68].mxu0  ;;  %v2370_v25 = vpop.f32.mrb[68].mxu1 }
 0x725   :  { %v2330_v51 = vadd.f32 %v2329_v38, %v7611_v16  ;;  %v2331_v52 = vpop.f32.mrb[69].mxu0  ;;  %v2372_v37 = vpop.f32.mrb[69].mxu1  ;;  %v2371_v39 = vadd.f32 %v2370_v25, %v7612_v24  ;;  %v2390_v16 = vmul.f32 0.5, %v3914_v6  ;;  %v2382_v25 = vmul.f32 0.5, %v3918_v18 }
 0x726   :  { %v2332_v44 = vadd.f32 %v2331_v52, %v7613_v14  ;;  %v2333_v19 = vpop.f32.mrb[70].mxu0  ;;  %v2374_v33 = vpop.f32.mrb[70].mxu1  ;;  %v2373_v49 = vadd.f32 %v2372_v37, %v7614_v53  ;;  %v2391_v24 = vadd.f32 0.5, %v2389_v32  ;;  %v2383_v14 = vadd.f32 0.5, %v2381_v48 }
 0x727   :  { %3919 = vtanh.f32 %v2330_v51  ;;  %v2334_v8 = vpop.f32.mrb[71].mxu0  ;;  %v2375_v50 = vpop.f32.mrb[71].mxu1  ;;  %v2395_v38 = vmul.f32 0.5, %v2371_v39  ;;  %v2392_v52 = vadd.f32 0.5, %v2390_v16  ;;  %v2384_v19 = vadd.f32 0.5, %v2382_v25  ;;  %v7615_v25 = vld [vmem:[#allocation110_spill] sm:$0xff] }
 0x728   :  { %3921 = vtanh.f32 %v2332_v44  ;;  %v2396_v4 = vmul.f32 0.5, %v2373_v49  ;;  %v2403_v33 = vmul.f32 %v2391_v24, %v5707_v23  ;;  %v7616_v24 = vld [vmem:[#allocation109_spill] sm:$0xff] }
 0x729   :  { %3923 = vtanh.f32 %v2395_v38  ;;  %v2404_v44 = vmul.f32 %v2392_v52, %v5709_v3  ;;  %v7617_v52 = vld [vmem:[#allocation111_spill] sm:$0xff] }
 0x72a   :  { %3925 = vtanh.f32 %v2396_v4 }
 0x731   :  { %v3920_v51 = vpop.eup %3919 }
 0x732   :  { %v3922_v37 = vpop.eup %3921  ;;  %v2405_v53 = vmul.f32 %v3920_v51, %v2383_v14  ;;  %v7618_v14 = vld [vmem:[#allocation112_spill] sm:$0xff]  ;;  %v7619_v51 = vld [vmem:[#allocation114_spill] sm:$0xff] }
 0x733   :  { %v2406_v8 = vmul.f32 %v3922_v37, %v2384_v19  ;;  %v3924_v49 = vpop.eup %3923  ;;  %v7620_v19 = vld [vmem:[#allocation113_spill] sm:$0xff]  ;;  %v7621_v37 = vld [vmem:[#allocation115_spill] sm:$0xff] }
 0x734   :  { %v5981_v22 = vadd.f32 %v2405_v53, %v2403_v33  ;;  %v3926_v4 = vpop.eup %3925  ;;  %v2399_v48 = vmul.f32 0.5, %v3924_v49  ;;  %v7622_v33 = vld [vmem:[#allocation116_spill] sm:$0xff]  ;;  %v7623_v53 = vld [vmem:[#allocation118_spill] sm:$0xff] }
 0x735   :  { %v5983_v39 = vadd.f32 %v2406_v8, %v2404_v44  ;;  %v2400_v50 = vmul.f32 0.5, %v3926_v4  ;;  %v7624_v44 = vld [vmem:[#allocation117_spill] sm:$0xff]  ;;  %v7625_v8 = vld [vmem:[#allocation119_spill] sm:$0xff]  ;;  %v7626_v49 = vld [vmem:[#allocation26_spill] sm:$0xff] }
 0x736   :  { %3927 = vtanh.f32 %v5981_v22  ;;  %v2401_v6 = vadd.f32 0.5, %v2399_v48  ;;  %v7627_v4 = vld [vmem:[#allocation28_spill] sm:$0xff]  ;;  %v7628_v48 = vld [vmem:[#allocation25_spill] sm:$0xff] }
 0x737   :  { %3929 = vtanh.f32 %v5983_v39  ;;  %v2402_v18 = vadd.f32 0.5, %v2400_v50  ;;  %v7629_v50 = vld [vmem:[#allocation27_spill] sm:$0xff] }
 0x740   :  { %v3928_v59 = vpop.eup %3927 }
 0x741   :  { %v3930_v23 = vpop.eup %3929  ;;  %v2411_v32 = vmul.f32 %v3928_v59, %v2401_v6  ;;  %v7630_v6 = vld [vmem:[#allocation57_spill] sm:$0xff]  ;;  %v7631_v59 = vld [vmem:[#allocation58_spill] sm:$0xff] }
 0x742   :  { %v2412_v38 = vmul.f32 %v3930_v23, %v2402_v18  ;;  %v7632_v18 = vld [vmem:[#allocation59_spill] sm:$0xff]  ;;  %v7633_v23 = vld [vmem:[#allocation60_spill] sm:$0xff] }
 0x743   :  { %v5987_v16 = vpack.c.bf16 %v2411_v32, %v2411_v32  ;;  %v7634_v32 = vld [vmem:[#allocation128_spill] sm:$0xff] }
 0x744   :  { %v2414_v3 = vpack.c.bf16 %v2412_v38, %v2412_v38  ;;  %v7635_v38 = vld [vmem:[#allocation130_spill] sm:$0xff] }
 0x746   :  { %2458 = vmatprep.mubr.bf16.mxu0 %v2414_v3  ;;  %2499 = vmatprep.mubr.bf16.mxu1 %v2414_v3 }
 0x747   :  { %2459 = vmatmul.mubr.bf16.vlgmr.msra.gmra.mrb[72].mxu0 %v5987_v16  ;;  %2500 = vmatmul.mubr.bf16.vlgmr.msra.gmra.mrb[72].mxu1 %v5987_v16 }
 0x748   :  { %2509 = vmatpush1.bf16.msra.mxu0 %v5717_v61  ;;  %2550 = vmatpush1.bf16.msra.mxu1 %v5720_v5 }
 0x749   :  { %2540 = vmatprep.mubr.bf16.mxu0 %v2414_v3  ;;  %2581 = vmatprep.mubr.bf16.mxu1 %v2414_v3  ;;  %v7636_v3 = vld [vmem:[#allocation129_spill] sm:$0xff] }
 0x74a   :  { %2510 = vmatprep.subr.bf16.mxu0 %v5723_v57  ;;  %2551 = vmatprep.subr.bf16.mxu1 %v5726_v1 }
 0x74c   :  { %2511 = vmatpush1.bf16.msra.mxu0 %v5729_v7  ;;  %2552 = vmatpush1.bf16.msra.mxu1 %v5732_v63 }
 0x74d   :  { %2512 = vmatprep.subr.bf16.mxu0 %v5735_v30  ;;  %2553 = vmatprep.subr.bf16.mxu1 %v5738_v27 }
 0x750   :  { %2513 = vmatpush1.bf16.msra.mxu0 %v5741_v55  ;;  %2554 = vmatpush1.bf16.msra.mxu1 %v5744_v56 }
 0x751   :  { %2514 = vmatprep.subr.bf16.mxu0 %v5747_v29  ;;  %2555 = vmatprep.subr.bf16.mxu1 %v5750_v34 }
 0x754   :  { %2515 = vmatpush1.bf16.msra.mxu0 %v5753_v58  ;;  %2556 = vmatpush1.bf16.msra.mxu1 %v5756_v60 }
 0x755   :  { %2516 = vmatprep.subr.bf16.mxu0 %v5759_v28  ;;  %2557 = vmatprep.subr.bf16.mxu1 %v5762_v26 }
 0x758   :  { %2517 = vmatpush1.bf16.msra.mxu0 %v7615_v25  ;;  %2558 = vmatpush1.bf16.msra.mxu1 %v7616_v24 }
 0x759   :  { %2518 = vmatprep.subr.bf16.mxu0 %v7617_v52  ;;  %2559 = vmatprep.subr.bf16.mxu1 %v7618_v14 }
 0x75c   :  { %2519 = vmatpush1.bf16.msra.mxu0 %v7619_v51  ;;  %2560 = vmatpush1.bf16.msra.mxu1 %v7620_v19 }
 0x75d   :  { %2520 = vmatprep.subr.bf16.mxu0 %v7621_v37  ;;  %2561 = vmatprep.subr.bf16.mxu1 %v7622_v33 }
 0x760   :  { %2521 = vmatpush1.bf16.msra.mxu0 %v7623_v53  ;;  %2562 = vmatpush1.bf16.msra.mxu1 %v7624_v44 }
 0x761   :  { %2522 = vmatprep.subr.bf16.mxu0 %v7625_v8  ;;  %2563 = vmatprep.subr.bf16.mxu1 %v7626_v49  ;;  %v7637_v49 = vld [vmem:[#allocation131_spill] sm:$0xff] }
 0x764   :  { %2523 = vmatpush1.bf16.msra.mxu0 %v7627_v4  ;;  %2564 = vmatpush1.bf16.msra.mxu1 %v7628_v48  ;;  %v7638_v4 = vld [vmem:[#allocation132_spill] sm:$0xff]  ;;  %v7639_v48 = vld [vmem:[#allocation134_spill] sm:$0xff] }
 0x765   :  { %2524 = vmatprep.subr.bf16.mxu0 %v7629_v50  ;;  %2565 = vmatprep.subr.bf16.mxu1 %v7630_v6  ;;  %v7640_v50 = vld [vmem:[#allocation133_spill] sm:$0xff]  ;;  %v7641_v6 = vld [vmem:[#allocation135_spill] sm:$0xff] }
 0x768   :  { %2525 = vmatpush1.bf16.msra.mxu0 %v7631_v59  ;;  %2566 = vmatpush1.bf16.msra.mxu1 %v7632_v18  ;;  %v7642_v59 = vld [vmem:[#allocation136_spill] sm:$0xff]  ;;  %v7643_v18 = vld [vmem:[#allocation138_spill] sm:$0xff] }
 0x769   :  { %2526 = vmatprep.subr.bf16.mxu0 %v7633_v23  ;;  %2567 = vmatprep.subr.bf16.mxu1 %v7634_v32  ;;  %v7644_v23 = vld [vmem:[#allocation137_spill] sm:$0xff]  ;;  %v7645_v32 = vld [vmem:[#allocation139_spill] sm:$0xff] }
 0x76c   :  { %2527 = vmatpush1.bf16.msra.mxu0 %v7635_v38  ;;  %2568 = vmatpush1.bf16.msra.mxu1 %v7636_v3  ;;  %v7646_v38 = vld [vmem:[#allocation140_spill] sm:$0xff]  ;;  %v7647_v3 = vld [vmem:[#allocation142_spill] sm:$0xff] }
 0x76d   :  { %2528 = vmatprep.subr.bf16.mxu0 %v7637_v49  ;;  %2569 = vmatprep.subr.bf16.mxu1 %v7638_v4  ;;  %v7648_v49 = vld [vmem:[#allocation141_spill] sm:$0xff]  ;;  %v7649_v4 = vld [vmem:[#allocation143_spill] sm:$0xff] }
 0x770   :  { %2529 = vmatpush1.bf16.msra.mxu0 %v7639_v48  ;;  %2570 = vmatpush1.bf16.msra.mxu1 %v7640_v50  ;;  %v7650_v48 = vld [vmem:[#allocation144_spill] sm:$0xff]  ;;  %v7651_v50 = vld [vmem:[#allocation146_spill] sm:$0xff] }
 0x771   :  { %2530 = vmatprep.subr.bf16.mxu0 %v7641_v6  ;;  %2571 = vmatprep.subr.bf16.mxu1 %v7642_v59  ;;  %v7652_v6 = vld [vmem:[#allocation145_spill] sm:$0xff]  ;;  %v7653_v59 = vld [vmem:[#allocation147_spill] sm:$0xff] }
 0x774   :  { %2531 = vmatpush1.bf16.msra.mxu0 %v7643_v18  ;;  %2572 = vmatpush1.bf16.msra.mxu1 %v7644_v23  ;;  %v7654_v18 = vld [vmem:[#allocation148_spill] sm:$0xff] }
 0x775   :  { %2532 = vmatprep.subr.bf16.mxu0 %v7645_v32  ;;  %2573 = vmatprep.subr.bf16.mxu1 %v7646_v38 }
 0x778   :  { %2533 = vmatpush1.bf16.msra.mxu0 %v7647_v3  ;;  %2574 = vmatpush1.bf16.msra.mxu1 %v7648_v49 }
 0x779   :  { %2534 = vmatprep.subr.bf16.mxu0 %v7649_v4  ;;  %2575 = vmatprep.subr.bf16.mxu1 %v7650_v48 }
 0x77c   :  { %2535 = vmatpush1.bf16.msra.mxu0 %v7651_v50  ;;  %2576 = vmatpush1.bf16.msra.mxu1 %v7652_v6 }
 0x77d   :  { %2536 = vmatprep.subr.bf16.mxu0 %v7653_v59  ;;  %2577 = vmatprep.subr.bf16.mxu1 %v7654_v18 }
 0x780   :  { %2537 = vmatpush1.bf16.msra.mxu0 %v5885_v62  ;;  %2578 = vmatpush1.bf16.msra.mxu1 %v5888_v45 }
 0x781   :  { %2538 = vmatprep.subr.bf16.mxu0 %v5891_v0  ;;  %2579 = vmatprep.subr.bf16.mxu1 %v5894_v2 }
 0x784   :  { %2539 = vmatpush1.bf16.msra.mxu0 %v5897_v35  ;;  %2580 = vmatpush1.bf16.msra.mxu1 %v5900_v36 }
 0x785   :  { %2639 = vmatprep.subr.bf16.mxu0 %v5497_v20  ;;  %2680 = vmatprep.subr.bf16.mxu1 %v5500_v15  ;;  %v7655_v20 = vld [vmem:[#allocation22_spill] sm:$0xff]  ;;  %v7656_v15 = vld [vmem:[#allocation24_spill] sm:$0xff] }
 0x787   :  { %2541 = vmatmul.mubr.bf16.vlgmr.msra.gmra.mrb[76].mxu0 %v5987_v16  ;;  %2582 = vmatmul.mubr.bf16.vlgmr.msra.gmra.mrb[76].mxu1 %v5987_v16  ;;  %v7672_v16 = vld [vmem:[#allocation161_spill] sm:$0xff] }
 0x788   :  { %2640 = vmatpush1.bf16.msra.mxu0 %v5505_v10  ;;  %2681 = vmatpush1.bf16.msra.mxu1 %v5508_v9  ;;  %v7657_v10 = vld [vmem:[#allocation21_spill] sm:$0xff]  ;;  %v7658_v9 = vld [vmem:[#allocation23_spill] sm:$0xff] }
 0x789   :  { %2641 = vmatprep.subr.bf16.mxu0 %v5511_v12  ;;  %2682 = vmatprep.subr.bf16.mxu1 %v5514_v13  ;;  %v7659_v12 = vld [vmem:[#allocation53_spill] sm:$0xff]  ;;  %v7660_v13 = vld [vmem:[#allocation55_spill] sm:$0xff] }
 0x78c   :  { %2642 = vmatpush1.bf16.msra.mxu0 %v5517_v40  ;;  %2683 = vmatpush1.bf16.msra.mxu1 %v5520_v41  ;;  %v7661_v40 = vld [vmem:[#allocation54_spill] sm:$0xff]  ;;  %v7662_v41 = vld [vmem:[#allocation56_spill] sm:$0xff] }
 0x78d   :  { %2643 = vmatprep.subr.bf16.mxu0 %v5523_v42  ;;  %2684 = vmatprep.subr.bf16.mxu1 %v5526_v43  ;;  %v7663_v42 = vld [vmem:[#allocation120_spill] sm:$0xff]  ;;  %v7664_v43 = vld [vmem:[#allocation122_spill] sm:$0xff] }
 0x790   :  { %2644 = vmatpush1.bf16.msra.mxu0 %v5529_v11  ;;  %2685 = vmatpush1.bf16.msra.mxu1 %v5532_v21  ;;  %v7665_v11 = vld [vmem:[#allocation121_spill] sm:$0xff]  ;;  %v7666_v21 = vld [vmem:[#allocation123_spill] sm:$0xff] }
 0x791   :  { %2645 = vmatprep.subr.bf16.mxu0 %v5535_v54  ;;  %2686 = vmatprep.subr.bf16.mxu1 %v5538_v46  ;;  %v7667_v54 = vld [vmem:[#allocation124_spill] sm:$0xff]  ;;  %v7668_v46 = vld [vmem:[#allocation126_spill] sm:$0xff] }
 0x794   :  { %2646 = vmatpush1.bf16.msra.mxu0 %v5541_v31  ;;  %2687 = vmatpush1.bf16.msra.mxu1 %v5544_v17  ;;  %v7669_v31 = vld [vmem:[#allocation125_spill] sm:$0xff]  ;;  %v7670_v17 = vld [vmem:[#allocation127_spill] sm:$0xff] }
 0x795   :  { %2647 = vmatprep.subr.bf16.mxu0 %v5547_v47  ;;  %2688 = vmatprep.subr.bf16.mxu1 %v7655_v20  ;;  %v7671_v47 = vld [vmem:[#allocation162_spill] sm:$0xff]  ;;  %v7673_v20 = vld [vmem:[#allocation164_spill] sm:$0xff] }
 0x798   :  { %2648 = vmatpush1.bf16.msra.mxu0 %v7656_v15  ;;  %2689 = vmatpush1.bf16.msra.mxu1 %v7657_v10  ;;  %v7674_v15 = vld [vmem:[#allocation166_spill] sm:$0xff]  ;;  %v7675_v10 = vld [vmem:[#allocation165_spill] sm:$0xff] }
 0x799   :  { %2649 = vmatprep.subr.bf16.mxu0 %v7658_v9  ;;  %2690 = vmatprep.subr.bf16.mxu1 %v7659_v12  ;;  %v7676_v9 = vld [vmem:[#allocation167_spill] sm:$0xff]  ;;  %v7677_v12 = vld [vmem:[#allocation168_spill] sm:$0xff] }
 0x79c   :  { %2650 = vmatpush1.bf16.msra.mxu0 %v7660_v13  ;;  %2691 = vmatpush1.bf16.msra.mxu1 %v7661_v40  ;;  %v7678_v13 = vld [vmem:[#allocation170_spill] sm:$0xff]  ;;  %v7679_v40 = vld [vmem:[#allocation169_spill] sm:$0xff] }
 0x79d   :  { %2651 = vmatprep.subr.bf16.mxu0 %v7662_v41  ;;  %2692 = vmatprep.subr.bf16.mxu1 %v7663_v42  ;;  %v7680_v41 = vld [vmem:[#allocation171_spill] sm:$0xff]  ;;  %v7681_v42 = vld [vmem:[#allocation172_spill] sm:$0xff] }
 0x7a0   :  { %2652 = vmatpush1.bf16.msra.mxu0 %v7664_v43  ;;  %2693 = vmatpush1.bf16.msra.mxu1 %v7665_v11  ;;  %v7682_v43 = vld [vmem:[#allocation87_spill] sm:$0xff]  ;;  %v7683_v11 = vld [vmem:[#allocation88_spill] sm:$0xff] }
 0x7a1   :  { %2653 = vmatprep.subr.bf16.mxu0 %v7666_v21  ;;  %2694 = vmatprep.subr.bf16.mxu1 %v7667_v54  ;;  %v7684_v21 = vld [vmem:[#allocation90_spill] sm:$0xff]  ;;  %v7685_v54 = vld [vmem:[#allocation89_spill] sm:$0xff] }
 0x7a4   :  { %2654 = vmatpush1.bf16.msra.mxu0 %v7668_v46  ;;  %2695 = vmatpush1.bf16.msra.mxu1 %v7669_v31  ;;  %v7686_v46 = vld [vmem:[#allocation91_spill] sm:$0xff]  ;;  %v7687_v31 = vld [vmem:[#allocation92_spill] sm:$0xff] }
 0x7a5   :  { %2655 = vmatprep.subr.bf16.mxu0 %v7670_v17  ;;  %2696 = vmatprep.subr.bf16.mxu1 %v7671_v47  ;;  %v7688_v17 = vld [vmem:[#allocation94_spill] sm:$0xff]  ;;  %v7689_v47 = vld [vmem:[#allocation93_spill] sm:$0xff] }
 0x7a8   :  { %2656 = vmatpush1.bf16.msra.mxu0 %v7672_v16  ;;  %2697 = vmatpush1.bf16.msra.mxu1 %v7673_v20  ;;  %v7690_v16 = vld [vmem:[#allocation95_spill] sm:$0xff]  ;;  %v7691_v20 = vld [vmem:[#allocation96_spill] sm:$0xff] }
 0x7a9   :  { %2657 = vmatprep.subr.bf16.mxu0 %v7674_v15  ;;  %2698 = vmatprep.subr.bf16.mxu1 %v7675_v10  ;;  %v7692_v15 = vld [vmem:[#allocation98_spill] sm:$0xff]  ;;  %v7693_v10 = vld [vmem:[#allocation97_spill] sm:$0xff] }
 0x7ac   :  { %2658 = vmatpush1.bf16.msra.mxu0 %v7676_v9  ;;  %2699 = vmatpush1.bf16.msra.mxu1 %v7677_v12  ;;  %v7694_v9 = vld [vmem:[#allocation99_spill] sm:$0xff]  ;;  %v7695_v12 = vld [vmem:[#allocation100_spill] sm:$0xff] }
 0x7ad   :  { %2659 = vmatprep.subr.bf16.mxu0 %v7678_v13  ;;  %2700 = vmatprep.subr.bf16.mxu1 %v7679_v40  ;;  %v7696_v13 = vld [vmem:[#allocation102_spill] sm:$0xff]  ;;  %v7697_v40 = vld [vmem:[#allocation101_spill] sm:$0xff] }
 0x7b0   :  { %2660 = vmatpush1.bf16.msra.mxu0 %v7680_v41  ;;  %2701 = vmatpush1.bf16.msra.mxu1 %v7681_v42  ;;  %v7698_v41 = vld [vmem:[#allocation103_spill] sm:$0xff]  ;;  %v7699_v42 = vld [vmem:[#allocation104_spill] sm:$0xff] }
 0x7b1   :  { %2661 = vmatprep.subr.bf16.mxu0 %v7682_v43  ;;  %2702 = vmatprep.subr.bf16.mxu1 %v7683_v11  ;;  %v7700_v43 = vld [vmem:[#allocation106_spill] sm:$0xff]  ;;  %v7701_v11 = vld [vmem:[#allocation105_spill] sm:$0xff] }
 0x7b4   :  { %2662 = vmatpush1.bf16.msra.mxu0 %v7684_v21  ;;  %2703 = vmatpush1.bf16.msra.mxu1 %v7685_v54  ;;  %v7702_v21 = vld [vmem:[#allocation107_spill] sm:$0xff]  ;;  %v7703_v54 = vld [vmem:[#allocation108_spill] sm:$0xff] }
 0x7b5   :  { %2663 = vmatprep.subr.bf16.mxu0 %v7686_v46  ;;  %2704 = vmatprep.subr.bf16.mxu1 %v7687_v31 }
 0x7b8   :  { %2664 = vmatpush1.bf16.msra.mxu0 %v7688_v17  ;;  %2705 = vmatpush1.bf16.msra.mxu1 %v7689_v47 }
 0x7b9   :  { %2665 = vmatprep.subr.bf16.mxu0 %v7690_v16  ;;  %2706 = vmatprep.subr.bf16.mxu1 %v7691_v20 }
 0x7bc   :  { %2666 = vmatpush1.bf16.msra.mxu0 %v7692_v15  ;;  %2707 = vmatpush1.bf16.msra.mxu1 %v7693_v10 }
 0x7bd   :  { %2667 = vmatprep.subr.bf16.mxu0 %v7694_v9  ;;  %2708 = vmatprep.subr.bf16.mxu1 %v7695_v12  ;;  %v7704_v9 = vld [vmem:[#allocation38_spill] sm:$0xff] }
 0x7c0   :  { %2668 = vmatpush1.bf16.msra.mxu0 %v7696_v13  ;;  %2709 = vmatpush1.bf16.msra.mxu1 %v7697_v40  ;;  %v7705_v13 = vld [vmem:[#allocation40_spill] sm:$0xff] }
 0x7c1   :  { %2669 = vmatprep.subr.bf16.mxu0 %v7698_v41  ;;  %2710 = vmatprep.subr.bf16.mxu1 %v7699_v42  ;;  %v7706_v41 = vld [vmem:[#allocation37_spill] sm:$0xff] }
 0x7c4   :  { %2670 = vmatpush1.bf16.msra.mxu0 %v7700_v43  ;;  %2711 = vmatpush1.bf16.msra.mxu1 %v7701_v11  ;;  %v7707_v43 = vld [vmem:[#allocation39_spill] sm:$0xff] }
 0x7c5   :  { %2721 = vmatprep.subr.bf16.mxu0 %v7702_v21  ;;  %2762 = vmatprep.subr.bf16.mxu1 %v7703_v54 }
 0x81a   :  { %v2460_v46 = vpop.f32.mrb[72].mxu0  ;;  %v2501_v31 = vpop.f32.mrb[72].mxu1 }
 0x81b   :  { %v2462_v17 = vpop.f32.mrb[73].mxu0  ;;  %v2503_v47 = vpop.f32.mrb[73].mxu1  ;;  %v2502_v12 = vadd.f32 %v2501_v31, %v7704_v9  ;;  %v2461_v42 = vadd.f32 %v2460_v46, %v7706_v41  ;;  %v7709_v9 = vld [vmem:[#allocation70_spill] sm:$0xff] }
 0x81c   :  { %v2464_v16 = vpop.f32.mrb[74].mxu0  ;;  %v2505_v20 = vpop.f32.mrb[74].mxu1  ;;  %v2504_v40 = vadd.f32 %v2503_v47, %v7705_v13  ;;  %v2463_v11 = vadd.f32 %v2462_v17, %v7707_v43  ;;  %v7710_v13 = vld [vmem:[#allocation71_spill] sm:$0xff] }
 0x81d   :  { %v2465_v15 = vpop.f32.mrb[75].mxu0  ;;  %v2506_v10 = vpop.f32.mrb[75].mxu1  ;;  %v2598_v36 = vmul.f32 0.5, %v2502_v12  ;;  %v2590_v35 = vmul.f32 0.5, %v2461_v42 }
 0x81e   :  { %v2599_v21 = vmul.f32 0.5, %v2504_v40  ;;  %v2591_v54 = vmul.f32 0.5, %v2463_v11  ;;  %v7708_v15 = vld [vmem:[#allocation69_spill] sm:$0xff]  ;;  %v7711_v40 = vld [vmem:[#allocation72_spill] sm:$0xff] }
 0x81f   :  { %3931 = vtanh.f32 %v2598_v36 }
 0x820   :  { %3933 = vtanh.f32 %v2599_v21 }
 0x821   :  { %3935 = vtanh.f32 %v2590_v35 }
 0x822   :  { %3937 = vtanh.f32 %v2591_v54 }
 0x829   :  { %v3932_v12 = vpop.eup %3931 }
 0x82a   :  { %v3934_v35 = vpop.eup %3933  ;;  %v2602_v54 = vmul.f32 0.5, %v3932_v12 }
 0x82b   :  { %v3936_v11 = vpop.eup %3935 }
 0x82c   :  { %v3938_v21 = vpop.eup %3937  ;;  %v2594_v45 = vmul.f32 0.5, %v3936_v11 }
 0x85a   :  { %v2542_v16 = vpop.f32.mrb[76].mxu0  ;;  %v2583_v20 = vpop.f32.mrb[76].mxu1 }
 0x85b   :  { %v2543_v10 = vadd.f32 %v2542_v16, %v7708_v15  ;;  %v2544_v2 = vpop.f32.mrb[77].mxu0  ;;  %v2585_v31 = vpop.f32.mrb[77].mxu1  ;;  %v2584_v47 = vadd.f32 %v2583_v20, %v7709_v9  ;;  %v2603_v15 = vmul.f32 0.5, %v3934_v35  ;;  %v2595_v20 = vmul.f32 0.5, %v3938_v21 }
 0x85c   :  { %v2545_v46 = vadd.f32 %v2544_v2, %v7710_v13  ;;  %v2546_v41 = vpop.f32.mrb[78].mxu0  ;;  %v2587_v17 = vpop.f32.mrb[78].mxu1  ;;  %v2586_v42 = vadd.f32 %v2585_v31, %v7711_v40  ;;  %v2604_v9 = vadd.f32 0.5, %v2602_v54  ;;  %v2596_v13 = vadd.f32 0.5, %v2594_v45 }
 0x85d   :  { %3939 = vtanh.f32 %v2543_v10  ;;  %v2547_v36 = vpop.f32.mrb[79].mxu0  ;;  %v2588_v43 = vpop.f32.mrb[79].mxu1  ;;  %v2608_v16 = vmul.f32 0.5, %v2584_v47  ;;  %v2605_v2 = vadd.f32 0.5, %v2603_v15  ;;  %v2597_v41 = vadd.f32 0.5, %v2595_v20  ;;  %v6253_v20 = vld [vmem:[#allocation3 + $0x108] sm:$0xff] }
 0x85e   :  { %3941 = vtanh.f32 %v2545_v46  ;;  %v2609_v0 = vmul.f32 0.5, %v2586_v42  ;;  %v2616_v17 = vmul.f32 %v2604_v9, %v5981_v22  ;;  %v6256_v9 = vld [vmem:[#allocation3 + $0x118] sm:$0xff] }
 0x85f   :  { %3943 = vtanh.f32 %v2608_v16  ;;  %v2617_v46 = vmul.f32 %v2605_v2, %v5983_v39  ;;  %v6259_v2 = vld [vmem:[#allocation3 + $0x100] sm:$0xff] }
 0x860   :  { %3945 = vtanh.f32 %v2609_v0 }
 0x867   :  { %v3940_v10 = vpop.eup %3939 }
 0x868   :  { %v3942_v31 = vpop.eup %3941  ;;  %v2618_v40 = vmul.f32 %v3940_v10, %v2596_v13  ;;  %v6262_v13 = vld [vmem:[#allocation3 + $0x110] sm:$0xff]  ;;  %v6265_v10 = vld [vmem:[#allocation3 + $0x148] sm:$0xff] }
 0x869   :  { %v2619_v36 = vmul.f32 %v3942_v31, %v2597_v41  ;;  %v3944_v42 = vpop.eup %3943  ;;  %v6268_v41 = vld [vmem:[#allocation3 + $0x158] sm:$0xff]  ;;  %v6271_v31 = vld [vmem:[#allocation3 + $0x140] sm:$0xff] }
 0x86a   :  { %v6131_v12 = vadd.f32 %v2618_v40, %v2616_v17  ;;  %v3946_v0 = vpop.eup %3945  ;;  %v2612_v45 = vmul.f32 0.5, %v3944_v42  ;;  %v6274_v17 = vld [vmem:[#allocation3 + $0x150] sm:$0xff]  ;;  %v6277_v40 = vld [vmem:[#allocation3 + $0x188] sm:$0xff] }
 0x86b   :  { %v6133_v47 = vadd.f32 %v2619_v36, %v2617_v46  ;;  %v2613_v43 = vmul.f32 0.5, %v3946_v0  ;;  %v6280_v46 = vld [vmem:[#allocation3 + $0x198] sm:$0xff]  ;;  %v6283_v36 = vld [vmem:[#allocation3 + $0x180] sm:$0xff]  ;;  %v6286_v42 = vld [vmem:[#allocation3 + $0x190] sm:$0xff] }
 0x86c   :  { %3947 = vtanh.f32 %v6131_v12  ;;  %v2614_v35 = vadd.f32 0.5, %v2612_v45  ;;  %v6289_v0 = vld [vmem:[#allocation3 + $0x1c8] sm:$0xff]  ;;  %v6292_v45 = vld [vmem:[#allocation3 + $0x1d8] sm:$0xff] }
 0x86d   :  { %3949 = vtanh.f32 %v6133_v47  ;;  %v2615_v21 = vadd.f32 0.5, %v2613_v43  ;;  %v6295_v43 = vld [vmem:[#allocation3 + $0x1c0] sm:$0xff] }
 0x876   :  { %v3948_v11 = vpop.eup %3947 }
 0x877   :  { %v3950_v22 = vpop.eup %3949  ;;  %v2624_v54 = vmul.f32 %v3948_v11, %v2614_v35  ;;  %v6298_v35 = vld [vmem:[#allocation3 + $0x1d0] sm:$0xff]  ;;  %v6301_v11 = vld [vmem:[#allocation3 + $0x208] sm:$0xff] }
 0x878   :  { %v2625_v16 = vmul.f32 %v3950_v22, %v2615_v21  ;;  %v6304_v21 = vld [vmem:[#allocation3 + $0x218] sm:$0xff]  ;;  %v6307_v22 = vld [vmem:[#allocation3 + $0x200] sm:$0xff] }
 0x879   :  { %v6137_v15 = vpack.c.bf16 %v2624_v54, %v2624_v54  ;;  %v6310_v54 = vld [vmem:[#allocation3 + $0x210] sm:$0xff] }
 0x87a   :  { %v2627_v39 = vpack.c.bf16 %v2625_v16, %v2625_v16  ;;  %v6313_v16 = vld [vmem:[#allocation3 + $0x248] sm:$0xff] }
 0x87c   :  { %2671 = vmatprep.mubr.bf16.mxu0 %v2627_v39  ;;  %2712 = vmatprep.mubr.bf16.mxu1 %v2627_v39 }
 0x87d   :  { %2672 = vmatmul.mubr.bf16.vlgmr.msra.gmra.mrb[80].mxu0 %v6137_v15  ;;  %2713 = vmatmul.mubr.bf16.vlgmr.msra.gmra.mrb[80].mxu1 %v6137_v15 }
 0x87e   :  { %2722 = vmatpush1.bf16.msra.mxu0 %v5717_v61  ;;  %2763 = vmatpush1.bf16.msra.mxu1 %v5720_v5  ;;  %v7712_v61 = vld [vmem:[#allocation26_spill] sm:$0xff]  ;;  %v7713_v5 = vld [vmem:[#allocation28_spill] sm:$0xff] }
 0x87f   :  { %2753 = vmatprep.mubr.bf16.mxu0 %v2627_v39  ;;  %2794 = vmatprep.mubr.bf16.mxu1 %v2627_v39  ;;  %v6316_v39 = vld [vmem:[#allocation3 + $0x258] sm:$0xff] }
 0x880   :  { %2723 = vmatprep.subr.bf16.mxu0 %v5723_v57  ;;  %2764 = vmatprep.subr.bf16.mxu1 %v5726_v1  ;;  %v7714_v57 = vld [vmem:[#allocation25_spill] sm:$0xff]  ;;  %v7715_v1 = vld [vmem:[#allocation27_spill] sm:$0xff] }
 0x882   :  { %2724 = vmatpush1.bf16.msra.mxu0 %v5729_v7  ;;  %2765 = vmatpush1.bf16.msra.mxu1 %v5732_v63  ;;  %v7716_v7 = vld [vmem:[#allocation57_spill] sm:$0xff]  ;;  %v7717_v63 = vld [vmem:[#allocation58_spill] sm:$0xff] }
 0x883   :  { %2725 = vmatprep.subr.bf16.mxu0 %v5735_v30  ;;  %2766 = vmatprep.subr.bf16.mxu1 %v5738_v27  ;;  %v7718_v30 = vld [vmem:[#allocation59_spill] sm:$0xff]  ;;  %v7719_v27 = vld [vmem:[#allocation60_spill] sm:$0xff] }
 0x886   :  { %2726 = vmatpush1.bf16.msra.mxu0 %v5741_v55  ;;  %2767 = vmatpush1.bf16.msra.mxu1 %v5744_v56  ;;  %v7720_v55 = vld [vmem:[#allocation128_spill] sm:$0xff]  ;;  %v7721_v56 = vld [vmem:[#allocation130_spill] sm:$0xff] }
 0x887   :  { %2727 = vmatprep.subr.bf16.mxu0 %v5747_v29  ;;  %2768 = vmatprep.subr.bf16.mxu1 %v5750_v34  ;;  %v7722_v29 = vld [vmem:[#allocation129_spill] sm:$0xff]  ;;  %v7723_v34 = vld [vmem:[#allocation131_spill] sm:$0xff] }
 0x88a   :  { %2728 = vmatpush1.bf16.msra.mxu0 %v5753_v58  ;;  %2769 = vmatpush1.bf16.msra.mxu1 %v5756_v60  ;;  %v7724_v58 = vld [vmem:[#allocation132_spill] sm:$0xff]  ;;  %v7725_v60 = vld [vmem:[#allocation134_spill] sm:$0xff] }
 0x88b   :  { %2729 = vmatprep.subr.bf16.mxu0 %v5759_v28  ;;  %2770 = vmatprep.subr.bf16.mxu1 %v5762_v26  ;;  %v7726_v28 = vld [vmem:[#allocation133_spill] sm:$0xff]  ;;  %v7727_v26 = vld [vmem:[#allocation135_spill] sm:$0xff] }
 0x88e   :  { %2730 = vmatpush1.bf16.msra.mxu0 %v7615_v25  ;;  %2771 = vmatpush1.bf16.msra.mxu1 %v7616_v24  ;;  %v7728_v25 = vld [vmem:[#allocation136_spill] sm:$0xff]  ;;  %v7729_v24 = vld [vmem:[#allocation138_spill] sm:$0xff] }
 0x88f   :  { %2731 = vmatprep.subr.bf16.mxu0 %v7617_v52  ;;  %2772 = vmatprep.subr.bf16.mxu1 %v7618_v14  ;;  %v7730_v52 = vld [vmem:[#allocation150_spill] sm:$0xff]  ;;  %v7731_v14 = vld [vmem:[#allocation149_spill] sm:$0xff] }
 0x892   :  { %2732 = vmatpush1.bf16.msra.mxu0 %v7619_v51  ;;  %2773 = vmatpush1.bf16.msra.mxu1 %v7620_v19  ;;  %v7732_v51 = vld [vmem:[#allocation151_spill] sm:$0xff]  ;;  %v7733_v19 = vld [vmem:[#allocation152_spill] sm:$0xff] }
 0x893   :  { %2733 = vmatprep.subr.bf16.mxu0 %v7621_v37  ;;  %2774 = vmatprep.subr.bf16.mxu1 %v7622_v33  ;;  %v7734_v37 = vld [vmem:[#allocation154_spill] sm:$0xff]  ;;  %v6203_v33 = vld [vmem:[#allocation3 + $0x8] sm:$0xff] }
 0x896   :  { %2734 = vmatpush1.bf16.msra.mxu0 %v7623_v53  ;;  %2775 = vmatpush1.bf16.msra.mxu1 %v7624_v44  ;;  %v6206_v53 = vld [vmem:[#allocation3 + $0x18] sm:$0xff]  ;;  %v6214_v44 = vld [vmem:[#allocation3 + $0x10] sm:$0xff] }
 0x897   :  { %2735 = vmatprep.subr.bf16.mxu0 %v7625_v8  ;;  %2776 = vmatprep.subr.bf16.mxu1 %v7712_v61  ;;  %v6217_v8 = vld [vmem:[#allocation3 + $0x48] sm:$0xff]  ;;  %v6322_v61 = vld [vmem:[#allocation3 + $0x250] sm:$0xff] }
 0x898   :  { %7735 = vst [vmem:[#allocation153_spill] sm:$0xff] %v6322_v61 }
 0x89a   :  { %2736 = vmatpush1.bf16.msra.mxu0 %v7713_v5  ;;  %2777 = vmatpush1.bf16.msra.mxu1 %v7714_v57  ;;  %v6325_v5 = vld [vmem:[#allocation3 + $0x288] sm:$0xff]  ;;  %v6328_v57 = vld [vmem:[#allocation3 + $0x298] sm:$0xff] }
 0x89b   :  { %2737 = vmatprep.subr.bf16.mxu0 %v7715_v1  ;;  %2778 = vmatprep.subr.bf16.mxu1 %v7716_v7  ;;  %7736 = vst [vmem:[#allocation155_spill] sm:$0xff] %v6325_v5  ;;  %7737 = vst [vmem:[#allocation156_spill] sm:$0xff] %v6328_v57  ;;  %v6331_v1 = vld [vmem:[#allocation3 + $0x280] sm:$0xff]  ;;  %v6334_v7 = vld [vmem:[#allocation3 + $0x290] sm:$0xff] }
 0x89c   :  { %7738 = vst [vmem:[#allocation158_spill] sm:$0xff] %v6331_v1  ;;  %7739 = vst [vmem:[#allocation157_spill] sm:$0xff] %v6334_v7 }
 0x89e   :  { %2738 = vmatpush1.bf16.msra.mxu0 %v7717_v63  ;;  %2779 = vmatpush1.bf16.msra.mxu1 %v7718_v30  ;;  %v6337_v63 = vld [vmem:[#allocation3 + $0x2c8] sm:$0xff]  ;;  %v6340_v30 = vld [vmem:[#allocation3 + $0x2d8] sm:$0xff] }
 0x89f   :  { %2739 = vmatprep.subr.bf16.mxu0 %v7719_v27  ;;  %2780 = vmatprep.subr.bf16.mxu1 %v7720_v55  ;;  %7740 = vst [vmem:[#allocation159_spill] sm:$0xff] %v6337_v63  ;;  %7741 = vst [vmem:[#allocation160_spill] sm:$0xff] %v6340_v30  ;;  %v6343_v27 = vld [vmem:[#allocation3 + $0x2c0] sm:$0xff]  ;;  %v6346_v55 = vld [vmem:[#allocation3 + $0x2d0] sm:$0xff] }
 0x8a0   :  { %7742 = vst [vmem:[#allocation163_spill] sm:$0xff] %v6343_v27  ;;  %7743 = vst [vmem:[#allocation30_spill] sm:$0xff] %v6346_v55 }
 0x8a2   :  { %2740 = vmatpush1.bf16.msra.mxu0 %v7721_v56  ;;  %2781 = vmatpush1.bf16.msra.mxu1 %v7722_v29  ;;  %v6349_v56 = vld [vmem:[#allocation3 + $0x308] sm:$0xff]  ;;  %v6352_v29 = vld [vmem:[#allocation3 + $0x318] sm:$0xff] }
 0x8a3   :  { %2741 = vmatprep.subr.bf16.mxu0 %v7723_v34  ;;  %2782 = vmatprep.subr.bf16.mxu1 %v7724_v58  ;;  %7744 = vst [vmem:[#allocation32_spill] sm:$0xff] %v6349_v56  ;;  %7745 = vst [vmem:[#allocation29_spill] sm:$0xff] %v6352_v29  ;;  %v6355_v34 = vld [vmem:[#allocation3 + $0x300] sm:$0xff]  ;;  %v6358_v58 = vld [vmem:[#allocation3 + $0x310] sm:$0xff] }
 0x8a4   :  { %7746 = vst [vmem:[#allocation31_spill] sm:$0xff] %v6355_v34  ;;  %7747 = vst [vmem:[#allocation61_spill] sm:$0xff] %v6358_v58 }
 0x8a6   :  { %2742 = vmatpush1.bf16.msra.mxu0 %v7725_v60  ;;  %2783 = vmatpush1.bf16.msra.mxu1 %v7726_v28  ;;  %v6361_v60 = vld [vmem:[#allocation3 + $0x348] sm:$0xff]  ;;  %v6364_v28 = vld [vmem:[#allocation3 + $0x358] sm:$0xff] }
 0x8a7   :  { %2743 = vmatprep.subr.bf16.mxu0 %v7727_v26  ;;  %2784 = vmatprep.subr.bf16.mxu1 %v7728_v25  ;;  %7748 = vst [vmem:[#allocation62_spill] sm:$0xff] %v6361_v60  ;;  %7749 = vst [vmem:[#allocation63_spill] sm:$0xff] %v6364_v28  ;;  %v6367_v26 = vld [vmem:[#allocation3 + $0x340] sm:$0xff]  ;;  %v6370_v25 = vld [vmem:[#allocation3 + $0x350] sm:$0xff] }
 0x8a8   :  { %7750 = vst [vmem:[#allocation64_spill] sm:$0xff] %v6367_v26  ;;  %7751 = vst [vmem:[#allocation34_spill] sm:$0xff] %v6370_v25 }
 0x8aa   :  { %2744 = vmatpush1.bf16.msra.mxu0 %v7729_v24  ;;  %2785 = vmatpush1.bf16.msra.mxu1 %v7644_v23  ;;  %v6241_v23 = vld [vmem:[#allocation3 + $0xc8] sm:$0xff] }
 0x8ab   :  { %2745 = vmatprep.subr.bf16.mxu0 %v7645_v32  ;;  %2786 = vmatprep.subr.bf16.mxu1 %v7646_v38  ;;  %v6244_v32 = vld [vmem:[#allocation3 + $0xd8] sm:$0xff]  ;;  %v6247_v38 = vld [vmem:[#allocation3 + $0xc0] sm:$0xff]  ;;  %v6373_v24 = vld [vmem:[#allocation3 + $0x388] sm:$0xff] }
 0x8ac   :  { %7752 = vst [vmem:[#allocation36_spill] sm:$0xff] %v6373_v24 }
 0x8ae   :  { %2746 = vmatpush1.bf16.msra.mxu0 %v7647_v3  ;;  %2787 = vmatpush1.bf16.msra.mxu1 %v7648_v49  ;;  %v6220_v49 = vld [vmem:[#allocation3 + $0x58] sm:$0xff]  ;;  %v6250_v3 = vld [vmem:[#allocation3 + $0xd0] sm:$0xff] }
 0x8af   :  { %2747 = vmatprep.subr.bf16.mxu0 %v7649_v4  ;;  %2788 = vmatprep.subr.bf16.mxu1 %v7650_v48  ;;  %v6223_v4 = vld [vmem:[#allocation3 + $0x40] sm:$0xff]  ;;  %v6226_v48 = vld [vmem:[#allocation3 + $0x50] sm:$0xff] }
 0x8b2   :  { %2748 = vmatpush1.bf16.msra.mxu0 %v7651_v50  ;;  %2789 = vmatpush1.bf16.msra.mxu1 %v7652_v6  ;;  %v6229_v50 = vld [vmem:[#allocation3 + $0x88] sm:$0xff]  ;;  %v6232_v6 = vld [vmem:[#allocation3 + $0x98] sm:$0xff] }
 0x8b3   :  { %2749 = vmatprep.subr.bf16.mxu0 %v7653_v59  ;;  %2790 = vmatprep.subr.bf16.mxu1 %v7654_v18  ;;  %v6235_v59 = vld [vmem:[#allocation3 + $0x80] sm:$0xff]  ;;  %v6238_v18 = vld [vmem:[#allocation3 + $0x90] sm:$0xff] }
 0x8b6   :  { %2750 = vmatpush1.bf16.msra.mxu0 %v5885_v62  ;;  %2791 = vmatpush1.bf16.msra.mxu1 %v7730_v52  ;;  %v6211_v62 = vld [vmem:[#allocation3] sm:$0xff]  ;;  %v6376_v52 = vld [vmem:[#allocation3 + $0x398] sm:$0xff] }
 0x8b7   :  { %2751 = vmatprep.subr.bf16.mxu0 %v7731_v14  ;;  %2792 = vmatprep.subr.bf16.mxu1 %v7732_v51  ;;  %7753 = vst [vmem:[#allocation33_spill] sm:$0xff] %v6376_v52  ;;  %v6379_v14 = vld [vmem:[#allocation3 + $0x380] sm:$0xff]  ;;  %v6382_v51 = vld [vmem:[#allocation3 + $0x390] sm:$0xff] }
 0x8b8   :  { %7754 = vst [vmem:[#allocation35_spill] sm:$0xff] %v6379_v14  ;;  %7755 = vst [vmem:[#allocation65_spill] sm:$0xff] %v6382_v51 }
 0x8ba   :  { %2752 = vmatpush1.bf16.msra.mxu0 %v7733_v19  ;;  %2793 = vmatpush1.bf16.msra.mxu1 %v7734_v37  ;;  %v6385_v19 = vld [vmem:[#allocation3 + $0x3c8] sm:$0xff]  ;;  %v6388_v37 = vld [vmem:[#allocation3 + $0x3d8] sm:$0xff] }
 0x8bb   :  { %2852 = vmatprep.subr.bf16.mxu0 %v6203_v33  ;;  %2893 = vmatprep.subr.bf16.mxu1 %v6206_v53  ;;  %7756 = vst [vmem:[#allocation66_spill] sm:$0xff] %v6385_v19  ;;  %7757 = vst [vmem:[#allocation67_spill] sm:$0xff] %v6388_v37 }
 0x8bd   :  { %2754 = vmatmul.mubr.bf16.vlgmr.msra.gmra.mrb[84].mxu0 %v6137_v15  ;;  %2795 = vmatmul.mubr.bf16.vlgmr.msra.gmra.mrb[84].mxu1 %v6137_v15  ;;  %v6319_v15 = vld [vmem:[#allocation3 + $0x240] sm:$0xff] }
 0x8be   :  { %2853 = vmatpush1.bf16.msra.mxu0 %v6211_v62  ;;  %2894 = vmatpush1.bf16.msra.mxu1 %v6214_v44 }
 0x8bf   :  { %2854 = vmatprep.subr.bf16.mxu0 %v6217_v8  ;;  %2895 = vmatprep.subr.bf16.mxu1 %v6220_v49 }
 0x8c2   :  { %2855 = vmatpush1.bf16.msra.mxu0 %v6223_v4  ;;  %2896 = vmatpush1.bf16.msra.mxu1 %v6226_v48 }
 0x8c3   :  { %2856 = vmatprep.subr.bf16.mxu0 %v6229_v50  ;;  %2897 = vmatprep.subr.bf16.mxu1 %v6232_v6 }
 0x8c6   :  { %2857 = vmatpush1.bf16.msra.mxu0 %v6235_v59  ;;  %2898 = vmatpush1.bf16.msra.mxu1 %v6238_v18 }
 0x8c7   :  { %2858 = vmatprep.subr.bf16.mxu0 %v6241_v23  ;;  %2899 = vmatprep.subr.bf16.mxu1 %v6244_v32 }
 0x8ca   :  { %2859 = vmatpush1.bf16.msra.mxu0 %v6247_v38  ;;  %2900 = vmatpush1.bf16.msra.mxu1 %v6250_v3 }
 0x8cb   :  { %2860 = vmatprep.subr.bf16.mxu0 %v6253_v20  ;;  %2901 = vmatprep.subr.bf16.mxu1 %v6256_v9 }
 0x8ce   :  { %2861 = vmatpush1.bf16.msra.mxu0 %v6259_v2  ;;  %2902 = vmatpush1.bf16.msra.mxu1 %v6262_v13 }
 0x8cf   :  { %2862 = vmatprep.subr.bf16.mxu0 %v6265_v10  ;;  %2903 = vmatprep.subr.bf16.mxu1 %v6268_v41 }
 0x8d2   :  { %2863 = vmatpush1.bf16.msra.mxu0 %v6271_v31  ;;  %2904 = vmatpush1.bf16.msra.mxu1 %v6274_v17 }
 0x8d3   :  { %2864 = vmatprep.subr.bf16.mxu0 %v6277_v40  ;;  %2905 = vmatprep.subr.bf16.mxu1 %v6280_v46 }
 0x8d6   :  { %2865 = vmatpush1.bf16.msra.mxu0 %v6283_v36  ;;  %2906 = vmatpush1.bf16.msra.mxu1 %v6286_v42 }
 0x8d7   :  { %2866 = vmatprep.subr.bf16.mxu0 %v6289_v0  ;;  %2907 = vmatprep.subr.bf16.mxu1 %v6292_v45 }
 0x8da   :  { %2867 = vmatpush1.bf16.msra.mxu0 %v6295_v43  ;;  %2908 = vmatpush1.bf16.msra.mxu1 %v6298_v35 }
 0x8db   :  { %2868 = vmatprep.subr.bf16.mxu0 %v6301_v11  ;;  %2909 = vmatprep.subr.bf16.mxu1 %v6304_v21 }
 0x8de   :  { %2869 = vmatpush1.bf16.msra.mxu0 %v6307_v22  ;;  %2910 = vmatpush1.bf16.msra.mxu1 %v6310_v54 }
 0x8df   :  { %2870 = vmatprep.subr.bf16.mxu0 %v6313_v16  ;;  %2911 = vmatprep.subr.bf16.mxu1 %v6316_v39 }
 0x8e2   :  { %2871 = vmatpush1.bf16.msra.mxu0 %v6319_v15  ;;  %2912 = vmatpush1.bf16.msra.mxu1 %v6322_v61 }
 0x8e3   :  { %2872 = vmatprep.subr.bf16.mxu0 %v6325_v5  ;;  %2913 = vmatprep.subr.bf16.mxu1 %v6328_v57 }
 0x8e6   :  { %2873 = vmatpush1.bf16.msra.mxu0 %v6331_v1  ;;  %2914 = vmatpush1.bf16.msra.mxu1 %v6334_v7 }
 0x8e7   :  { %2874 = vmatprep.subr.bf16.mxu0 %v6337_v63  ;;  %2915 = vmatprep.subr.bf16.mxu1 %v6340_v30  ;;  %v7765_v30 = vld [vmem:[#allocation43_spill] sm:$0xff] }
 0x8ea   :  { %2875 = vmatpush1.bf16.msra.mxu0 %v6343_v27  ;;  %2916 = vmatpush1.bf16.msra.mxu1 %v6346_v55  ;;  %v7764_v55 = vld [vmem:[#allocation41_spill] sm:$0xff] }
 0x8eb   :  { %2876 = vmatprep.subr.bf16.mxu0 %v6349_v56  ;;  %2917 = vmatprep.subr.bf16.mxu1 %v6352_v29  ;;  %v7763_v56 = vld [vmem:[#allocation44_spill] sm:$0xff] }
 0x8ee   :  { %2877 = vmatpush1.bf16.msra.mxu0 %v6355_v34  ;;  %2918 = vmatpush1.bf16.msra.mxu1 %v6358_v58  ;;  %v7762_v34 = vld [vmem:[#allocation42_spill] sm:$0xff] }
 0x8ef   :  { %2878 = vmatprep.subr.bf16.mxu0 %v6361_v60  ;;  %2919 = vmatprep.subr.bf16.mxu1 %v6364_v28 }
 0x8f2   :  { %2879 = vmatpush1.bf16.msra.mxu0 %v6367_v26  ;;  %2920 = vmatpush1.bf16.msra.mxu1 %v6370_v25 }
 0x8f3   :  { %2880 = vmatprep.subr.bf16.mxu0 %v6373_v24  ;;  %2921 = vmatprep.subr.bf16.mxu1 %v6376_v52  ;;  %v6391_v24 = vld [vmem:[#allocation3 + $0x3c0] sm:$0xff]  ;;  %v6394_v52 = vld [vmem:[#allocation3 + $0x3d0] sm:$0xff] }
 0x8f4   :  { %7758 = vst [vmem:[#allocation68_spill] sm:$0xff] %v6391_v24  ;;  %7759 = vst [vmem:[#allocation110_spill] sm:$0xff] %v6394_v52 }
 0x8f6   :  { %2881 = vmatpush1.bf16.msra.mxu0 %v6379_v14  ;;  %2922 = vmatpush1.bf16.msra.mxu1 %v6382_v51  ;;  %v6397_v14 = vld [vmem:[#allocation3 + $0x28] sm:$0xff]  ;;  %v6400_v51 = vld [vmem:[#allocation3 + $0x38] sm:$0xff] }
 0x8f7   :  { %2882 = vmatprep.subr.bf16.mxu0 %v6385_v19  ;;  %2923 = vmatprep.subr.bf16.mxu1 %v6388_v37  ;;  %7760 = vst [vmem:[#allocation109_spill] sm:$0xff] %v6397_v14  ;;  %7761 = vst [vmem:[#allocation111_spill] sm:$0xff] %v6400_v51 }
 0x8fa   :  { %2883 = vmatpush1.bf16.msra.mxu0 %v6391_v24  ;;  %2924 = vmatpush1.bf16.msra.mxu1 %v6394_v52 }
 0x8fb   :  { %2934 = vmatprep.subr.bf16.mxu0 %v6397_v14  ;;  %2975 = vmatprep.subr.bf16.mxu1 %v6400_v51 }
 0x950   :  { %v2673_v19 = vpop.f32.mrb[80].mxu0  ;;  %v2714_v25 = vpop.f32.mrb[80].mxu1 }
 0x951   :  { %v2675_v26 = vpop.f32.mrb[81].mxu0  ;;  %v2716_v37 = vpop.f32.mrb[81].mxu1  ;;  %v2715_v29 = vadd.f32 %v2714_v25, %v7762_v34  ;;  %v2674_v27 = vadd.f32 %v2673_v19, %v7764_v55  ;;  %v7767_v25 = vld [vmem:[#allocation74_spill] sm:$0xff] }
 0x952   :  { %v2677_v28 = vpop.f32.mrb[82].mxu0  ;;  %v2718_v60 = vpop.f32.mrb[82].mxu1  ;;  %v2717_v52 = vadd.f32 %v2716_v37, %v7763_v56  ;;  %v2676_v14 = vadd.f32 %v2675_v26, %v7765_v30  ;;  %v7768_v37 = vld [vmem:[#allocation75_spill] sm:$0xff] }
 0x953   :  { %v2678_v58 = vpop.f32.mrb[83].mxu0  ;;  %v2719_v24 = vpop.f32.mrb[83].mxu1  ;;  %v2811_v63 = vmul.f32 0.5, %v2715_v29  ;;  %v2803_v1 = vmul.f32 0.5, %v2674_v27  ;;  %v7769_v27 = vld [vmem:[#allocation76_spill] sm:$0xff] }
 0x954   :  { %v2812_v7 = vmul.f32 0.5, %v2717_v52  ;;  %v2804_v51 = vmul.f32 0.5, %v2676_v14  ;;  %v7766_v58 = vld [vmem:[#allocation73_spill] sm:$0xff] }
 0x955   :  { %3951 = vtanh.f32 %v2811_v63 }
 0x956   :  { %3953 = vtanh.f32 %v2812_v7 }
 0x957   :  { %3955 = vtanh.f32 %v2803_v1 }
 0x958   :  { %3957 = vtanh.f32 %v2804_v51 }
 0x95f   :  { %v3952_v29 = vpop.eup %3951 }
 0x960   :  { %v3954_v1 = vpop.eup %3953  ;;  %v2815_v51 = vmul.f32 0.5, %v3952_v29 }
 0x961   :  { %v3956_v52 = vpop.eup %3955 }
 0x962   :  { %v3958_v14 = vpop.eup %3957  ;;  %v2807_v61 = vmul.f32 0.5, %v3956_v52 }
 0x990   :  { %v2755_v28 = vpop.f32.mrb[84].mxu0  ;;  %v2796_v60 = vpop.f32.mrb[84].mxu1 }
 0x991   :  { %v2756_v24 = vadd.f32 %v2755_v28, %v7766_v58  ;;  %v2757_v57 = vpop.f32.mrb[85].mxu0  ;;  %v2798_v34 = vpop.f32.mrb[85].mxu1  ;;  %v2797_v56 = vadd.f32 %v2796_v60, %v7767_v25  ;;  %v2816_v58 = vmul.f32 0.5, %v3954_v1  ;;  %v2808_v60 = vmul.f32 0.5, %v3958_v14 }
 0x992   :  { %v2758_v55 = vadd.f32 %v2757_v57, %v7768_v37  ;;  %v2759_v19 = vpop.f32.mrb[86].mxu0  ;;  %v2800_v30 = vpop.f32.mrb[86].mxu1  ;;  %v2799_v26 = vadd.f32 %v2798_v34, %v7769_v27  ;;  %v2817_v25 = vadd.f32 0.5, %v2815_v51  ;;  %v2809_v37 = vadd.f32 0.5, %v2807_v61 }
 0x993   :  { %3959 = vtanh.f32 %v2756_v24  ;;  %v2760_v63 = vpop.f32.mrb[87].mxu0  ;;  %v2801_v7 = vpop.f32.mrb[87].mxu1  ;;  %v2821_v28 = vmul.f32 0.5, %v2797_v56  ;;  %v2818_v57 = vadd.f32 0.5, %v2816_v58  ;;  %v2810_v19 = vadd.f32 0.5, %v2808_v60  ;;  %v6423_v60 = vld [vmem:[#allocation3 + $0x20] sm:$0xff] }
 0x994   :  { %3961 = vtanh.f32 %v2758_v55  ;;  %v2822_v5 = vmul.f32 0.5, %v2799_v26  ;;  %v2829_v30 = vmul.f32 %v2817_v25, %v6131_v12  ;;  %v6426_v25 = vld [vmem:[#allocation3 + $0x30] sm:$0xff] }
 0x995   :  { %3963 = vtanh.f32 %v2821_v28  ;;  %v2830_v55 = vmul.f32 %v2818_v57, %v6133_v47  ;;  %v6429_v57 = vld [vmem:[#allocation3 + $0x68] sm:$0xff] }
 0x996   :  { %3965 = vtanh.f32 %v2822_v5 }
 0x99d   :  { %v3960_v24 = vpop.eup %3959 }
 0x99e   :  { %v3962_v34 = vpop.eup %3961  ;;  %v2831_v27 = vmul.f32 %v3960_v24, %v2809_v37  ;;  %v6432_v37 = vld [vmem:[#allocation3 + $0x78] sm:$0xff]  ;;  %v6435_v24 = vld [vmem:[#allocation3 + $0x60] sm:$0xff] }
 0x99f   :  { %v2832_v63 = vmul.f32 %v3962_v34, %v2810_v19  ;;  %v3964_v26 = vpop.eup %3963  ;;  %v6438_v19 = vld [vmem:[#allocation3 + $0x70] sm:$0xff]  ;;  %v6441_v34 = vld [vmem:[#allocation3 + $0xa8] sm:$0xff] }
 0x9a0   :  { %v6413_v29 = vadd.f32 %v2831_v27, %v2829_v30  ;;  %v3966_v5 = vpop.eup %3965  ;;  %v2825_v61 = vmul.f32 0.5, %v3964_v26  ;;  %v6444_v30 = vld [vmem:[#allocation3 + $0xb8] sm:$0xff]  ;;  %v6447_v27 = vld [vmem:[#allocation3 + $0xa0] sm:$0xff] }
 0x9a1   :  { %v6415_v56 = vadd.f32 %v2832_v63, %v2830_v55  ;;  %v2826_v7 = vmul.f32 0.5, %v3966_v5  ;;  %v6450_v55 = vld [vmem:[#allocation3 + $0xb0] sm:$0xff]  ;;  %v6453_v63 = vld [vmem:[#allocation3 + $0xe8] sm:$0xff]  ;;  %v6456_v26 = vld [vmem:[#allocation3 + $0xf8] sm:$0xff] }
 0x9a2   :  { %3967 = vtanh.f32 %v6413_v29  ;;  %v2827_v1 = vadd.f32 0.5, %v2825_v61  ;;  %v6459_v5 = vld [vmem:[#allocation3 + $0xe0] sm:$0xff]  ;;  %v6462_v61 = vld [vmem:[#allocation3 + $0xf0] sm:$0xff] }
 0x9a3   :  { %3969 = vtanh.f32 %v6415_v56  ;;  %v2828_v14 = vadd.f32 0.5, %v2826_v7  ;;  %v6465_v7 = vld [vmem:[#allocation3 + $0x128] sm:$0xff] }
 0x9ac   :  { %v3968_v52 = vpop.eup %3967 }
 0x9ad   :  { %v3970_v12 = vpop.eup %3969  ;;  %v2837_v51 = vmul.f32 %v3968_v52, %v2827_v1  ;;  %v6468_v1 = vld [vmem:[#allocation3 + $0x138] sm:$0xff]  ;;  %v6471_v52 = vld [vmem:[#allocation3 + $0x120] sm:$0xff] }
 0x9ae   :  { %v2838_v28 = vmul.f32 %v3970_v12, %v2828_v14  ;;  %7770 = vst [vmem:[#allocation112_spill] sm:$0xff] %v6471_v52  ;;  %v6474_v14 = vld [vmem:[#allocation3 + $0x130] sm:$0xff]  ;;  %v6477_v12 = vld [vmem:[#allocation3 + $0x168] sm:$0xff] }
 0x9af   :  { %v6419_v58 = vpack.c.bf16 %v2837_v51, %v2837_v51  ;;  %7771 = vst [vmem:[#allocation114_spill] sm:$0xff] %v6474_v14  ;;  %7772 = vst [vmem:[#allocation113_spill] sm:$0xff] %v6477_v12  ;;  %v6480_v51 = vld [vmem:[#allocation3 + $0x178] sm:$0xff] }
 0x9b0   :  { %v2840_v47 = vpack.c.bf16 %v2838_v28, %v2838_v28  ;;  %7773 = vst [vmem:[#allocation115_spill] sm:$0xff] %v6480_v51  ;;  %v6483_v28 = vld [vmem:[#allocation3 + $0x160] sm:$0xff] }
 0x9b1   :  { %7774 = vst [vmem:[#allocation116_spill] sm:$0xff] %v6483_v28 }
 0x9b2   :  { %2884 = vmatprep.mubr.bf16.mxu0 %v2840_v47  ;;  %2925 = vmatprep.mubr.bf16.mxu1 %v2840_v47 }
 0x9b3   :  { %2885 = vmatmul.mubr.bf16.vlgmr.msra.gmra.mrb[88].mxu0 %v6419_v58  ;;  %2926 = vmatmul.mubr.bf16.vlgmr.msra.gmra.mrb[88].mxu1 %v6419_v58 }
 0x9b4   :  { %2935 = vmatpush1.bf16.msra.mxu0 %v6423_v60  ;;  %2976 = vmatpush1.bf16.msra.mxu1 %v6426_v25 }
 0x9b5   :  { %2966 = vmatprep.mubr.bf16.mxu0 %v2840_v47  ;;  %3007 = vmatprep.mubr.bf16.mxu1 %v2840_v47  ;;  %v6486_v47 = vld [vmem:[#allocation3 + $0x170] sm:$0xff] }
 0x9b6   :  { %2936 = vmatprep.subr.bf16.mxu0 %v6429_v57  ;;  %2977 = vmatprep.subr.bf16.mxu1 %v6432_v37  ;;  %7775 = vst [vmem:[#allocation118_spill] sm:$0xff] %v6486_v47 }
 0x9b8   :  { %2937 = vmatpush1.bf16.msra.mxu0 %v6435_v24  ;;  %2978 = vmatpush1.bf16.msra.mxu1 %v6438_v19 }
 0x9b9   :  { %2938 = vmatprep.subr.bf16.mxu0 %v6441_v34  ;;  %2979 = vmatprep.subr.bf16.mxu1 %v6444_v30 }
 0x9bc   :  { %2939 = vmatpush1.bf16.msra.mxu0 %v6447_v27  ;;  %2980 = vmatpush1.bf16.msra.mxu1 %v6450_v55 }
 0x9bd   :  { %2940 = vmatprep.subr.bf16.mxu0 %v6453_v63  ;;  %2981 = vmatprep.subr.bf16.mxu1 %v6456_v26 }
 0x9c0   :  { %2941 = vmatpush1.bf16.msra.mxu0 %v6459_v5  ;;  %2982 = vmatpush1.bf16.msra.mxu1 %v6462_v61 }
 0x9c1   :  { %2942 = vmatprep.subr.bf16.mxu0 %v6465_v7  ;;  %2983 = vmatprep.subr.bf16.mxu1 %v6468_v1 }
 0x9c4   :  { %2943 = vmatpush1.bf16.msra.mxu0 %v6471_v52  ;;  %2984 = vmatpush1.bf16.msra.mxu1 %v6474_v14  ;;  %v6489_v52 = vld [vmem:[#allocation3 + $0x1a8] sm:$0xff]  ;;  %v6492_v14 = vld [vmem:[#allocation3 + $0x1b8] sm:$0xff] }
 0x9c5   :  { %2944 = vmatprep.subr.bf16.mxu0 %v6477_v12  ;;  %2985 = vmatprep.subr.bf16.mxu1 %v6480_v51  ;;  %7776 = vst [vmem:[#allocation117_spill] sm:$0xff] %v6489_v52  ;;  %7777 = vst [vmem:[#allocation119_spill] sm:$0xff] %v6492_v14  ;;  %v6495_v12 = vld [vmem:[#allocation3 + $0x1a0] sm:$0xff]  ;;  %v6498_v51 = vld [vmem:[#allocation3 + $0x1b0] sm:$0xff] }
 0x9c6   :  { %7778 = vst [vmem:[#allocation137_spill] sm:$0xff] %v6495_v12  ;;  %7779 = vst [vmem:[#allocation139_spill] sm:$0xff] %v6498_v51 }
 0x9c8   :  { %2945 = vmatpush1.bf16.msra.mxu0 %v6483_v28  ;;  %2986 = vmatpush1.bf16.msra.mxu1 %v6486_v47  ;;  %v6501_v28 = vld [vmem:[#allocation3 + $0x1e8] sm:$0xff]  ;;  %v6504_v47 = vld [vmem:[#allocation3 + $0x1f8] sm:$0xff] }
 0x9c9   :  { %2946 = vmatprep.subr.bf16.mxu0 %v6489_v52  ;;  %2987 = vmatprep.subr.bf16.mxu1 %v6492_v14  ;;  %7780 = vst [vmem:[#allocation140_spill] sm:$0xff] %v6501_v28  ;;  %7781 = vst [vmem:[#allocation142_spill] sm:$0xff] %v6504_v47  ;;  %v6507_v52 = vld [vmem:[#allocation3 + $0x1e0] sm:$0xff]  ;;  %v6510_v14 = vld [vmem:[#allocation3 + $0x1f0] sm:$0xff] }
 0x9ca   :  { %7782 = vst [vmem:[#allocation141_spill] sm:$0xff] %v6507_v52  ;;  %7783 = vst [vmem:[#allocation143_spill] sm:$0xff] %v6510_v14 }
 0x9cc   :  { %2947 = vmatpush1.bf16.msra.mxu0 %v6495_v12  ;;  %2988 = vmatpush1.bf16.msra.mxu1 %v6498_v51  ;;  %v6513_v12 = vld [vmem:[#allocation3 + $0x228] sm:$0xff]  ;;  %v6516_v51 = vld [vmem:[#allocation3 + $0x238] sm:$0xff] }
 0x9cd   :  { %2948 = vmatprep.subr.bf16.mxu0 %v6501_v28  ;;  %2989 = vmatprep.subr.bf16.mxu1 %v6504_v47  ;;  %7784 = vst [vmem:[#allocation144_spill] sm:$0xff] %v6513_v12  ;;  %7785 = vst [vmem:[#allocation146_spill] sm:$0xff] %v6516_v51  ;;  %v6519_v28 = vld [vmem:[#allocation3 + $0x220] sm:$0xff]  ;;  %v6522_v47 = vld [vmem:[#allocation3 + $0x230] sm:$0xff] }
 0x9ce   :  { %7786 = vst [vmem:[#allocation145_spill] sm:$0xff] %v6519_v28  ;;  %7787 = vst [vmem:[#allocation147_spill] sm:$0xff] %v6522_v47 }
 0x9d0   :  { %2949 = vmatpush1.bf16.msra.mxu0 %v6507_v52  ;;  %2990 = vmatpush1.bf16.msra.mxu1 %v6510_v14  ;;  %v6525_v52 = vld [vmem:[#allocation3 + $0x268] sm:$0xff]  ;;  %v6528_v14 = vld [vmem:[#allocation3 + $0x278] sm:$0xff] }
 0x9d1   :  { %2950 = vmatprep.subr.bf16.mxu0 %v6513_v12  ;;  %2991 = vmatprep.subr.bf16.mxu1 %v6516_v51  ;;  %7788 = vst [vmem:[#allocation148_spill] sm:$0xff] %v6525_v52  ;;  %7789 = vst [vmem:[#allocation22_spill] sm:$0xff] %v6528_v14  ;;  %v6531_v12 = vld [vmem:[#allocation3 + $0x260] sm:$0xff]  ;;  %v6534_v51 = vld [vmem:[#allocation3 + $0x270] sm:$0xff] }
 0x9d2   :  { %7790 = vst [vmem:[#allocation24_spill] sm:$0xff] %v6531_v12  ;;  %7791 = vst [vmem:[#allocation21_spill] sm:$0xff] %v6534_v51 }
 0x9d4   :  { %2951 = vmatpush1.bf16.msra.mxu0 %v6519_v28  ;;  %2992 = vmatpush1.bf16.msra.mxu1 %v6522_v47  ;;  %v6537_v28 = vld [vmem:[#allocation3 + $0x2a8] sm:$0xff]  ;;  %v6540_v47 = vld [vmem:[#allocation3 + $0x2b8] sm:$0xff] }
 0x9d5   :  { %2952 = vmatprep.subr.bf16.mxu0 %v6525_v52  ;;  %2993 = vmatprep.subr.bf16.mxu1 %v6528_v14  ;;  %7792 = vst [vmem:[#allocation23_spill] sm:$0xff] %v6537_v28  ;;  %7793 = vst [vmem:[#allocation53_spill] sm:$0xff] %v6540_v47  ;;  %v6543_v52 = vld [vmem:[#allocation3 + $0x2a0] sm:$0xff]  ;;  %v6546_v14 = vld [vmem:[#allocation3 + $0x2b0] sm:$0xff] }
 0x9d6   :  { %7794 = vst [vmem:[#allocation55_spill] sm:$0xff] %v6543_v52  ;;  %7795 = vst [vmem:[#allocation54_spill] sm:$0xff] %v6546_v14 }
 0x9d8   :  { %2953 = vmatpush1.bf16.msra.mxu0 %v6531_v12  ;;  %2994 = vmatpush1.bf16.msra.mxu1 %v6534_v51  ;;  %v6549_v12 = vld [vmem:[#allocation3 + $0x2e8] sm:$0xff]  ;;  %v6552_v51 = vld [vmem:[#allocation3 + $0x2f8] sm:$0xff] }
 0x9d9   :  { %2954 = vmatprep.subr.bf16.mxu0 %v6537_v28  ;;  %2995 = vmatprep.subr.bf16.mxu1 %v6540_v47  ;;  %7796 = vst [vmem:[#allocation56_spill] sm:$0xff] %v6549_v12  ;;  %7797 = vst [vmem:[#allocation120_spill] sm:$0xff] %v6552_v51  ;;  %v6555_v28 = vld [vmem:[#allocation3 + $0x2e0] sm:$0xff]  ;;  %v6558_v47 = vld [vmem:[#allocation3 + $0x2f0] sm:$0xff] }
 0x9da   :  { %7798 = vst [vmem:[#allocation122_spill] sm:$0xff] %v6555_v28  ;;  %7799 = vst [vmem:[#allocation121_spill] sm:$0xff] %v6558_v47 }
 0x9dc   :  { %2955 = vmatpush1.bf16.msra.mxu0 %v6543_v52  ;;  %2996 = vmatpush1.bf16.msra.mxu1 %v6546_v14  ;;  %v6561_v52 = vld [vmem:[#allocation3 + $0x328] sm:$0xff]  ;;  %v6564_v14 = vld [vmem:[#allocation3 + $0x338] sm:$0xff] }
 0x9dd   :  { %2956 = vmatprep.subr.bf16.mxu0 %v6549_v12  ;;  %2997 = vmatprep.subr.bf16.mxu1 %v6552_v51  ;;  %7800 = vst [vmem:[#allocation123_spill] sm:$0xff] %v6561_v52  ;;  %7801 = vst [vmem:[#allocation124_spill] sm:$0xff] %v6564_v14  ;;  %v6567_v12 = vld [vmem:[#allocation3 + $0x320] sm:$0xff]  ;;  %v6570_v51 = vld [vmem:[#allocation3 + $0x330] sm:$0xff] }
 0x9de   :  { %7802 = vst [vmem:[#allocation126_spill] sm:$0xff] %v6567_v12  ;;  %7803 = vst [vmem:[#allocation125_spill] sm:$0xff] %v6570_v51 }
 0x9e0   :  { %2957 = vmatpush1.bf16.msra.mxu0 %v6555_v28  ;;  %2998 = vmatpush1.bf16.msra.mxu1 %v6558_v47  ;;  %v6573_v28 = vld [vmem:[#allocation3 + $0x368] sm:$0xff]  ;;  %v6576_v47 = vld [vmem:[#allocation3 + $0x378] sm:$0xff] }
 0x9e1   :  { %2958 = vmatprep.subr.bf16.mxu0 %v6561_v52  ;;  %2999 = vmatprep.subr.bf16.mxu1 %v6564_v14  ;;  %7804 = vst [vmem:[#allocation127_spill] sm:$0xff] %v6573_v28  ;;  %7805 = vst [vmem:[#allocation162_spill] sm:$0xff] %v6576_v47  ;;  %v6579_v52 = vld [vmem:[#allocation3 + $0x360] sm:$0xff]  ;;  %v6582_v14 = vld [vmem:[#allocation3 + $0x370] sm:$0xff] }
 0x9e2   :  { %7806 = vst [vmem:[#allocation161_spill] sm:$0xff] %v6579_v52  ;;  %7807 = vst [vmem:[#allocation164_spill] sm:$0xff] %v6582_v14 }
 0x9e4   :  { %2959 = vmatpush1.bf16.msra.mxu0 %v6567_v12  ;;  %3000 = vmatpush1.bf16.msra.mxu1 %v6570_v51  ;;  %v6585_v12 = vld [vmem:[#allocation3 + $0x3a8] sm:$0xff]  ;;  %v6588_v51 = vld [vmem:[#allocation3 + $0x3b8] sm:$0xff] }
 0x9e5   :  { %2960 = vmatprep.subr.bf16.mxu0 %v6573_v28  ;;  %3001 = vmatprep.subr.bf16.mxu1 %v6576_v47  ;;  %7808 = vst [vmem:[#allocation166_spill] sm:$0xff] %v6585_v12  ;;  %7809 = vst [vmem:[#allocation165_spill] sm:$0xff] %v6588_v51  ;;  %v6591_v28 = vld [vmem:[#allocation3 + $0x3a0] sm:$0xff]  ;;  %v6594_v47 = vld [vmem:[#allocation3 + $0x3b0] sm:$0xff] }
 0x9e8   :  { %2961 = vmatpush1.bf16.msra.mxu0 %v6579_v52  ;;  %3002 = vmatpush1.bf16.msra.mxu1 %v6582_v14  ;;  %v6597_v52 = vld [vmem:[#allocation3 + $0x3e8] sm:$0xff]  ;;  %v6600_v14 = vld [vmem:[#allocation3 + $0x3f8] sm:$0xff] }
 0x9e9   :  { %2962 = vmatprep.subr.bf16.mxu0 %v6585_v12  ;;  %3003 = vmatprep.subr.bf16.mxu1 %v6588_v51  ;;  %v6603_v12 = vld [vmem:[#allocation3 + $0x3e0] sm:$0xff]  ;;  %v6606_v51 = vld [vmem:[#allocation3 + $0x3f0] sm:$0xff] }
 0x9ec   :  { %2963 = vmatpush1.bf16.msra.mxu0 %v6591_v28  ;;  %3004 = vmatpush1.bf16.msra.mxu1 %v6594_v47 }
 0x9ed   :  { %2964 = vmatprep.subr.bf16.mxu0 %v6597_v52  ;;  %3005 = vmatprep.subr.bf16.mxu1 %v6600_v14 }
 0x9f0   :  { %2965 = vmatpush1.bf16.msra.mxu0 %v6603_v12  ;;  %3006 = vmatpush1.bf16.msra.mxu1 %v6606_v51 }
 0x9f1   :  { %3065 = vmatprep.subr.bf16.mxu0 %v6203_v33  ;;  %3106 = vmatprep.subr.bf16.mxu1 %v6206_v53  ;;  %v7810_v33 = vld [vmem:[#allocation153_spill] sm:$0xff]  ;;  %v7811_v53 = vld [vmem:[#allocation155_spill] sm:$0xff] }
 0x9f3   :  { %2967 = vmatmul.mubr.bf16.vlgmr.msra.gmra.mrb[92].mxu0 %v6419_v58  ;;  %3008 = vmatmul.mubr.bf16.vlgmr.msra.gmra.mrb[92].mxu1 %v6419_v58  ;;  %v7839_v58 = vld [vmem:[#allocation45_spill] sm:$0xff] }
 0x9f4   :  { %3066 = vmatpush1.bf16.msra.mxu0 %v6211_v62  ;;  %3107 = vmatpush1.bf16.msra.mxu1 %v6214_v44  ;;  %v7812_v62 = vld [vmem:[#allocation156_spill] sm:$0xff]  ;;  %v7813_v44 = vld [vmem:[#allocation158_spill] sm:$0xff] }
 0x9f5   :  { %3067 = vmatprep.subr.bf16.mxu0 %v6217_v8  ;;  %3108 = vmatprep.subr.bf16.mxu1 %v6220_v49  ;;  %v7814_v8 = vld [vmem:[#allocation157_spill] sm:$0xff]  ;;  %v7815_v49 = vld [vmem:[#allocation159_spill] sm:$0xff] }
 0x9f8   :  { %3068 = vmatpush1.bf16.msra.mxu0 %v6223_v4  ;;  %3109 = vmatpush1.bf16.msra.mxu1 %v6226_v48  ;;  %v7816_v4 = vld [vmem:[#allocation160_spill] sm:$0xff]  ;;  %v7817_v48 = vld [vmem:[#allocation163_spill] sm:$0xff] }
 0x9f9   :  { %3069 = vmatprep.subr.bf16.mxu0 %v6229_v50  ;;  %3110 = vmatprep.subr.bf16.mxu1 %v6232_v6  ;;  %v7818_v50 = vld [vmem:[#allocation30_spill] sm:$0xff]  ;;  %v7819_v6 = vld [vmem:[#allocation32_spill] sm:$0xff] }
 0x9fc   :  { %3070 = vmatpush1.bf16.msra.mxu0 %v6235_v59  ;;  %3111 = vmatpush1.bf16.msra.mxu1 %v6238_v18  ;;  %v7820_v59 = vld [vmem:[#allocation29_spill] sm:$0xff]  ;;  %v7821_v18 = vld [vmem:[#allocation31_spill] sm:$0xff] }
 0x9fd   :  { %3071 = vmatprep.subr.bf16.mxu0 %v6241_v23  ;;  %3112 = vmatprep.subr.bf16.mxu1 %v6244_v32  ;;  %v7822_v23 = vld [vmem:[#allocation61_spill] sm:$0xff]  ;;  %v7823_v32 = vld [vmem:[#allocation62_spill] sm:$0xff] }
 0xa00   :  { %3072 = vmatpush1.bf16.msra.mxu0 %v6247_v38  ;;  %3113 = vmatpush1.bf16.msra.mxu1 %v6250_v3  ;;  %v7824_v38 = vld [vmem:[#allocation63_spill] sm:$0xff]  ;;  %v7825_v3 = vld [vmem:[#allocation64_spill] sm:$0xff] }
 0xa01   :  { %3073 = vmatprep.subr.bf16.mxu0 %v6253_v20  ;;  %3114 = vmatprep.subr.bf16.mxu1 %v6256_v9  ;;  %v7826_v20 = vld [vmem:[#allocation34_spill] sm:$0xff]  ;;  %v7827_v9 = vld [vmem:[#allocation36_spill] sm:$0xff] }
 0xa04   :  { %3074 = vmatpush1.bf16.msra.mxu0 %v6259_v2  ;;  %3115 = vmatpush1.bf16.msra.mxu1 %v6262_v13  ;;  %v7828_v2 = vld [vmem:[#allocation33_spill] sm:$0xff]  ;;  %v7829_v13 = vld [vmem:[#allocation35_spill] sm:$0xff] }
 0xa05   :  { %3075 = vmatprep.subr.bf16.mxu0 %v6265_v10  ;;  %3116 = vmatprep.subr.bf16.mxu1 %v6268_v41  ;;  %v7830_v10 = vld [vmem:[#allocation65_spill] sm:$0xff]  ;;  %v7831_v41 = vld [vmem:[#allocation66_spill] sm:$0xff] }
 0xa08   :  { %3076 = vmatpush1.bf16.msra.mxu0 %v6271_v31  ;;  %3117 = vmatpush1.bf16.msra.mxu1 %v6274_v17  ;;  %v7832_v31 = vld [vmem:[#allocation67_spill] sm:$0xff]  ;;  %v7833_v17 = vld [vmem:[#allocation68_spill] sm:$0xff] }
 0xa09   :  { %3077 = vmatprep.subr.bf16.mxu0 %v6277_v40  ;;  %3118 = vmatprep.subr.bf16.mxu1 %v6280_v46  ;;  %v7834_v40 = vld [vmem:[#allocation110_spill] sm:$0xff]  ;;  %v7835_v46 = vld [vmem:[#allocation109_spill] sm:$0xff] }
 0xa0c   :  { %3078 = vmatpush1.bf16.msra.mxu0 %v6283_v36  ;;  %3119 = vmatpush1.bf16.msra.mxu1 %v6286_v42  ;;  %v7836_v36 = vld [vmem:[#allocation111_spill] sm:$0xff] }
 0xa0d   :  { %3079 = vmatprep.subr.bf16.mxu0 %v6289_v0  ;;  %3120 = vmatprep.subr.bf16.mxu1 %v6292_v45 }
 0xa10   :  { %3080 = vmatpush1.bf16.msra.mxu0 %v6295_v43  ;;  %3121 = vmatpush1.bf16.msra.mxu1 %v6298_v35 }
 0xa11   :  { %3081 = vmatprep.subr.bf16.mxu0 %v6301_v11  ;;  %3122 = vmatprep.subr.bf16.mxu1 %v6304_v21 }
 0xa14   :  { %3082 = vmatpush1.bf16.msra.mxu0 %v6307_v22  ;;  %3123 = vmatpush1.bf16.msra.mxu1 %v6310_v54  ;;  %v7837_v54 = vld [vmem:[#allocation46_spill] sm:$0xff] }
 0xa15   :  { %3083 = vmatprep.subr.bf16.mxu0 %v6313_v16  ;;  %3124 = vmatprep.subr.bf16.mxu1 %v6316_v39  ;;  %v7838_v39 = vld [vmem:[#allocation48_spill] sm:$0xff] }
 0xa18   :  { %3084 = vmatpush1.bf16.msra.mxu0 %v6319_v15  ;;  %3125 = vmatpush1.bf16.msra.mxu1 %v7810_v33 }
 0xa19   :  { %3085 = vmatprep.subr.bf16.mxu0 %v7811_v53  ;;  %3126 = vmatprep.subr.bf16.mxu1 %v7812_v62  ;;  %v7840_v53 = vld [vmem:[#allocation47_spill] sm:$0xff] }
 0xa1c   :  { %3086 = vmatpush1.bf16.msra.mxu0 %v7813_v44  ;;  %3127 = vmatpush1.bf16.msra.mxu1 %v7814_v8 }
 0xa1d   :  { %3087 = vmatprep.subr.bf16.mxu0 %v7815_v49  ;;  %3128 = vmatprep.subr.bf16.mxu1 %v7816_v4 }
 0xa20   :  { %3088 = vmatpush1.bf16.msra.mxu0 %v7817_v48  ;;  %3129 = vmatpush1.bf16.msra.mxu1 %v7818_v50 }
 0xa21   :  { %3089 = vmatprep.subr.bf16.mxu0 %v7819_v6  ;;  %3130 = vmatprep.subr.bf16.mxu1 %v7820_v59  ;;  %v7841_v6 = vld [vmem:[#allocation77_spill] sm:$0xff] }
 0xa24   :  { %3090 = vmatpush1.bf16.msra.mxu0 %v7821_v18  ;;  %3131 = vmatpush1.bf16.msra.mxu1 %v7822_v23 }
 0xa25   :  { %3091 = vmatprep.subr.bf16.mxu0 %v7823_v32  ;;  %3132 = vmatprep.subr.bf16.mxu1 %v7824_v38  ;;  %v7842_v32 = vld [vmem:[#allocation78_spill] sm:$0xff] }
 0xa28   :  { %3092 = vmatpush1.bf16.msra.mxu0 %v7825_v3  ;;  %3133 = vmatpush1.bf16.msra.mxu1 %v7826_v20  ;;  %v7843_v3 = vld [vmem:[#allocation79_spill] sm:$0xff] }
 0xa29   :  { %3093 = vmatprep.subr.bf16.mxu0 %v7827_v9  ;;  %3134 = vmatprep.subr.bf16.mxu1 %v7828_v2 }
 0xa2c   :  { %3094 = vmatpush1.bf16.msra.mxu0 %v7829_v13  ;;  %3135 = vmatpush1.bf16.msra.mxu1 %v7830_v10  ;;  %v7844_v10 = vld [vmem:[#allocation80_spill] sm:$0xff] }
 0xa2d   :  { %3095 = vmatprep.subr.bf16.mxu0 %v7831_v41  ;;  %3136 = vmatprep.subr.bf16.mxu1 %v7832_v31 }
 0xa30   :  { %3096 = vmatpush1.bf16.msra.mxu0 %v7833_v17  ;;  %3137 = vmatpush1.bf16.msra.mxu1 %v7834_v40 }
 0xa31   :  { %3147 = vmatprep.subr.bf16.mxu0 %v7835_v46  ;;  %3188 = vmatprep.subr.bf16.mxu1 %v7836_v36 }
 0xa86   :  { %v2886_v42 = vpop.f32.mrb[88].mxu0  ;;  %v2927_v0 = vpop.f32.mrb[88].mxu1 }
 0xa87   :  { %v2888_v45 = vpop.f32.mrb[89].mxu0  ;;  %v2929_v43 = vpop.f32.mrb[89].mxu1  ;;  %v2928_v16 = vadd.f32 %v2927_v0, %v7837_v54  ;;  %v2887_v33 = vadd.f32 %v2886_v42, %v7839_v58 }
 0xa88   :  { %v2890_v35 = vpop.f32.mrb[90].mxu0  ;;  %v2931_v11 = vpop.f32.mrb[90].mxu1  ;;  %v2930_v15 = vadd.f32 %v2929_v43, %v7838_v39  ;;  %v2889_v62 = vadd.f32 %v2888_v45, %v7840_v53 }
 0xa89   :  { %v2891_v21 = vpop.f32.mrb[91].mxu0  ;;  %v2932_v22 = vpop.f32.mrb[91].mxu1  ;;  %v3024_v44 = vmul.f32 0.5, %v2928_v16  ;;  %v3016_v49 = vmul.f32 0.5, %v2887_v33 }
 0xa8a   :  { %v3025_v8 = vmul.f32 0.5, %v2930_v15  ;;  %v3017_v4 = vmul.f32 0.5, %v2889_v62 }
 0xa8b   :  { %3971 = vtanh.f32 %v3024_v44 }
 0xa8c   :  { %3973 = vtanh.f32 %v3025_v8 }
 0xa8d   :  { %3975 = vtanh.f32 %v3016_v49 }
 0xa8e   :  { %3977 = vtanh.f32 %v3017_v4 }
 0xa95   :  { %v3972_v13 = vpop.eup %3971 }
 0xa96   :  { %v3974_v40 = vpop.eup %3973  ;;  %v3028_v42 = vmul.f32 0.5, %v3972_v13  ;;  %v7865_v13 = vld [vmem:[#allocation24_spill] sm:$0xff] }
 0xa97   :  { %v3976_v46 = vpop.eup %3975  ;;  %v3029_v45 = vmul.f32 0.5, %v3974_v40  ;;  %v7870_v40 = vld [vmem:[#allocation54_spill] sm:$0xff] }
 0xa98   :  { %v3978_v36 = vpop.eup %3977  ;;  %v3020_v35 = vmul.f32 0.5, %v3976_v46  ;;  %v3030_v21 = vadd.f32 0.5, %v3028_v42  ;;  %v7871_v46 = vld [vmem:[#allocation56_spill] sm:$0xff]  ;;  %v7873_v42 = vld [vmem:[#allocation122_spill] sm:$0xff] }
 0xa99   :  { %v3021_v11 = vmul.f32 0.5, %v3978_v36  ;;  %v3031_v22 = vadd.f32 0.5, %v3029_v45  ;;  %v7872_v36 = vld [vmem:[#allocation120_spill] sm:$0xff]  ;;  %v7875_v45 = vld [vmem:[#allocation123_spill] sm:$0xff] }
 0xa9a   :  { %v3022_v54 = vadd.f32 0.5, %v3020_v35  ;;  %v3042_v58 = vmul.f32 %v3030_v21, %v6413_v29  ;;  %v7877_v35 = vld [vmem:[#allocation126_spill] sm:$0xff]  ;;  %v7879_v21 = vld [vmem:[#allocation127_spill] sm:$0xff] }
 0xa9b   :  { %v3023_v39 = vadd.f32 0.5, %v3021_v11  ;;  %v3043_v53 = vmul.f32 %v3031_v22, %v6415_v56  ;;  %v7878_v11 = vld [vmem:[#allocation125_spill] sm:$0xff]  ;;  %v7880_v22 = vld [vmem:[#allocation162_spill] sm:$0xff] }
 0xac6   :  { %v2968_v48 = vpop.f32.mrb[92].mxu0  ;;  %v3009_v50 = vpop.f32.mrb[92].mxu1 }
 0xac7   :  { %v2969_v59 = vadd.f32 %v2968_v48, %v7841_v6  ;;  %v2970_v18 = vpop.f32.mrb[93].mxu0  ;;  %v3011_v23 = vpop.f32.mrb[93].mxu1  ;;  %v3010_v38 = vadd.f32 %v3009_v50, %v7842_v32 }
 0xac8   :  { %v2971_v20 = vadd.f32 %v2970_v18, %v7843_v3  ;;  %v2972_v9 = vpop.f32.mrb[94].mxu0  ;;  %v3013_v2 = vpop.f32.mrb[94].mxu1  ;;  %v3012_v41 = vadd.f32 %v3011_v23, %v7844_v10  ;;  %v7861_v3 = vld [vmem:[#allocation145_spill] sm:$0xff] }
 0xac9   :  { %3979 = vtanh.f32 %v2969_v59  ;;  %v2973_v31 = vpop.f32.mrb[95].mxu0  ;;  %v3014_v17 = vpop.f32.mrb[95].mxu1  ;;  %v3034_v0 = vmul.f32 0.5, %v3010_v38  ;;  %v7863_v9 = vld [vmem:[#allocation148_spill] sm:$0xff]  ;;  %v7864_v2 = vld [vmem:[#allocation22_spill] sm:$0xff]  ;;  %v7866_v10 = vld [vmem:[#allocation21_spill] sm:$0xff] }
 0xaca   :  { %3981 = vtanh.f32 %v2971_v20  ;;  %v3035_v43 = vmul.f32 0.5, %v3012_v41  ;;  %v7862_v20 = vld [vmem:[#allocation147_spill] sm:$0xff]  ;;  %v7868_v31 = vld [vmem:[#allocation53_spill] sm:$0xff] }
 0xacb   :  { %3983 = vtanh.f32 %v3034_v0  ;;  %v7867_v41 = vld [vmem:[#allocation23_spill] sm:$0xff]  ;;  %v7874_v0 = vld [vmem:[#allocation121_spill] sm:$0xff] }
 0xacc   :  { %3985 = vtanh.f32 %v3035_v43  ;;  %v7869_v17 = vld [vmem:[#allocation55_spill] sm:$0xff]  ;;  %v7876_v43 = vld [vmem:[#allocation124_spill] sm:$0xff] }
 0xad3   :  { %v3980_v16 = vpop.eup %3979 }
 0xad4   :  { %v3982_v15 = vpop.eup %3981  ;;  %v3044_v33 = vmul.f32 %v3980_v16, %v3022_v54  ;;  %v7881_v54 = vld [vmem:[#allocation161_spill] sm:$0xff]  ;;  %v7882_v16 = vld [vmem:[#allocation164_spill] sm:$0xff] }
 0xad5   :  { %v3045_v62 = vmul.f32 %v3982_v15, %v3023_v39  ;;  %v3984_v49 = vpop.eup %3983  ;;  %v7883_v39 = vld [vmem:[#allocation166_spill] sm:$0xff]  ;;  %v7884_v15 = vld [vmem:[#allocation165_spill] sm:$0xff] }
 0xad6   :  { %v6687_v44 = vadd.f32 %v3044_v33, %v3042_v58  ;;  %v3986_v4 = vpop.eup %3985  ;;  %v3038_v48 = vmul.f32 0.5, %v3984_v49  ;;  %v7885_v58 = vld [vmem:[#allocation86_spill] sm:$0xff]  ;;  %v3313_v33 = vld [vmem:[#allocation11 + $0x80] sm:$0xff]  ;;  %v3298_v49 = vld [vmem:[#allocation11 + $0x8] sm:$0xff] }
 0xad7   :  { %v6689_v8 = vadd.f32 %v3045_v62, %v3043_v53  ;;  %v3039_v50 = vmul.f32 0.5, %v3986_v4  ;;  %v3314_v53 = vld [vmem:[#allocation11 + $0x88] sm:$0xff] }
 0xad8   :  { %3987 = vtanh.f32 %v6687_v44  ;;  %v3040_v6 = vadd.f32 0.5, %v3038_v48  ;;  %v3731_v62 = vpack.c.bf16 %v3314_v53, %v3313_v33  ;;  %v3265_v48 = vld [vmem:[#allocation10] sm:$0xff]  ;;  %v3307_v53 = vld [vmem:[#allocation11 + $0x50] sm:$0xff] }
 0xad9   :  { %3989 = vtanh.f32 %v6689_v8  ;;  %v3041_v18 = vadd.f32 0.5, %v3039_v50 }
 0xae2   :  { %v3988_v59 = vpop.eup %3987 }
 0xae3   :  { %v3990_v29 = vpop.eup %3989  ;;  %v3050_v23 = vmul.f32 %v3988_v59, %v3040_v6  ;;  %v3316_v6 = vld [vmem:[#allocation11 + $0x98] sm:$0xff] }
 0xae4   :  { %v3051_v32 = vmul.f32 %v3990_v29, %v3041_v18  ;;  %v3299_v18 = vld [vmem:[#allocation11 + $0x10] sm:$0xff]  ;;  %v3300_v29 = vld [vmem:[#allocation11 + $0x18] sm:$0xff] }
 0xae5   :  { %v6693_v38 = vpack.c.bf16 %v3050_v23, %v3050_v23  ;;  %v3283_v23 = vld [vmem:[#allocation10 + $0x90] sm:$0xff] }
 0xae6   :  { %v3053_v56 = vpack.c.bf16 %v3051_v32, %v3051_v32  ;;  %v3737_v32 = vpack.c.bf16 %v3300_v29, %v3299_v18  ;;  %v3293_v18 = vld [vmem:[#allocation10 + $0xe0] sm:$0xff] }
 0xae8   :  { %3097 = vmatprep.mubr.bf16.mxu0 %v3053_v56  ;;  %3138 = vmatprep.mubr.bf16.mxu1 %v3053_v56 }
 0xae9   :  { %3098 = vmatmul.mubr.bf16.vlgmr.msra.gmra.mrb[96].mxu0 %v6693_v38  ;;  %3139 = vmatmul.mubr.bf16.vlgmr.msra.gmra.mrb[96].mxu1 %v6693_v38 }
 0xaea   :  { %3148 = vmatpush1.bf16.msra.mxu0 %v6423_v60  ;;  %3189 = vmatpush1.bf16.msra.mxu1 %v6426_v25  ;;  %v7845_v60 = vld [vmem:[#allocation112_spill] sm:$0xff]  ;;  %v7846_v25 = vld [vmem:[#allocation114_spill] sm:$0xff] }
 0xaeb   :  { %3179 = vmatprep.mubr.bf16.mxu0 %v3053_v56  ;;  %3220 = vmatprep.mubr.bf16.mxu1 %v3053_v56  ;;  %v3284_v56 = vld [vmem:[#allocation10 + $0x98] sm:$0xff] }
 0xaec   :  { %3149 = vmatprep.subr.bf16.mxu0 %v6429_v57  ;;  %3190 = vmatprep.subr.bf16.mxu1 %v6432_v37  ;;  %v7847_v57 = vld [vmem:[#allocation113_spill] sm:$0xff]  ;;  %v7848_v37 = vld [vmem:[#allocation115_spill] sm:$0xff] }
 0xaee   :  { %3150 = vmatpush1.bf16.msra.mxu0 %v6435_v24  ;;  %3191 = vmatpush1.bf16.msra.mxu1 %v6438_v19  ;;  %v7849_v24 = vld [vmem:[#allocation116_spill] sm:$0xff]  ;;  %v7850_v19 = vld [vmem:[#allocation118_spill] sm:$0xff] }
 0xaef   :  { %3151 = vmatprep.subr.bf16.mxu0 %v6441_v34  ;;  %3192 = vmatprep.subr.bf16.mxu1 %v6444_v30  ;;  %v7851_v34 = vld [vmem:[#allocation117_spill] sm:$0xff]  ;;  %v7852_v30 = vld [vmem:[#allocation119_spill] sm:$0xff] }
 0xaf2   :  { %3152 = vmatpush1.bf16.msra.mxu0 %v6447_v27  ;;  %3193 = vmatpush1.bf16.msra.mxu1 %v6450_v55  ;;  %v7853_v27 = vld [vmem:[#allocation137_spill] sm:$0xff]  ;;  %v7854_v55 = vld [vmem:[#allocation139_spill] sm:$0xff] }
 0xaf3   :  { %3153 = vmatprep.subr.bf16.mxu0 %v6453_v63  ;;  %3194 = vmatprep.subr.bf16.mxu1 %v6456_v26  ;;  %v7855_v63 = vld [vmem:[#allocation140_spill] sm:$0xff]  ;;  %v7856_v26 = vld [vmem:[#allocation142_spill] sm:$0xff] }
 0xaf6   :  { %3154 = vmatpush1.bf16.msra.mxu0 %v6459_v5  ;;  %3195 = vmatpush1.bf16.msra.mxu1 %v6462_v61  ;;  %v7857_v5 = vld [vmem:[#allocation141_spill] sm:$0xff]  ;;  %v7858_v61 = vld [vmem:[#allocation143_spill] sm:$0xff] }
 0xaf7   :  { %3155 = vmatprep.subr.bf16.mxu0 %v6465_v7  ;;  %3196 = vmatprep.subr.bf16.mxu1 %v6468_v1  ;;  %v7859_v7 = vld [vmem:[#allocation144_spill] sm:$0xff]  ;;  %v7860_v1 = vld [vmem:[#allocation146_spill] sm:$0xff] }
 0xafa   :  { %3156 = vmatpush1.bf16.msra.mxu0 %v7845_v60  ;;  %3197 = vmatpush1.bf16.msra.mxu1 %v7846_v25  ;;  %v3268_v60 = vld [vmem:[#allocation10 + $0x18] sm:$0xff]  ;;  %v3767_v25 = vpack.c.bf16 %v3284_v56, %v3283_v23  ;;  %v3294_v23 = vld [vmem:[#allocation10 + $0xe8] sm:$0xff] }
 0xafb   :  { %3157 = vmatprep.subr.bf16.mxu0 %v7847_v57  ;;  %3198 = vmatprep.subr.bf16.mxu1 %v7848_v37  ;;  %v3317_v37 = vld [vmem:[#allocation11 + $0xa0] sm:$0xff]  ;;  %v3278_v56 = vld [vmem:[#allocation10 + $0x68] sm:$0xff] }
 0xafe   :  { %3158 = vmatpush1.bf16.msra.mxu0 %v7849_v24  ;;  %3199 = vmatpush1.bf16.msra.mxu1 %v7850_v19  ;;  %v3318_v24 = vld [vmem:[#allocation11 + $0xa8] sm:$0xff] }
 0xaff   :  { %3159 = vmatprep.subr.bf16.mxu0 %v7851_v34  ;;  %3200 = vmatprep.subr.bf16.mxu1 %v7852_v30  ;;  %v3739_v19 = vpack.c.bf16 %v3318_v24, %v3317_v37  ;;  %v3301_v34 = vld [vmem:[#allocation11 + $0x20] sm:$0xff]  ;;  %v3302_v30 = vld [vmem:[#allocation11 + $0x28] sm:$0xff]  ;;  %v3311_v24 = vld [vmem:[#allocation11 + $0x70] sm:$0xff] }
 0xb02   :  { %3160 = vmatpush1.bf16.msra.mxu0 %v7853_v27  ;;  %3201 = vmatpush1.bf16.msra.mxu1 %v7854_v55  ;;  %v3285_v27 = vld [vmem:[#allocation10 + $0xa0] sm:$0xff]  ;;  %v3741_v55 = vpack.c.bf16 %v3302_v30, %v3301_v34  ;;  %v3295_v34 = vld [vmem:[#allocation10 + $0xf0] sm:$0xff] }
 0xb03   :  { %3161 = vmatprep.subr.bf16.mxu0 %v7855_v63  ;;  %3202 = vmatprep.subr.bf16.mxu1 %v7856_v26  ;;  %v3286_v63 = vld [vmem:[#allocation10 + $0xa8] sm:$0xff]  ;;  %v3269_v26 = vld [vmem:[#allocation10 + $0x20] sm:$0xff] }
 0xb06   :  { %3162 = vmatpush1.bf16.msra.mxu0 %v7857_v5  ;;  %3203 = vmatpush1.bf16.msra.mxu1 %v7858_v61  ;;  %v3270_v5 = vld [vmem:[#allocation10 + $0x28] sm:$0xff]  ;;  %v3771_v61 = vpack.c.bf16 %v3286_v63, %v3285_v27  ;;  %v3296_v27 = vld [vmem:[#allocation10 + $0xf8] sm:$0xff] }
 0xb07   :  { %3163 = vmatprep.subr.bf16.mxu0 %v7859_v7  ;;  %3204 = vmatprep.subr.bf16.mxu1 %v7860_v1  ;;  %v3773_v7 = vpack.c.bf16 %v3270_v5, %v3269_v26  ;;  %v3319_v1 = vld [vmem:[#allocation11 + $0xb0] sm:$0xff]  ;;  %v3280_v63 = vld [vmem:[#allocation10 + $0x78] sm:$0xff]  ;;  %v3791_v26 = vpack.c.bf16 %v3296_v27, %v3295_v34 }
 0xb0a   :  { %3164 = vmatpush1.bf16.msra.mxu0 %v7861_v3  ;;  %3205 = vmatpush1.bf16.msra.mxu1 %v7862_v20  ;;  %v3320_v3 = vld [vmem:[#allocation11 + $0xb8] sm:$0xff] }
 0xb0b   :  { %3165 = vmatprep.subr.bf16.mxu0 %v7863_v9  ;;  %3206 = vmatprep.subr.bf16.mxu1 %v7864_v2  ;;  %v3743_v20 = vpack.c.bf16 %v3320_v3, %v3319_v1  ;;  %v3303_v9 = vld [vmem:[#allocation11 + $0x30] sm:$0xff]  ;;  %v3304_v2 = vld [vmem:[#allocation11 + $0x38] sm:$0xff] }
 0xb0e   :  { %3166 = vmatpush1.bf16.msra.mxu0 %v7865_v13  ;;  %3207 = vmatpush1.bf16.msra.mxu1 %v7866_v10  ;;  %v3287_v13 = vld [vmem:[#allocation10 + $0xb0] sm:$0xff]  ;;  %v3745_v10 = vpack.c.bf16 %v3304_v2, %v3303_v9 }
 0xb0f   :  { %3167 = vmatprep.subr.bf16.mxu0 %v7867_v41  ;;  %3208 = vmatprep.subr.bf16.mxu1 %v7868_v31  ;;  %v3288_v41 = vld [vmem:[#allocation10 + $0xb8] sm:$0xff]  ;;  %v3271_v31 = vld [vmem:[#allocation10 + $0x30] sm:$0xff] }
 0xb12   :  { %3168 = vmatpush1.bf16.msra.mxu0 %v7869_v17  ;;  %3209 = vmatpush1.bf16.msra.mxu1 %v7870_v40  ;;  %v3272_v17 = vld [vmem:[#allocation10 + $0x38] sm:$0xff]  ;;  %v3775_v40 = vpack.c.bf16 %v3288_v41, %v3287_v13  ;;  %v7887_v41 = vld [vmem:[#allocation50_spill] sm:$0xff] }
 0xb13   :  { %3169 = vmatprep.subr.bf16.mxu0 %v7871_v46  ;;  %3210 = vmatprep.subr.bf16.mxu1 %v7872_v36  ;;  %v3777_v46 = vpack.c.bf16 %v3272_v17, %v3271_v31  ;;  %v3321_v36 = vld [vmem:[#allocation11 + $0xc0] sm:$0xff] }
 0xb14   :  { %v7888_v17 = vld [vmem:[#allocation52_spill] sm:$0xff] }
 0xb16   :  { %3170 = vmatpush1.bf16.msra.mxu0 %v7873_v42  ;;  %3211 = vmatpush1.bf16.msra.mxu1 %v7874_v0  ;;  %v3322_v42 = vld [vmem:[#allocation11 + $0xc8] sm:$0xff] }
 0xb17   :  { %3171 = vmatprep.subr.bf16.mxu0 %v7875_v45  ;;  %3212 = vmatprep.subr.bf16.mxu1 %v7876_v43  ;;  %v3747_v0 = vpack.c.bf16 %v3322_v42, %v3321_v36  ;;  %v3305_v45 = vld [vmem:[#allocation11 + $0x40] sm:$0xff]  ;;  %v3306_v43 = vld [vmem:[#allocation11 + $0x48] sm:$0xff]  ;;  %v7890_v42 = vld [vmem:[#allocation51_spill] sm:$0xff] }
 0xb1a   :  { %3172 = vmatpush1.bf16.msra.mxu0 %v7877_v35  ;;  %3213 = vmatpush1.bf16.msra.mxu1 %v7878_v11  ;;  %v3289_v35 = vld [vmem:[#allocation10 + $0xc0] sm:$0xff]  ;;  %v3749_v11 = vpack.c.bf16 %v3306_v43, %v3305_v45 }
 0xb1b   :  { %3173 = vmatprep.subr.bf16.mxu0 %v7879_v21  ;;  %3214 = vmatprep.subr.bf16.mxu1 %v7880_v22  ;;  %v3290_v21 = vld [vmem:[#allocation10 + $0xc8] sm:$0xff]  ;;  %v3273_v22 = vld [vmem:[#allocation10 + $0x40] sm:$0xff] }
 0xb1e   :  { %3174 = vmatpush1.bf16.msra.mxu0 %v7881_v54  ;;  %3215 = vmatpush1.bf16.msra.mxu1 %v7882_v16  ;;  %v3274_v54 = vld [vmem:[#allocation10 + $0x48] sm:$0xff]  ;;  %v3779_v16 = vpack.c.bf16 %v3290_v21, %v3289_v35 }
 0xb1f   :  { %3175 = vmatprep.subr.bf16.mxu0 %v7883_v39  ;;  %3216 = vmatprep.subr.bf16.mxu1 %v7884_v15  ;;  %v3781_v39 = vpack.c.bf16 %v3274_v54, %v3273_v22  ;;  %v3323_v15 = vld [vmem:[#allocation11 + $0xd0] sm:$0xff]  ;;  %v7891_v54 = vld [vmem:[#allocation81_spill] sm:$0xff] }
 0xb22   :  { %3176 = vmatpush1.bf16.msra.mxu0 %v6591_v28  ;;  %3217 = vmatpush1.bf16.msra.mxu1 %v6594_v47  ;;  %v3297_v28 = vld [vmem:[#allocation11] sm:$0xff] }
 0xb23   :  { %3177 = vmatprep.subr.bf16.mxu0 %v6597_v52  ;;  %3218 = vmatprep.subr.bf16.mxu1 %v6600_v14  ;;  %v3281_v47 = vld [vmem:[#allocation10 + $0x80] sm:$0xff]  ;;  %v3733_v4 = vpack.c.bf16 %v3298_v49, %v3297_v28  ;;  %v3282_v52 = vld [vmem:[#allocation10 + $0x88] sm:$0xff]  ;;  %v3291_v28 = vld [vmem:[#allocation10 + $0xd0] sm:$0xff] }
 0xb24   :  { %v3266_v14 = vld [vmem:[#allocation10 + $0x8] sm:$0xff] }
 0xb25   :  { %v3765_v50 = vpack.c.bf16 %v3266_v14, %v3265_v48 }
 0xb26   :  { %3178 = vmatpush1.bf16.msra.mxu0 %v6603_v12  ;;  %3219 = vmatpush1.bf16.msra.mxu1 %v6606_v51  ;;  %v3763_v12 = vpack.c.bf16 %v3282_v52, %v3281_v47  ;;  %v3315_v51 = vld [vmem:[#allocation11 + $0x90] sm:$0xff]  ;;  %v3292_v47 = vld [vmem:[#allocation10 + $0xd8] sm:$0xff] }
 0xb27   :  { %3732 = vmatprep.subr.bf16.mxu0 %v3731_v62  ;;  %v3735_v59 = vpack.c.bf16 %v3316_v6, %v3315_v51  ;;  %v3308_v62 = vld [vmem:[#allocation11 + $0x58] sm:$0xff]  ;;  %v3783_v48 = vpack.c.bf16 %v3292_v47, %v3291_v28  ;;  %v3309_v6 = vld [vmem:[#allocation11 + $0x60] sm:$0xff] }
 0xb28   :  { %3764 = vmatprep.subr.bf16.mxu1 %v3763_v12  ;;  %v3753_v49 = vpack.c.bf16 %v3308_v62, %v3307_v53  ;;  %v3276_v52 = vld [vmem:[#allocation10 + $0x58] sm:$0xff]  ;;  %v3325_v12 = vld [vmem:[#allocation11 + $0xe0] sm:$0xff] }
 0xb29   :  { %3180 = vmatmul.mubr.bf16.vlgmr.msra.gmra.mrb[100].mxu0 %v6693_v38  ;;  %3221 = vmatmul.mubr.bf16.vlgmr.msra.gmra.mrb[100].mxu1 %v6693_v38  ;;  %v3267_v38 = vld [vmem:[#allocation10 + $0x10] sm:$0xff]  ;;  %v7893_v53 = vld [vmem:[#allocation83_spill] sm:$0xff] }
 0xb2a   :  { %3393 = vmatprep.mubr.f32.mxu0 %v7885_v58  ;;  %3734 = vmatpush3.bf16.msra.mxu0 %v3733_v4  ;;  %v3769_v57 = vpack.c.bf16 %v3268_v60, %v3267_v38  ;;  %v3324_v58 = vld [vmem:[#allocation11 + $0xd8] sm:$0xff]  ;;  %v3275_v4 = vld [vmem:[#allocation10 + $0x50] sm:$0xff]  ;;  %v3787_v38 = vpack.c.bf16 %v3294_v23, %v3293_v18 }
 0xb2b   :  { %3766 = vmatpush3.bf16.msra.mxu1 %v3765_v50  ;;  %3736 = vmatprep.subr.bf16.mxu0 %v3735_v59  ;;  %v3751_v33 = vpack.c.bf16 %v3324_v58, %v3323_v15  ;;  %v3785_v14 = vpack.c.bf16 %v3276_v52, %v3275_v4  ;;  %v3326_v50 = vld [vmem:[#allocation11 + $0xe8] sm:$0xff]  ;;  %v7892_v58 = vld [vmem:[#allocation82_spill] sm:$0xff]  ;;  %v7894_v4 = vld [vmem:[#allocation84_spill] sm:$0xff] }
 0xb2c   :  { %3768 = vmatprep.subr.bf16.mxu1 %v3767_v25  ;;  %v3755_v51 = vpack.c.bf16 %v3326_v50, %v3325_v12  ;;  %v3310_v59 = vld [vmem:[#allocation11 + $0x68] sm:$0xff]  ;;  %v3327_v25 = vld [vmem:[#allocation11 + $0xf0] sm:$0xff] }
 0xb2d   :  { %v3757_v29 = vpack.c.bf16 %v3310_v59, %v3309_v6 }
 0xb2e   :  { %3738 = vmatpush3.bf16.msra.mxu0 %v3737_v32  ;;  %v3277_v32 = vld [vmem:[#allocation10 + $0x60] sm:$0xff] }
 0xb2f   :  { %3770 = vmatpush3.bf16.msra.mxu1 %v3769_v57  ;;  %3740 = vmatprep.subr.bf16.mxu0 %v3739_v19  ;;  %v3789_v60 = vpack.c.bf16 %v3278_v56, %v3277_v32  ;;  %v3328_v57 = vld [vmem:[#allocation11 + $0xf8] sm:$0xff] }
 0xb30   :  { %3772 = vmatprep.subr.bf16.mxu1 %v3771_v61  ;;  %v3759_v37 = vpack.c.bf16 %v3328_v57, %v3327_v25  ;;  %v3312_v19 = vld [vmem:[#allocation11 + $0x78] sm:$0xff]  ;;  %v7886_v61 = vld [vmem:[#allocation85_spill] sm:$0xff] }
 0xb31   :  { %v3761_v30 = vpack.c.bf16 %v3312_v19, %v3311_v24 }
 0xb32   :  { %3742 = vmatpush3.bf16.msra.mxu0 %v3741_v55  ;;  %v3279_v55 = vld [vmem:[#allocation10 + $0x70] sm:$0xff] }
 0xb33   :  { %3774 = vmatpush3.bf16.msra.mxu1 %v3773_v7  ;;  %3744 = vmatprep.subr.bf16.mxu0 %v3743_v20  ;;  %v3793_v5 = vpack.c.bf16 %v3280_v63, %v3279_v55 }
 0xb34   :  { %3776 = vmatprep.subr.bf16.mxu1 %v3775_v40 }
 0xb36   :  { %3746 = vmatpush3.bf16.msra.mxu0 %v3745_v10 }
 0xb37   :  { %3778 = vmatpush3.bf16.msra.mxu1 %v3777_v46  ;;  %3748 = vmatprep.subr.bf16.mxu0 %v3747_v0  ;;  %v7889_v46 = vld [vmem:[#allocation49_spill] sm:$0xff] }
 0xb38   :  { %3780 = vmatprep.subr.bf16.mxu1 %v3779_v16 }
 0xb3a   :  { %3750 = vmatpush3.bf16.msra.mxu0 %v3749_v11 }
 0xb3b   :  { %3782 = vmatpush3.bf16.msra.mxu1 %v3781_v39  ;;  %3752 = vmatprep.subr.bf16.mxu0 %v3751_v33 }
 0xb3c   :  { %3784 = vmatprep.subr.bf16.mxu1 %v3783_v48 }
 0xb3e   :  { %3754 = vmatpush3.bf16.msra.mxu0 %v3753_v49 }
 0xb3f   :  { %3786 = vmatpush3.bf16.msra.mxu1 %v3785_v14  ;;  %3756 = vmatprep.subr.bf16.mxu0 %v3755_v51 }
 0xb40   :  { %3788 = vmatprep.subr.bf16.mxu1 %v3787_v38 }
 0xb42   :  { %3758 = vmatpush3.bf16.msra.mxu0 %v3757_v29 }
 0xb43   :  { %3790 = vmatpush3.bf16.msra.mxu1 %v3789_v60  ;;  %3760 = vmatprep.subr.bf16.mxu0 %v3759_v37 }
 0xb44   :  { %3792 = vmatprep.subr.bf16.mxu1 %v3791_v26 }
 0xb46   :  { %3762 = vmatpush3.bf16.msra.mxu0 %v3761_v30 }
 0xb47   :  { %3794 = vmatpush3.bf16.msra.mxu1 %v3793_v5 }
 0xb49   :  { %3394 = vmatmul.mubr.f32.vlgmr.msra.gmra.mrb[104].mxu0 %v7886_v61 }
 0xbbc   :  { %v3099_v7 = vpop.f32.mrb[96].mxu0  ;;  %v3140_v1 = vpop.f32.mrb[96].mxu1 }
 0xbbd   :  { %v3101_v3 = vpop.f32.mrb[97].mxu0  ;;  %v3142_v20 = vpop.f32.mrb[97].mxu1  ;;  %v3141_v31 = vadd.f32 %v3140_v1, %v7887_v41  ;;  %v3100_v36 = vadd.f32 %v3099_v7, %v7889_v46 }
 0xbbe   :  { %v3103_v9 = vpop.f32.mrb[98].mxu0  ;;  %v3144_v2 = vpop.f32.mrb[98].mxu1  ;;  %v3143_v40 = vadd.f32 %v3142_v20, %v7888_v17  ;;  %v3102_v0 = vadd.f32 %v3101_v3, %v7890_v42  ;;  %v3659_v17 = vld [vmem:[%s6794_s6] ss:$0 sm:$0xff] }
 0xbbf   :  { %v3104_v13 = vpop.f32.mrb[99].mxu0  ;;  %v3145_v10 = vpop.f32.mrb[99].mxu1  ;;  %v3237_v45 = vmul.f32 0.5, %v3141_v31  ;;  %v3229_v35 = vmul.f32 0.5, %v3100_v36 }
 0xbc0   :  { %v3238_v43 = vmul.f32 0.5, %v3143_v40  ;;  %v3230_v11 = vmul.f32 0.5, %v3102_v0 }
 0xbc1   :  { %3991 = vtanh.f32 %v3237_v45 }
 0xbc2   :  { %3993 = vtanh.f32 %v3238_v43 }
 0xbc3   :  { %3995 = vtanh.f32 %v3229_v35 }
 0xbc4   :  { %3997 = vtanh.f32 %v3230_v11 }
 0xbcb   :  { %v3992_v47 = vpop.eup %3991 }
 0xbcc   :  { %v3994_v12 = vpop.eup %3993  ;;  %v3241_v6 = vmul.f32 0.5, %v3992_v47 }
 0xbcd   :  { %v3996_v50 = vpop.eup %3995  ;;  %v3242_v18 = vmul.f32 0.5, %v3994_v12 }
 0xbce   :  { %v3998_v51 = vpop.eup %3997  ;;  %v3233_v23 = vmul.f32 0.5, %v3996_v50  ;;  %v3243_v56 = vadd.f32 0.5, %v3241_v6 }
 0xbcf   :  { %v3234_v32 = vmul.f32 0.5, %v3998_v51  ;;  %v3244_v38 = vadd.f32 0.5, %v3242_v18 }
 0xbd0   :  { %v3235_v60 = vadd.f32 0.5, %v3233_v23  ;;  %v3255_v24 = vmul.f32 %v3243_v56, %v6687_v44 }
 0xbd1   :  { %v3236_v57 = vadd.f32 0.5, %v3234_v32  ;;  %v3256_v34 = vmul.f32 %v3244_v38, %v6689_v8 }
 0xbfc   :  { %v3181_v21 = vpop.f32.mrb[100].mxu0  ;;  %v3222_v22 = vpop.f32.mrb[100].mxu1 }
 0xbfd   :  { %v3182_v16 = vadd.f32 %v3181_v21, %v7891_v54  ;;  %v3183_v39 = vpop.f32.mrb[101].mxu0  ;;  %v3224_v15 = vpop.f32.mrb[101].mxu1  ;;  %v3223_v33 = vadd.f32 %v3222_v22, %v7892_v58 }
 0xbfe   :  { %v3184_v62 = vadd.f32 %v3183_v39, %v7893_v53  ;;  %v3185_v28 = vpop.f32.mrb[102].mxu0  ;;  %v3226_v49 = vpop.f32.mrb[102].mxu1  ;;  %v3225_v52 = vadd.f32 %v3224_v15, %v7894_v4 }
 0xbff   :  { %3999 = vtanh.f32 %v3182_v16  ;;  %v3186_v48 = vpop.f32.mrb[103].mxu0  ;;  %v3227_v14 = vpop.f32.mrb[103].mxu1  ;;  %v3247_v59 = vmul.f32 0.5, %v3223_v33 }
 0xc00   :  { %4001 = vtanh.f32 %v3184_v62  ;;  %v3248_v29 = vmul.f32 0.5, %v3225_v52 }
 0xc01   :  { %4003 = vtanh.f32 %v3247_v59 }
 0xc02   :  { %4005 = vtanh.f32 %v3248_v29 }
 0xc09   :  { %v4000_v25 = vpop.eup %3999 }
 0xc0a   :  { %v4002_v37 = vpop.eup %4001  ;;  %v3257_v19 = vmul.f32 %v4000_v25, %v3235_v60 }
 0xc0b   :  { %v3258_v30 = vmul.f32 %v4002_v37, %v3236_v57  ;;  %v4004_v63 = vpop.eup %4003 }
 0xc0c   :  { %v3259_v27 = vadd.f32 %v3257_v19, %v3255_v24  ;;  %v4006_v26 = vpop.eup %4005  ;;  %v3251_v5 = vmul.f32 0.5, %v4004_v63 }
 0xc0d   :  { %v3260_v55 = vadd.f32 %v3258_v30, %v3256_v34  ;;  %v3252_v61 = vmul.f32 0.5, %v4006_v26 }
 0xc0e   :  { %4007 = vtanh.f32 %v3259_v27  ;;  %v3253_v7 = vadd.f32 0.5, %v3251_v5 }
 0xc0f   :  { %4009 = vtanh.f32 %v3260_v55  ;;  %v3254_v3 = vadd.f32 0.5, %v3252_v61 }
 0xc18   :  { %v4008_v1 = vpop.eup %4007 }
 0xc19   :  { %v4010_v20 = vpop.eup %4009  ;;  %v3263_v9 = vmul.f32 %v4008_v1, %v3253_v7 }
 0xc1a   :  { %v3264_v2 = vmul.f32 %v4010_v20, %v3254_v3 }
 0xc1c   :  { %3463 = vmatprep.mubr.f32.mxu1 %v3264_v2  ;;  %v3693_v44 = vpop.f32.mrb[104].mxu0 }
 0xc1d   :  { %3464 = vmatmul.mubr.f32.vlgmr.msra.gmra.mrb[104].mxu1 %v3263_v9  ;;  %v3694_v13 = vpop.f32.mrb[105].mxu0 }
 0xc1e   :  { %v3695_v8 = vadd.f32 %v3694_v13, %v3693_v44 }
 0xcf0   :  { %v3728_v10 = vpop.f32.mrb[104].mxu1 }
 0xcf1   :  { %v3729_v41 = vpop.f32.mrb[105].mxu1 }
 0xcf2   :  { %v3730_v31 = vadd.f32 %v3729_v41, %v3728_v10 }
 0xcf4   :  { %v3466_v40 = vadd.f32 %v3730_v31, %v3695_v8 }
 0xcf6   :  { %v3476_v46 = vadd.f32 %v3659_v17, %v3466_v40 }
 0xcf8   :  { %3477 = vst [vmem:[#allocation13] sm:$0xff] %v3476_v46 }
 0xcf9   :  { %4366 = shalt.err (!%p4363_p8)
}
 0xcfa   :  { %s4367_s11 = scalar_lea.hbm %s6795_s7, 128 }
 0xcfb   :  { %p4368_p9 = scmp.ne.s32.totalorder %s6795_s7, %s4367_s11  ;;  %p4371_p10 = scmp.lt.u32.totalorder %s4367_s11, %s6795_s7 }
 0xcfd   :  { %p4373_p11 = pnand %p4371_p10, %p4368_p9 }
 0xcff   :  { %4376 = shalt.err (!%p4373_p11)
}
 0xd00   :  { %3487 = dma.vmem_to_hbm [thread:$0]  %s3485_s30, 128, %s6795_s7, [#allocation7]  }
 0xd01   :  { %4385 = dma.done.wait [#allocation7], 128  }
 0xd02   :  { %4386 = vsyncadd [#allocation7], 4294967168 }
 0xd03   :  { %3491 = vsyncpa [#allocation6], 1 }
 0xd04   :  { %3492 = vsyncpa [#allocation9], 1 }
 0xd05   :  { %3493 = vsyncpa [#allocation12], 1 }
 0xd06   :  { %3494 = vsyncpa [#allocation7], 1 }
 0xd07   :  { %3495 = vsyncmov [#allocation4] }
 0xd0a   :  { %s3496_s17 = vpop.sfrf %3495 }
 0xd0b   :  { %p3660_p12 = scmp.ne.s32.totalorder %s3496_s17, 0 }
 0xd0d   :  { %3500 = shalt.err (%p3660_p12)  }

</bundles_post_ra>
